<compile_context>
chip_gen: v5e
topology: v5e:2x2
jax: 0.10.0
libtpu: 0.0.40
codegen_flags: <defaults>
</compile_context>

<pallas_src>
import functools

import jax
import jax.numpy as jnp
from jax.experimental import pallas as pl
from jax.experimental.pallas import tpu as pltpu

NUM_CLASSES = 10
FEAT_DIM = 2048        # ResNet-50 feature width consumed by the heads
STEM_CH = 64           # semantic stem conv width
STEM_PAD = 128         # lane-padded stem width used inside the kernel
HEAD_PAD = 128         # lane-padded fused head output width (num_classes + 4 -> 128)


def _round_up(x, m):
    return ((x + m - 1) // m) * m


def _pick_tile_h(H, W, max_rows=512):
    """Largest divisor of H whose band keeps TH*W matmul rows under budget."""
    # TODO(synk): mask a ragged tail tile instead of requiring TH | H.
    th = 1
    for cand in range(1, H + 1):
        if H % cand == 0 and cand * W <= max_rows:
            th = cand
    return th


# --------------------------------------------------------------------------
# Fused stem conv + GAP + projection + heads kernel
# --------------------------------------------------------------------------
def _stem_head_kernel(x_ref, w_stem_ref, b_stem_ref, w_proj_ref, b_proj_ref,
                      w_heads_ref, b_heads_ref, out_ref, pooled_ref,
                      *, H, W, C, TH, KPAD):
    """One (batch, row-band) grid step.

    x_ref       : (H, W, C)            full NHWC image of one batch (f32, resident)
    w_stem_ref  : (KPAD, STEM_PAD)     im2col stem weight, (tap, chan) rows (bf16)
    b_stem_ref  : (1, STEM_PAD)        stem bias (f32)
    w_proj_ref  : (STEM_PAD, FEAT_DIM) projection weight (bf16)
    b_proj_ref  : (1, FEAT_DIM)        projection bias (f32)
    w_heads_ref : (FEAT_DIM, HEAD_PAD) [classifier | bbox | 0] weight (bf16)
    b_heads_ref : (1, HEAD_PAD)        fused head bias (f32)
    out_ref     : (1, HEAD_PAD)        fused head output for this batch (f32)
    pooled_ref  : (1, STEM_PAD)        VMEM scratch: GAP accumulator (f32)
    """
    r = pl.program_id(1)
    n_r = pl.num_programs(1)
    row0 = r * TH

    @pl.when(r == 0)
    def _init():
        pooled_ref[...] = jnp.zeros_like(pooled_ref)

    # ---- halo band (TH+2, W+2, C): loaded once per band, zero borders in-VMEM
    core = x_ref[pl.ds(row0, TH)]                                   # (TH, W, C)
    top = x_ref[pl.ds(jnp.maximum(row0 - 1, 0), 1)]                 # (1, W, C)
    bot = x_ref[pl.ds(jnp.minimum(row0 + TH, H - 1), 1)]            # (1, W, C)
    top = top * (r > 0).astype(jnp.float32)                         # zero image border
    bot = bot * (r < n_r - 1).astype(jnp.float32)
    band = jnp.concatenate([top, core, bot], axis=0)                # (TH+2, W, C)
    zcol = jnp.zeros((TH + 2, 1, C), jnp.float32)
    band = jnp.concatenate([zcol, band, zcol], axis=1)              # (TH+2, W+2, C)

    # ---- im2col: (TH*W, KPAD) slab, K order = (dy, dx, channel) -> one matmul
    taps = [band[dy:dy + TH, dx:dx + W, :] for dy in range(3) for dx in range(3)]
    if KPAD > 9 * C:
        taps.append(jnp.zeros((TH, W, KPAD - 9 * C), jnp.float32))
    slab = jnp.concatenate(taps, axis=-1).reshape(TH * W, KPAD)
    slab = slab.astype(jnp.bfloat16)                                # single cast

    act = jnp.dot(slab, w_stem_ref[...], preferred_element_type=jnp.float32)
    act = jnp.maximum(act + b_stem_ref[...], 0.0)                   # (TH*W, 128) f32
    pooled_ref[...] += jnp.sum(act, axis=0, keepdims=True)          # (1, 128) lane-dense

    # ---- finalize: GAP normalize + projection + fused classifier/bbox heads
    @pl.when(r == n_r - 1)
    def _finalize():
        pooled = pooled_ref[...] * (1.0 / float(H * W))             # (1, 128) f32
        feats = jnp.dot(pooled.astype(jnp.bfloat16), w_proj_ref[...],
                        preferred_element_type=jnp.float32)
        feats = jnp.maximum(feats + b_proj_ref[...], 0.0)           # (1, FEAT_DIM)
        heads = jnp.dot(feats.astype(jnp.bfloat16), w_heads_ref[...],
                        preferred_element_type=jnp.float32)
        out_ref[...] = heads + b_heads_ref[...]                     # (1, HEAD_PAD)


# --------------------------------------------------------------------------
# Params
# --------------------------------------------------------------------------
def init_params(key, num_classes=NUM_CLASSES, in_ch=3):
    ks = jax.random.split(key, 8)
    s = 0.02
    return {
        # stem conv weight indexed as [3*dy+dx, c, n]
        "w_stem": s * jax.random.normal(ks[0], (9, in_ch, STEM_CH), jnp.float32),
        "b_stem": s * jax.random.normal(ks[1], (STEM_CH,), jnp.float32),
        "w_proj": s * jax.random.normal(ks[2], (STEM_CH, FEAT_DIM), jnp.float32),
        "b_proj": s * jax.random.normal(ks[3], (FEAT_DIM,), jnp.float32),
        # nn.Linear stores (out, in); we keep the transposed (in, out) layout
        "w_cls": s * jax.random.normal(ks[4], (FEAT_DIM, num_classes), jnp.float32),
        "b_cls": s * jax.random.normal(ks[5], (num_classes,), jnp.float32),
        "w_box": s * jax.random.normal(ks[6], (FEAT_DIM, 4), jnp.float32),
        "b_box": s * jax.random.normal(ks[7], (4,), jnp.float32),
    }


def _prepare(params, num_classes, in_ch, kpad):
    """Reshape / zero-pad / bf16-cast the weights into kernel-friendly layouts."""
    # stem: (9, C, 64) -> (9*C, 64), rows ordered (tap, channel) -> pad to (KPAD, 128)
    w_stem = params["w_stem"].reshape(9 * in_ch, STEM_CH)
    w_stem = jnp.pad(w_stem, ((0, kpad - 9 * in_ch), (0, STEM_PAD - STEM_CH)))
    b_stem = jnp.pad(params["b_stem"], (0, STEM_PAD - STEM_CH)).reshape(1, STEM_PAD)
    # projection: zero rows for the padded stem channels keep the result exact
    w_proj = jnp.pad(params["w_proj"], ((0, STEM_PAD - STEM_CH), (0, 0)))
    b_proj = params["b_proj"].reshape(1, FEAT_DIM)
    # fused lane-dense head: [classifier | bbox | zeros] -> (FEAT_DIM, 128)
    pad = HEAD_PAD - (num_classes + 4)
    w_heads = jnp.pad(jnp.concatenate([params["w_cls"], params["w_box"]], axis=1),
                      ((0, 0), (0, pad)))
    b_heads = jnp.pad(jnp.concatenate([params["b_cls"], params["b_box"]]),
                      (0, pad)).reshape(1, HEAD_PAD)
    return (w_stem.astype(jnp.bfloat16), b_stem,
            w_proj.astype(jnp.bfloat16), b_proj,
            w_heads.astype(jnp.bfloat16), b_heads)


# --------------------------------------------------------------------------
# Forward
# --------------------------------------------------------------------------
@functools.partial(jax.jit, static_argnames=("num_classes",))
def object_detection_forward(x_nchw, params, num_classes=NUM_CLASSES):
    """Forward pass. x_nchw: (B, C, H, W) float32 -> (classes, bboxes)."""
    B, C, H, W = x_nchw.shape
    KPAD = _round_up(9 * C, 8)
    TH = _pick_tile_h(H, W)
    n_r = H // TH

    (w_stem, b_stem, w_proj, b_proj, w_heads, b_heads) = _prepare(
        params, num_classes, C, KPAD)

    # Single layout pass: NHWC puts the (tap, channel) contraction in lanes.
    # No jnp.pad pass — the zero border is synthesized inside the kernel.
    x_nhwc = jnp.transpose(x_nchw, (0, 2, 3, 1))

    kernel = functools.partial(_stem_head_kernel, H=H, W=W, C=C, TH=TH, KPAD=KPAD)
    out3 = pl.pallas_call(
        kernel,
        out_shape=jax.ShapeDtypeStruct((B, 1, HEAD_PAD), jnp.float32),
        grid_spec=pltpu.PrefetchScalarGridSpec(
            num_scalar_prefetch=0,
            grid=(B, n_r),
            in_specs=[
                # image: one batch resident across all of its row bands
                pl.BlockSpec((None, H, W, C), lambda b, r: (b, 0, 0, 0)),
                pl.BlockSpec((KPAD, STEM_PAD), lambda b, r: (0, 0)),
                pl.BlockSpec((1, STEM_PAD), lambda b, r: (0, 0)),
                pl.BlockSpec((STEM_PAD, FEAT_DIM), lambda b, r: (0, 0)),
                pl.BlockSpec((1, FEAT_DIM), lambda b, r: (0, 0)),
                pl.BlockSpec((FEAT_DIM, HEAD_PAD), lambda b, r: (0, 0)),
                pl.BlockSpec((1, HEAD_PAD), lambda b, r: (0, 0)),
            ],
            # head output block revisited across row bands; written at finalize
            out_specs=pl.BlockSpec((None, 1, HEAD_PAD), lambda b, r: (b, 0, 0)),
            scratch_shapes=[pltpu.VMEM((1, STEM_PAD), jnp.float32)],
        ),
        compiler_params=pltpu.CompilerParams(
            dimension_semantics=("parallel", "arbitrary"),
            vmem_limit_bytes=32 * 1024 * 1024),
    )(x_nhwc, w_stem, b_stem, w_proj, b_proj, w_heads, b_heads)

    out = out3[:, 0, :]
    classes = out[:, :num_classes]
    bboxes = out[:, num_classes:num_classes + 4]
    return classes, bboxes


# --------------------------------------------------------------------------
# Pure-JAX reference (f32) for correctness checking
# --------------------------------------------------------------------------
def _reference_forward(x_nchw, params, num_classes=NUM_CLASSES):
    B, C, H, W = x_nchw.shape
    xp = jnp.pad(x_nchw, ((0, 0), (0, 0), (1, 1), (1, 1)))
    cols = jnp.stack([xp[:, :, dy:dy + H, dx:dx + W]
                      for dy in range(3) for dx in range(3)], axis=1)   # (B,9,C,H,W)
    conv = jnp.einsum("btchw,tcn->bnhw", cols, params["w_stem"])
    act = jnp.maximum(conv + params["b_stem"][None, :, None, None], 0.0)
    pooled = act.mean(axis=(2, 3))                                       # (B, 64)
    feats = jnp.maximum(pooled @ params["w_proj"] + params["b_proj"], 0.0)
    classes = feats @ params["w_cls"] + params["b_cls"]
    bboxes = feats @ params["w_box"] + params["b_box"]
    return classes, bboxes


if __name__ == "__main__":
    x = jax.random.normal(jax.random.PRNGKey(0), (2, 3, 16, 16), dtype=jnp.float32)
    params = init_params(jax.random.PRNGKey(42))

    classes, bboxes = object_detection_forward(x, params)
    jax.block_until_ready((classes, bboxes))

    assert classes.shape == (2, NUM_CLASSES), classes.shape
    assert bboxes.shape == (2, 4), bboxes.shape
    assert bool(jnp.all(jnp.isfinite(classes))) and bool(jnp.all(jnp.isfinite(bboxes)))

    ref_c, ref_b = _reference_forward(x, params)
    assert float(jnp.max(jnp.abs(classes - ref_c))) < 1e-2, "classes mismatch"
    assert float(jnp.max(jnp.abs(bboxes - ref_b))) < 1e-2, "bboxes mismatch"
    print("KERNEL_OK")
</pallas_src>

<mosaic_0001>
module attributes {stable_mosaic.version = 11 : i64} {
  func.func @_stem_head_kernel(%arg0: i32, %arg1: i32, %arg2: memref<1x16x16x3xf32, #tpu.memory_space<vmem>>, %arg3: memref<32x128xbf16, #tpu.memory_space<vmem>>, %arg4: memref<1x128xf32, #tpu.memory_space<vmem>>, %arg5: memref<128x2048xbf16, #tpu.memory_space<vmem>>, %arg6: memref<1x2048xf32, #tpu.memory_space<vmem>>, %arg7: memref<2048x128xbf16, #tpu.memory_space<vmem>>, %arg8: memref<1x128xf32, #tpu.memory_space<vmem>>, %arg9: memref<1x1x128xf32, #tpu.memory_space<vmem>>, %arg10: memref<1x128xf32, #tpu.memory_space<vmem>>) attributes {dimension_semantics = [#tpu.dimension_semantics<parallel>, #tpu.dimension_semantics<arbitrary>], iteration_bounds = array<i64: 2, 1>, scalar_prefetch = 0 : i64, scratch_operands = 1 : i64, tpu.core_type = #tpu.core_type<tc>, window_params = [{transform_indices = @transform_0, window_bounds = array<i64: 1, 16, 16, 3>}, {pipeline_mode = #tpu.pipeline_mode<synchronous>, transform_indices = @transform_1, window_bounds = array<i64: 32, 128>}, {pipeline_mode = #tpu.pipeline_mode<synchronous>, transform_indices = @transform_2, window_bounds = array<i64: 1, 128>}, {pipeline_mode = #tpu.pipeline_mode<synchronous>, transform_indices = @transform_3, window_bounds = array<i64: 128, 2048>}, {pipeline_mode = #tpu.pipeline_mode<synchronous>, transform_indices = @transform_4, window_bounds = array<i64: 1, 2048>}, {pipeline_mode = #tpu.pipeline_mode<synchronous>, transform_indices = @transform_5, window_bounds = array<i64: 2048, 128>}, {pipeline_mode = #tpu.pipeline_mode<synchronous>, transform_indices = @transform_6, window_bounds = array<i64: 1, 128>}, {transform_indices = @transform_7, window_bounds = array<i64: 1, 1, 128>}]} {
    %c16_i32 = arith.constant 16 : i32
    %0 = arith.muli %arg1, %c16_i32 : i32
    %c0_i32 = arith.constant 0 : i32
    %1 = arith.cmpi eq, %arg1, %c0_i32 : i32
    %2 = arith.extui %1 : i1 to i32
    %c0_i32_0 = arith.constant 0 : i32
    %3 = arith.cmpi ne, %2, %c0_i32_0 : i32
    scf.if %3 {
      %cst_27 = arith.constant 0.000000e+00 : f32
      %58 = vector.broadcast %cst_27 : f32 to vector<1x128xf32>
      %c0_28 = arith.constant 0 : index
      %c0_29 = arith.constant 0 : index
      %59 = vector.load %arg10[%c0_28, %c0_29] : memref<1x128xf32, #tpu.memory_space<vmem>>, vector<1x128xf32>
      tpu.vector_store %arg10[%c0_28, %c0_29], %58 {strides = array<i32>} : memref<1x128xf32, #tpu.memory_space<vmem>>, vector<1x128xf32>,
    } else {
    }
    %c0 = arith.constant 0 : index
    %4 = arith.index_cast %0 : i32 to index
    %c0_1 = arith.constant 0 : index
    %c0_2 = arith.constant 0 : index
    %5 = vector.load %arg2[%c0, %4, %c0_1, %c0_2] : memref<1x16x16x3xf32, #tpu.memory_space<vmem>>, vector<1x16x16x3xf32>
    %6 = vector.shape_cast %5 : vector<1x16x16x3xf32> to vector<16x16x3xf32>
    %c1_i32 = arith.constant 1 : i32
    %7 = arith.subi %0, %c1_i32 : i32
    %c0_i32_3 = arith.constant 0 : i32
    %8 = arith.maxsi %7, %c0_i32_3 : i32
    %c0_4 = arith.constant 0 : index
    %9 = arith.index_cast %8 : i32 to index
    %c0_5 = arith.constant 0 : index
    %c0_6 = arith.constant 0 : index
    %10 = vector.load %arg2[%c0_4, %9, %c0_5, %c0_6] : memref<1x16x16x3xf32, #tpu.memory_space<vmem>>, vector<1x1x16x3xf32>
    %11 = vector.shape_cast %10 : vector<1x1x16x3xf32> to vector<1x16x3xf32>
    %c16_i32_7 = arith.constant 16 : i32
    %12 = arith.addi %0, %c16_i32_7 : i32
    %c15_i32 = arith.constant 15 : i32
    %13 = arith.minsi %12, %c15_i32 : i32
    %c0_8 = arith.constant 0 : index
    %14 = arith.index_cast %13 : i32 to index
    %c0_9 = arith.constant 0 : index
    %c0_10 = arith.constant 0 : index
    %15 = vector.load %arg2[%c0_8, %14, %c0_9, %c0_10] : memref<1x16x16x3xf32, #tpu.memory_space<vmem>>, vector<1x1x16x3xf32>
    %16 = vector.shape_cast %15 : vector<1x1x16x3xf32> to vector<1x16x3xf32>
    %c0_i32_11 = arith.constant 0 : i32
    %17 = arith.cmpi sgt, %arg1, %c0_i32_11 : i32
    %18 = arith.extui %17 : i1 to i32
    %19 = arith.sitofp %18 : i32 to f32
    %20 = vector.broadcast %19 : f32 to vector<1x16x3xf32>
    %21 = arith.mulf %11, %20 : vector<1x16x3xf32>
    %c0_i32_12 = arith.constant 0 : i32
    %22 = arith.cmpi slt, %arg1, %c0_i32_12 : i32
    %23 = arith.extui %22 : i1 to i32
    %24 = arith.sitofp %23 : i32 to f32
    %25 = vector.broadcast %24 : f32 to vector<1x16x3xf32>
    %26 = arith.mulf %16, %25 : vector<1x16x3xf32>
    %27 = tpu.concatenate %21, %6, %26 in 0 : vector<1x16x3xf32>, vector<16x16x3xf32>, vector<1x16x3xf32> -> vector<18x16x3xf32>
    %cst = arith.constant 0.000000e+00 : f32
    %28 = vector.broadcast %cst : f32 to vector<18x1x3xf32>
    %29 = tpu.concatenate %28, %27, %28 in 1 : vector<18x1x3xf32>, vector<18x16x3xf32>, vector<18x1x3xf32> -> vector<18x18x3xf32>
    %30 = vector.extract_strided_slice %29 {offsets = [0, 0, 0], sizes = [16, 16, 3], strides = [1, 1, 1]} : vector<18x18x3xf32> to vector<16x16x3xf32>
    %31 = vector.extract_strided_slice %29 {offsets = [0, 1, 0], sizes = [16, 16, 3], strides = [1, 1, 1]} : vector<18x18x3xf32> to vector<16x16x3xf32>
    %32 = vector.extract_strided_slice %29 {offsets = [0, 2, 0], sizes = [16, 16, 3], strides = [1, 1, 1]} : vector<18x18x3xf32> to vector<16x16x3xf32>
    %33 = vector.extract_strided_slice %29 {offsets = [1, 0, 0], sizes = [16, 16, 3], strides = [1, 1, 1]} : vector<18x18x3xf32> to vector<16x16x3xf32>
    %34 = vector.extract_strided_slice %29 {offsets = [1, 1, 0], sizes = [16, 16, 3], strides = [1, 1, 1]} : vector<18x18x3xf32> to vector<16x16x3xf32>
    %35 = vector.extract_strided_slice %29 {offsets = [1, 2, 0], sizes = [16, 16, 3], strides = [1, 1, 1]} : vector<18x18x3xf32> to vector<16x16x3xf32>
    %36 = vector.extract_strided_slice %29 {offsets = [2, 0, 0], sizes = [16, 16, 3], strides = [1, 1, 1]} : vector<18x18x3xf32> to vector<16x16x3xf32>
    %37 = vector.extract_strided_slice %29 {offsets = [2, 1, 0], sizes = [16, 16, 3], strides = [1, 1, 1]} : vector<18x18x3xf32> to vector<16x16x3xf32>
    %38 = vector.extract_strided_slice %29 {offsets = [2, 2, 0], sizes = [16, 16, 3], strides = [1, 1, 1]} : vector<18x18x3xf32> to vector<16x16x3xf32>
    %cst_13 = arith.constant 0.000000e+00 : f32
    %39 = vector.broadcast %cst_13 : f32 to vector<16x16x5xf32>
    %40 = tpu.concatenate %30, %31, %32, %33, %34, %35, %36, %37, %38, %39 in 2 : vector<16x16x3xf32>, vector<16x16x3xf32>, vector<16x16x3xf32>, vector<16x16x3xf32>, vector<16x16x3xf32>, vector<16x16x3xf32>, vector<16x16x3xf32>, vector<16x16x3xf32>, vector<16x16x3xf32>, vector<16x16x5xf32> -> vector<16x16x32xf32>
    %41 = vector.shape_cast %40 : vector<16x16x32xf32> to vector<256x32xf32>
    %42 = arith.truncf %41 : vector<256x32xf32> to vector<256x32xbf16>
    %c0_14 = arith.constant 0 : index
    %c0_15 = arith.constant 0 : index
    %43 = vector.load %arg3[%c0_14, %c0_15] : memref<32x128xbf16, #tpu.memory_space<vmem>>, vector<32x128xbf16>
    %cst_16 = arith.constant dense<0.000000e+00> : vector<256x128xf32>
    %44 = tpu.matmul %42, %43, %cst_16 {dimension_numbers = #tpu.dot_dimension_numbers<[1], [0], [0], [1], [0, 0, 1, 1], [], []>} : vector<256x32xbf16>, vector<32x128xbf16>, vector<256x128xf32> -> vector<256x128xf32>
    %c0_17 = arith.constant 0 : index
    %c0_18 = arith.constant 0 : index
    %45 = vector.load %arg4[%c0_17, %c0_18] : memref<1x128xf32, #tpu.memory_space<vmem>>, vector<1x128xf32>
    %46 = vector.broadcast %45 : vector<1x128xf32> to vector<256x128xf32>
    %47 = arith.addf %44, %46 : vector<256x128xf32>
    %cst_19 = arith.constant 0.000000e+00 : f32
    %48 = vector.broadcast %cst_19 : f32 to vector<256x128xf32>
    %49 = arith.maximumf %47, %48 : vector<256x128xf32>
    %c0_20 = arith.constant 0 : index
    %c0_21 = arith.constant 0 : index
    %50 = vector.load %arg10[%c0_20, %c0_21] : memref<1x128xf32, #tpu.memory_space<vmem>>, vector<1x128xf32>
    %cst_22 = arith.constant dense<0.000000e+00> : vector<128xf32>
    %51 = vector.multi_reduction <add>, %49, %cst_22 [0] : vector<256x128xf32> to vector<128xf32>
    %52 = vector.shape_cast %51 : vector<128xf32> to vector<1x128xf32>
    %53 = arith.addf %50, %52 : vector<1x128xf32>
    %c0_23 = arith.constant 0 : index
    %c0_24 = arith.constant 0 : index
    %54 = vector.load %arg10[%c0_23, %c0_24] : memref<1x128xf32, #tpu.memory_space<vmem>>, vector<1x128xf32>
    tpu.vector_store %arg10[%c0_23, %c0_24], %53 {strides = array<i32>} : memref<1x128xf32, #tpu.memory_space<vmem>>, vector<1x128xf32>,
    %c0_i32_25 = arith.constant 0 : i32
    %55 = arith.cmpi eq, %arg1, %c0_i32_25 : i32
    %56 = arith.extui %55 : i1 to i32
    %c0_i32_26 = arith.constant 0 : i32
    %57 = arith.cmpi ne, %56, %c0_i32_26 : i32
    scf.if %57 {
      %c0_27 = arith.constant 0 : index
      %c0_28 = arith.constant 0 : index
      %58 = vector.load %arg10[%c0_27, %c0_28] : memref<1x128xf32, #tpu.memory_space<vmem>>, vector<1x128xf32>
      %cst_29 = arith.constant 3.906250e-03 : f32
      %59 = vector.broadcast %cst_29 : f32 to vector<1x128xf32>
      %60 = arith.mulf %58, %59 : vector<1x128xf32>
      %61 = arith.truncf %60 : vector<1x128xf32> to vector<1x128xbf16>
      %c0_30 = arith.constant 0 : index
      %c0_31 = arith.constant 0 : index
      %62 = vector.load %arg5[%c0_30, %c0_31] : memref<128x2048xbf16, #tpu.memory_space<vmem>>, vector<128x2048xbf16>
      %cst_32 = arith.constant dense<0.000000e+00> : vector<1x2048xf32>
      %63 = tpu.matmul %61, %62, %cst_32 {dimension_numbers = #tpu.dot_dimension_numbers<[1], [0], [0], [1], [0, 0, 1, 1], [], []>} : vector<1x128xbf16>, vector<128x2048xbf16>, vector<1x2048xf32> -> vector<1x2048xf32>
      %c0_33 = arith.constant 0 : index
      %c0_34 = arith.constant 0 : index
      %64 = vector.load %arg6[%c0_33, %c0_34] : memref<1x2048xf32, #tpu.memory_space<vmem>>, vector<1x2048xf32>
      %65 = arith.addf %63, %64 : vector<1x2048xf32>
      %cst_35 = arith.constant 0.000000e+00 : f32
      %66 = vector.broadcast %cst_35 : f32 to vector<1x2048xf32>
      %67 = arith.maximumf %65, %66 : vector<1x2048xf32>
      %68 = arith.truncf %67 : vector<1x2048xf32> to vector<1x2048xbf16>
      %c0_36 = arith.constant 0 : index
      %c0_37 = arith.constant 0 : index
      %69 = vector.load %arg7[%c0_36, %c0_37] : memref<2048x128xbf16, #tpu.memory_space<vmem>>, vector<2048x128xbf16>
      %cst_38 = arith.constant dense<0.000000e+00> : vector<1x128xf32>
      %70 = tpu.matmul %68, %69, %cst_38 {dimension_numbers = #tpu.dot_dimension_numbers<[1], [0], [0], [1], [0, 0, 1, 1], [], []>} : vector<1x2048xbf16>, vector<2048x128xbf16>, vector<1x128xf32> -> vector<1x128xf32>
      %c0_39 = arith.constant 0 : index
      %c0_40 = arith.constant 0 : index
      %71 = vector.load %arg8[%c0_39, %c0_40] : memref<1x128xf32, #tpu.memory_space<vmem>>, vector<1x128xf32>
      %72 = arith.addf %70, %71 : vector<1x128xf32>
      %c0_41 = arith.constant 0 : index
      %c0_42 = arith.constant 0 : index
      %c0_43 = arith.constant 0 : index
      %73 = vector.load %arg9[%c0_41, %c0_42, %c0_43] : memref<1x1x128xf32, #tpu.memory_space<vmem>>, vector<1x1x128xf32>
      %74 = vector.shape_cast %73 : vector<1x1x128xf32> to vector<1x128xf32>
      %75 = vector.shape_cast %72 : vector<1x128xf32> to vector<1x1x128xf32>
      tpu.vector_store %arg9[%c0_41, %c0_42, %c0_43], %75 {strides = array<i32>} : memref<1x1x128xf32, #tpu.memory_space<vmem>>, vector<1x1x128xf32>,
    } else {
    }
    return
  }
  func.func @transform_0(%arg0: i32, %arg1: i32) -> (i32, i32, i32, i32) {
    %c0_i32 = arith.constant 0 : i32
    %c0_i32_0 = arith.constant 0 : i32
    %c0_i32_1 = arith.constant 0 : i32
    %c0_i32_2 = arith.constant 0 : i32
    return %arg0, %c0_i32, %c0_i32_0, %c0_i32_1 : i32, i32, i32, i32
  }
  func.func @transform_1(%arg0: i32, %arg1: i32) -> (i32, i32) {
    %c0_i32 = arith.constant 0 : i32
    %c0_i32_0 = arith.constant 0 : i32
    %c0_i32_1 = arith.constant 0 : i32
    return %c0_i32, %c0_i32_0 : i32, i32
  }
  func.func @transform_2(%arg0: i32, %arg1: i32) -> (i32, i32) {
    %c0_i32 = arith.constant 0 : i32
    %c0_i32_0 = arith.constant 0 : i32
    %c0_i32_1 = arith.constant 0 : i32
    return %c0_i32, %c0_i32_0 : i32, i32
  }
  func.func @transform_3(%arg0: i32, %arg1: i32) -> (i32, i32) {
    %c0_i32 = arith.constant 0 : i32
    %c0_i32_0 = arith.constant 0 : i32
    %c0_i32_1 = arith.constant 0 : i32
    return %c0_i32, %c0_i32_0 : i32, i32
  }
  func.func @transform_4(%arg0: i32, %arg1: i32) -> (i32, i32) {
    %c0_i32 = arith.constant 0 : i32
    %c0_i32_0 = arith.constant 0 : i32
    %c0_i32_1 = arith.constant 0 : i32
    return %c0_i32, %c0_i32_0 : i32, i32
  }
  func.func @transform_5(%arg0: i32, %arg1: i32) -> (i32, i32) {
    %c0_i32 = arith.constant 0 : i32
    %c0_i32_0 = arith.constant 0 : i32
    %c0_i32_1 = arith.constant 0 : i32
    return %c0_i32, %c0_i32_0 : i32, i32
  }
  func.func @transform_6(%arg0: i32, %arg1: i32) -> (i32, i32) {
    %c0_i32 = arith.constant 0 : i32
    %c0_i32_0 = arith.constant 0 : i32
    %c0_i32_1 = arith.constant 0 : i32
    return %c0_i32, %c0_i32_0 : i32, i32
  }
  func.func @transform_7(%arg0: i32, %arg1: i32) -> (i32, i32, i32) {
    %c0_i32 = arith.constant 0 : i32
    %c0_i32_0 = arith.constant 0 : i32
    %c0_i32_1 = arith.constant 0 : i32
    return %arg0, %c0_i32, %c0_i32_0 : i32, i32, i32
  }
}

</mosaic_0001>

<bundles_post_ra>
// kernel: object_detection_forward.1
= control target key start
LH: loop header
LB: loop body
LE: loop exit
PB: predicated region body
PF: predicated region fallthrough
CT: control target
= control target key end

     0   :  { %s6473_s24 = smov 0   ;;  %s6475_s25 = smov 0   ;;  %s8868_s0 = inlined_call_operand.vmem [shape: f32[2,16,16,3], index: 0, kind: input, shape index: {}]   ;;  %s8869_s1 = inlined_call_operand.vmem [shape: bf16[32,128], index: 1, kind: input, shape index: {}]   ;;  %s8870_s2 = inlined_call_operand.vmem [shape: f32[1,128], index: 2, kind: input, shape index: {}]   ;;  %s8871_s3 = inlined_call_operand.vmem [shape: bf16[128,2048], index: 3, kind: input, shape index: {}]   ;;  %s8872_s4 = inlined_call_operand.vmem [shape: f32[1,2048], index: 4, kind: input, shape index: {}]   ;;  %s8873_s5 = inlined_call_operand.vmem [shape: bf16[2048,128], index: 5, kind: input, shape index: {}]   ;;  %s8874_s6 = inlined_call_operand.vmem [shape: f32[1,128], index: 6, kind: input, shape index: {}]   ;;  %s8875_s7 = inlined_call_operand.vmem [shape: f32[2,1,128], index: 7, kind: output, shape index: {}]  }
   0x1   :  { %s6477_s26 = smov 0  }
   0x2 LB: > { %s29_s27 = sadd.s32 1, %s6418_s25  ;;  %p4411_p0 = scmp.ge.s32.totalorder %s6422_s26, 1  ;;  %s6422_s26 = sphi %s6477_s26, %s17_s26   ;;  %s6418_s25 = sphi %s6475_s25, %s8877_s25   ;;  %s6414_s24 = sphi %s6473_s24, %s8876_s24  }
   0x3   : > { %p31_p1 = scmp.ge.s32.totalorder %s29_s27, 2  ;;  %p249_p2 = scmp.lt.s32.totalorder %s6422_s26, 3 }
   0x5   : > { %s8879_s27 = smov (%p31_p1, %s29_s27), 0  ;;  %p250_p3 = pnand %p4411_p0, %p249_p2 }
   0x6   : > { %p279_p4 = scmp.lt.s32.totalorder (!%p250_p3), %s6414_s24, 1  ;;  %s6424_s9 = smov (!%p250_p3), 9  }
   0x7   : > { %253 = sbr.rel (%p250_p3) target bundleno = 1050 (0x41a), region = 48  ;;  %s6425_s10 = smov (!%p250_p3), 3  }
   0x8   : > { %s6426_s11 = smov (!%p250_p3), 12   ;;  %s6427_s12 = smov (!%p250_p3), 18  }
   0x9   : > { %s6428_s13 = smov (!%p250_p3), 6   ;;  %s6429_s14 = smov (!%p250_p3), 24  }
   0xa   : > { %s6430_s15 = smov (!%p250_p3), 15   ;;  %s6431_s16 = smov (!%p250_p3), 21  }
   0xc   : > { %s8881_s24 = smov (!%p279_p4, %s6414_s24), 1  ;;  %vm390_vm0 = vcmask 1040384   ;;  %vm565_vm1 = vcmask 1046528   ;;  %vm742_vm2 = vcmask 1045504   ;;  %vm1519_vm3 = vcmask 23552  }
   0xd   : > { %s5466_s28 = sshll.u32 %s8881_s24, 8  ;;  %vm1552_vm4 = vcmask 48128   ;;  %vm1585_vm5 = vcmask 72704   ;;  %vm1618_vm6 = vcmask 97280   ;;  %vm1651_vm7 = vcmask 121856   ;;  %s286_s22 = scalar_lea.vmem %s8875_s7, %s8881_s24 }
   0xe   : > { %s6497_s8 = scalar_lea.vmem %s8868_s0, %s5466_s28  ;;  %vm1684_vm8 = vcmask 146432   ;;  %vm1717_vm9 = vcmask 171008   ;;  %vm1750_vm10 = vcmask 195584   ;;  %vm1783_vm11 = vcmask 220160  }
   0xf   : > { %v333_v0 = vld [vmem:[%s6497_s8] sm:$0xff]  ;;  %v334_v1 = vld [vmem:[%s6497_s8 + $0x8] sm:$0xff]  ;;  %v298_v2 = vld [vmem:[%s6497_s8 + $0x10] sm:$0xff]  ;;  %vm1852_vm12 = vcmask 261120  }
  0x10   : > { %v346_v3 = vmul.f32 0.0, %v333_v0  ;;  %v347_v4 = vmul.f32 0.0, %v334_v1  ;;  %v394_v5 = vrot.slane %v333_v0, 7  ;;  %v395_v6 = vrot.slane %v334_v1, 7  ;;  %v299_v7 = vld [vmem:[%s6497_s8 + $0x18] sm:$0xff]  ;;  %v300_v59 = vld [vmem:[%s6497_s8 + $0x20] sm:$0xff] }
  0x11   : > { %v397_v8 = vrot.slane %v298_v2, 7  ;;  %v398_v9 = vrot.slane %v299_v7, 7  ;;  %v301_v60 = vld [vmem:[%s6497_s8 + $0x28] sm:$0xff]  ;;  %v400_v61 = vrot.slane %v300_v59, 7 }
  0x12   : > { %v391_v10 = vrot.slane %v346_v3, 7  ;;  %v392_v11 = vrot.slane %v347_v4, 7  ;;  %v6504_v12 = vsel %vm390_vm0, %v394_v5, %v395_v6  ;;  %v6507_v13 = vsel %vm390_vm0, 0.0, %v394_v5 }
  0x13   : > { %v5758_v14 = vpack.i.bf16 %v6504_v12, %v6507_v13  ;;  %v516_v15 = vsel %vm390_vm0, %v395_v6, 0.0  ;;  %v571_v16 = vrot.slane %v6507_v13, 1  ;;  %v572_v17 = vrot.slane %v6504_v12, 1 }
  0x14   : > { %v6515_v18 = vsel %vm390_vm0, %v391_v10, %v392_v11  ;;  %v6518_v19 = vsel %vm390_vm0, 0.0, %v391_v10  ;;  %v515_v20 = vsel %vm390_vm0, %v392_v11, 0.0  ;;  %v574_v21 = vrot.slane %v516_v15, 1  ;;  %v303_v10 = vld [vmem:[%s6497_s8 + $0x38] sm:$0xff] }
  0x15   : > { %v566_v22 = vrot.slane %v6518_v19, 1  ;;  %v567_v23 = vrot.slane %v6515_v18, 1  ;;  %v569_v24 = vrot.slane %v515_v20, 1  ;;  %v746_v25 = vrot.slane %v515_v20, 2  ;;  %5759 = vrot.lane.b32.xlu1 %v5758_v14, %s6424_s9 }
  0x16   : > { %v743_v26 = vrot.slane %v6518_v19, 2  ;;  %v744_v27 = vrot.slane %v6515_v18, 2  ;;  %v573_v28 = vsel %vm565_vm1, %v571_v16, %v572_v17  ;;  %v575_v29 = vsel %vm565_vm1, %v572_v17, %v574_v21 }
  0x17   : > { %v568_v30 = vsel %vm565_vm1, %v566_v22, %v567_v23  ;;  %v570_v31 = vsel %vm565_vm1, %v567_v23, %v569_v24  ;;  %v6531_v32 = vsel %vm390_vm0, %v397_v8, %v398_v9  ;;  %v6534_v34 = vsel %vm390_vm0, 0.0, %v397_v8 }
  0x18   : > { %v5778_v33 = vpack.i.bf16 %v570_v31, %v568_v30  ;;  %v745_v35 = vsel %vm742_vm2, %v743_v26, %v744_v27  ;;  %v5768_v36 = vpack.i.bf16 %v575_v29, %v573_v28  ;;  %v517_v37 = vsel %vm390_vm0, %v398_v9, 0.0  ;;  %v302_v9 = vld [vmem:[%s6497_s8 + $0x30] sm:$0xff] }
  0x19   : > { %v747_v38 = vsel %vm742_vm2, %v744_v27, %v746_v25  ;;  %v753_v39 = vrot.slane %v6534_v34, 2  ;;  %v754_v40 = vrot.slane %v6531_v32, 2  ;;  %v756_v41 = vrot.slane %v517_v37, 2 }
  0x1a   : > { %5779 = vrot.lane.b32.xlu0 %v5778_v33, %s6425_s10  ;;  %v5783_v42 = vpack.i.bf16 %v747_v38, %v745_v35  ;;  %v576_v43 = vrot.slane %v6534_v34, 1  ;;  %v577_v44 = vrot.slane %v6531_v32, 1  ;;  %v5763_v47 = vpack.i.bf16 %v6531_v32, %v6534_v34  ;;  %v304_v38 = vld [vmem:[%s6497_s8 + $0x40] sm:$0xff] }
  0x1b   : > { %v755_v45 = vsel %vm742_vm2, %v753_v39, %v754_v40  ;;  %v757_v46 = vsel %vm742_vm2, %v754_v40, %v756_v41  ;;  %v579_v48 = vrot.slane %v517_v37, 1  ;;  %v748_v49 = vrot.slane %v6507_v13, 2  ;;  %v305_v39 = vld [vmem:[%s6497_s8 + $0x48] sm:$0xff] }
  0x1c   : > { %v749_v50 = vrot.slane %v6504_v12, 2  ;;  %v751_v51 = vrot.slane %v516_v15, 2  ;;  %5764 = vrot.lane.b32.xlu2 %v5763_v47, %s6427_s12  ;;  %v5793_v52 = vpack.i.bf16 %v757_v46, %v755_v45  ;;  %v578_v53 = vsel %vm565_vm1, %v576_v43, %v577_v44 }
  0x1d   : > { %5769 = vrot.lane.b32.xlu1 %v5768_v36, %s6426_s11  ;;  %v580_v54 = vsel %vm565_vm1, %v577_v44, %v579_v48  ;;  %v401_v62 = vrot.slane %v301_v60, 7  ;;  %v6567_v0 = vsel %vm390_vm0, 0.0, %v400_v61  ;;  %v403_v17 = vrot.slane %v302_v9, 7 }
  0x1e   : > { %v750_v55 = vsel %vm742_vm2, %v748_v49, %v749_v50  ;;  %v752_v56 = vsel %vm742_vm2, %v749_v50, %v751_v51  ;;  %v5788_v57 = vpack.i.bf16 %v580_v54, %v578_v53  ;;  %v758_v3 = vrot.slane %v6567_v0, 2 }
  0x1f   : > { %v5803_v58 = vpack.i.bf16 %v752_v56, %v750_v55  ;;  %v6564_v63 = vsel %vm390_vm0, %v400_v61, %v401_v62  ;;  %v518_v2 = vsel %vm390_vm0, %v401_v62, 0.0  ;;  %v581_v6 = vrot.slane %v6567_v0, 1  ;;  %v306_v61 = vld [vmem:[%s6497_s8 + $0x50] sm:$0xff]  ;;  %v307_v62 = vld [vmem:[%s6497_s8 + $0x58] sm:$0xff] }
  0x20   : > { %v5823_v1 = vpack.i.bf16 %v6564_v63, %v6567_v0  ;;  %v759_v4 = vrot.slane %v6564_v63, 2  ;;  %v761_v5 = vrot.slane %v518_v2, 2  ;;  %v582_v7 = vrot.slane %v6564_v63, 1 }
  0x21   : > { %v584_v8 = vrot.slane %v518_v2, 1  ;;  %v404_v20 = vrot.slane %v303_v10, 7  ;;  %v6592_v24 = vsel %vm390_vm0, 0.0, %v403_v17  ;;  %v407_v43 = vrot.slane %v305_v39, 7 }
  0x22   : > { %5784 = vrot.lane.b32.xlu0 %v5783_v42, %s6428_s13  ;;  %v760_v11 = vsel %vm742_vm2, %v758_v3, %v759_v4  ;;  %v762_v14 = vsel %vm742_vm2, %v759_v4, %v761_v5  ;;  %v583_v15 = vsel %vm565_vm1, %v581_v6, %v582_v7  ;;  %v586_v26 = vrot.slane %v6592_v24, 1 }
  0x23   : > { %v585_v16 = vsel %vm565_vm1, %v582_v7, %v584_v8  ;;  %v5833_v22 = vpack.i.bf16 %v762_v14, %v760_v11  ;;  %v6589_v23 = vsel %vm390_vm0, %v403_v17, %v404_v20  ;;  %v519_v25 = vsel %vm390_vm0, %v404_v20, 0.0 }
  0x24   : > { %5774 = vrot.lane.b32.xlu2 %v5803_v58, %s6430_s15  ;;  %v5828_v21 = vpack.i.bf16 %v585_v16, %v583_v15  ;;  %v587_v27 = vrot.slane %v6589_v23, 1  ;;  %v589_v28 = vrot.slane %v519_v25, 1  ;;  %v5863_v33 = vpack.i.bf16 %v6589_v23, %v6592_v24  ;;  %v308_v15 = vld [vmem:[%s6497_s8 + $0x60] sm:$0xff]  ;;  %v309_v16 = vld [vmem:[%s6497_s8 + $0x68] sm:$0xff] }
  0x25   : > { %5794 = vrot.lane.b32.xlu1 %v5793_v52, %s6429_s14  ;;  %v763_v35 = vrot.slane %v6592_v24, 2  ;;  %v766_v37 = vrot.slane %v519_v25, 2  ;;  %v406_v42 = vrot.slane %v304_v38, 7  ;;  %v410_v2 = vrot.slane %v307_v62, 7 }
  0x26   : > { %v588_v29 = vsel %vm565_vm1, %v586_v26, %v587_v27  ;;  %v590_v30 = vsel %vm565_vm1, %v587_v27, %v589_v28  ;;  %v412_v26 = vrot.slane %v308_v15, 7  ;;  %v413_v27 = vrot.slane %v309_v16, 7  ;;  %v5468_v28 = vld [vmem:[%s8869_s1 + $0x8] sm:$0xff] }
  0x27   : > { %v5868_v31 = vpack.i.bf16 %v590_v30, %v588_v29  ;;  %v6617_v45 = vsel %vm390_vm0, %v406_v42, %v407_v43  ;;  %v6620_v46 = vsel %vm390_vm0, 0.0, %v406_v42  ;;  %v521_v6 = vsel %vm390_vm0, %v410_v2, 0.0  ;;  %1907 = vmatpush.bf16.msra.mxu0 %v5468_v28 }
  0x28   : > { %v768_v48 = vrot.slane %v6620_v46, 2  ;;  %v769_v49 = vrot.slane %v6617_v45, 2  ;;  %v591_v53 = vrot.slane %v6620_v46, 1  ;;  %v592_v54 = vrot.slane %v6617_v45, 1 }
  0x29   : > { %v5903_v59 = vpack.i.bf16 %v6617_v45, %v6620_v46  ;;  %v776_v9 = vrot.slane %v521_v6, 2  ;;  %v599_v14 = vrot.slane %v521_v6, 1 }
  0x2a   : > { %5789 = vrot.lane.b32.xlu0 %v5788_v57, %s6431_s16  ;;  %v770_v51 = vsel %vm742_vm2, %v768_v48, %v769_v49 }
  0x2c   : > { %5799 = vrot.lane.b32.xlu2 %v5768_v36, %s6425_s10  ;;  %v764_v36 = vrot.slane %v6589_v23, 2 }
  0x2d   : > { %5809 = vrot.lane.b32.xlu1 %v5763_v47, %s6424_s9  ;;  %v520_v47 = vsel %vm390_vm0, %v407_v43, 0.0 }
  0x2e   : > { %v765_v40 = vsel %vm742_vm2, %v763_v35, %v764_v36  ;;  %v767_v41 = vsel %vm742_vm2, %v764_v36, %v766_v37  ;;  %v771_v50 = vrot.slane %v520_v47, 2  ;;  %v594_v55 = vrot.slane %v520_v47, 1  ;;  %v5467_v36 = vld [vmem:[%s8869_s1] sm:$0xff] }
  0x2f   : > { %v5873_v44 = vpack.i.bf16 %v767_v41, %v765_v40  ;;  %v522_v35 = vsel %vm390_vm0, %v413_v27, 0.0  ;;  %1908 = vmatpush.bf16.msra.mxu0 %v5467_v36 }
  0x30   : > { %v604_v39 = vrot.slane %v522_v35, 1 }
  0x32   : > { %5804 = vrot.lane.b32.xlu0 %v5803_v58, %s6428_s13  ;;  %v595_v58 = vsel %vm565_vm1, %v592_v54, %v594_v55  ;;  %v781_v55 = vrot.slane %v522_v35, 2 }
  0x34   : > { %5814 = vrot.lane.b32.xlu2 %v5788_v57, %s6426_s11 }
  0x35   : > { %5824 = vrot.lane.b32.xlu1 %v5823_v1, %s6427_s12 }
  0x3a   : > { %5819 = vrot.lane.b32.xlu0 %v5793_v52, %s6430_s15 }
  0x3c   : > { %5829 = vrot.lane.b32.xlu2 %v5828_v21, %s6431_s16 }
  0x3d   : > { %5839 = vrot.lane.b32.xlu1 %v5788_v57, %s6425_s10  ;;  %v593_v57 = vsel %vm565_vm1, %v591_v53, %v592_v54 }
  0x3e   : > { %v5908_v60 = vpack.i.bf16 %v595_v58, %v593_v57 }
  0x42   : > { %5834 = vrot.lane.b32.xlu0 %v5833_v22, %s6429_s14 }
  0x44   : > { %5844 = vrot.lane.b32.xlu2 %v5793_v52, %s6428_s13  ;;  %v772_v52 = vsel %vm742_vm2, %v769_v49, %v771_v50  ;;  %v310_v49 = vld [vmem:[%s6497_s8 + $0x70] sm:$0xff]  ;;  %v311_v50 = vld [vmem:[%s6497_s8 + $0x78] sm:$0xff] }
  0x45   : > { %5854 = vrot.lane.b32.xlu1 %v5828_v21, %s6426_s11  ;;  %v5913_v56 = vpack.i.bf16 %v772_v52, %v770_v51  ;;  %v416_v57 = vrot.slane %v311_v50, 7 }
  0x4a   : > { %5849 = vrot.lane.b32.xlu0 %v5823_v1, %s6424_s9  ;;  %v409_v1 = vrot.slane %v306_v61, 7 }
  0x4c   : > { %5859 = vrot.lane.b32.xlu2 %v5833_v22, %s6430_s15  ;;  %v6645_v3 = vsel %vm390_vm0, %v409_v1, %v410_v2  ;;  %v6648_v4 = vsel %vm390_vm0, 0.0, %v409_v1 }
  0x4d   : > { %5869 = vrot.lane.b32.xlu1 %v5868_v31, %s6431_s16  ;;  %v5943_v5 = vpack.i.bf16 %v6645_v3, %v6648_v4  ;;  %v773_v7 = vrot.slane %v6648_v4, 2  ;;  %v774_v8 = vrot.slane %v6645_v3, 2  ;;  %v596_v10 = vrot.slane %v6648_v4, 1 }
  0x4e   : > { %v597_v11 = vrot.slane %v6645_v3, 1 }
  0x4f   : > { %v775_v17 = vsel %vm742_vm2, %v773_v7, %v774_v8  ;;  %v777_v20 = vsel %vm742_vm2, %v774_v8, %v776_v9 }
  0x50   : > { %v600_v25 = vsel %vm565_vm1, %v597_v11, %v599_v14  ;;  %v5953_v30 = vpack.i.bf16 %v777_v20, %v775_v17 }
  0x52   : > { %5864 = vrot.lane.b32.xlu0 %v5863_v33, %s6427_s12 }
  0x54   : > { %5874 = vrot.lane.b32.xlu2 %v5873_v44, %s6429_s14 }
  0x55   : > { %5884 = vrot.lane.b32.xlu1 %v5833_v22, %s6428_s13  ;;  %v598_v22 = vsel %vm565_vm1, %v596_v10, %v597_v11 }
  0x56   : > { %v6673_v29 = vpack.i.bf16 %v600_v25, %v598_v22 }
  0x5a   : > { %5879 = vrot.lane.b32.xlu0 %v5828_v21, %s6425_s10 }
  0x5c   : > { %5889 = vrot.lane.b32.xlu2 %v5863_v33, %s6424_s9  ;;  %v6680_v33 = vsel %vm390_vm0, 0.0, %v412_v26 }
  0x5d   : > { %5899 = vrot.lane.b32.xlu1 %v5873_v44, %s6430_s15  ;;  %v601_v37 = vrot.slane %v6680_v33, 1  ;;  %v778_v53 = vrot.slane %v6680_v33, 2 }
  0x62   : > { %5894 = vrot.lane.b32.xlu0 %v5868_v31, %s6426_s11 }
  0x64   : > { %5904 = vrot.lane.b32.xlu2 %v5903_v59, %s6427_s12 }
  0x65   : > { %5914 = vrot.lane.b32.xlu1 %v5913_v56, %s6429_s14 }
  0x6a   : > { %5909 = vrot.lane.b32.xlu0 %v5908_v60, %s6431_s16 }
  0x6c   : > { %5919 = vrot.lane.b32.xlu2 %v5868_v31, %s6425_s10  ;;  %v6677_v31 = vsel %vm390_vm0, %v412_v26, %v413_v27  ;;  %v523_v27 = vsel %vm390_vm0, %v416_v57, 0.0 }
  0x6d   : > { %5929 = vrot.lane.b32.xlu1 %v5903_v59, %s6424_s9  ;;  %v602_v38 = vrot.slane %v6677_v31, 1  ;;  %v6709_v51 = vpack.i.bf16 %v6677_v31, %v6680_v33  ;;  %v779_v54 = vrot.slane %v6677_v31, 2 }
  0x6f   : > { %v603_v41 = vsel %vm565_vm1, %v601_v37, %v602_v38  ;;  %v605_v42 = vsel %vm565_vm1, %v602_v38, %v604_v39  ;;  %v780_v61 = vsel %vm742_vm2, %v778_v53, %v779_v54  ;;  %v782_v62 = vsel %vm742_vm2, %v779_v54, %v781_v55 }
  0x70   : > { %v6725_v7 = vpack.i.bf16 %v782_v62, %v780_v61  ;;  %v786_v38 = vrot.slane %v523_v27, 2  ;;  %v609_v61 = vrot.slane %v523_v27, 1 }
  0x72   : > { %5924 = vrot.lane.b32.xlu0 %v5873_v44, %s6428_s13  ;;  %v6698_v44 = vpack.i.bf16 %v605_v42, %v603_v41 }
  0x74   : > { %5934 = vrot.lane.b32.xlu2 %v5908_v60, %s6426_s11 }
  0x75   : > { %5944 = vrot.lane.b32.xlu1 %v5943_v5, %s6427_s12 }
  0x76   : > { %v6666_v21 = vpop.permute.xlu2 %5764 }
  0x77   : > { %v5767_v35 = vunpack.i.h.bf16 %v6666_v21 }
  0x7a   : > { %5939 = vrot.lane.b32.xlu0 %v5913_v56, %s6430_s15 }
  0x7c   : > { %5949 = vrot.lane.b32.xlu2 %v6673_v29, %s6431_s16 }
  0x7d   : > { %5959 = vrot.lane.b32.xlu1 %v5908_v60, %s6425_s10 }
  0x7e   : > { %v6691_v40 = vpop.permute.xlu2 %5774 }
  0x7f   : > { %v5777_v2 = vunpack.i.h.bf16 %v6691_v40 }
  0x82   : > { %5954 = vrot.lane.b32.xlu0 %v5953_v30, %s6429_s14 }
  0x84   : > { %5964 = vrot.lane.b32.xlu2 %v5913_v56, %s6428_s13  ;;  %v415_v56 = vrot.slane %v310_v49, 7 }
  0x85   : > { %5974 = vrot.lane.b32.xlu1 %v6673_v29, %s6426_s11 }
  0x86   : > { %v6701_v47 = vpop.permute.xlu2 %5799  ;;  %v6723_v6 = vsel %vm390_vm0, %v415_v56, %v416_v57  ;;  %v6735_v26 = vsel %vm390_vm0, 0.0, %v415_v56 }
  0x87   : > { %v5760_v43 = vpop.permute.xlu1 %5759  ;;  %v783_v36 = vrot.slane %v6735_v26, 2  ;;  %v784_v37 = vrot.slane %v6723_v6, 2 }
  0x88   : > { %v5762_v16 = vunpack.i.h.bf16 %v5760_v43  ;;  %v5761_v17 = vunpack.i.l.bf16 %v5760_v43 }
  0x89   : > { %v785_v54 = vsel %vm742_vm2, %v783_v36, %v784_v37  ;;  %v787_v55 = vsel %vm742_vm2, %v784_v37, %v786_v38 }
  0x8a   : > { %5969 = vrot.lane.b32.xlu0 %v5943_v5, %s6424_s9  ;;  %v5776_v5 = vunpack.i.l.bf16 %v6691_v40  ;;  %v5766_v40 = vunpack.i.l.bf16 %v6666_v21 }
  0x8c   : > { %v5780_v48 = vpop.permute.xlu0 %5779  ;;  %5979 = vrot.lane.b32.xlu2 %v5953_v30, %s6430_s15 }
  0x8d   : > { %5989 = vrot.lane.b32.xlu1 %v6698_v44, %s6431_s16  ;;  %v5782_v58 = vunpack.i.h.bf16 %v5780_v48  ;;  %v5781_v59 = vunpack.i.l.bf16 %v5780_v48 }
  0x8e   : > { %v6716_v60 = vpop.permute.xlu2 %5814 }
  0x8f   : > { %v5770_v52 = vpop.permute.xlu1 %5769  ;;  %v1521_v14 = vsel %vm1519_vm3, %v6515_v18, %v5782_v58  ;;  %v1520_v15 = vsel %vm1519_vm3, %v6518_v19, %v5781_v59  ;;  %v607_v59 = vrot.slane %v6723_v6, 1 }
  0x90   : > { %v5772_v10 = vunpack.i.h.bf16 %v5770_v52  ;;  %v5771_v11 = vunpack.i.l.bf16 %v5770_v52 }
  0x92   : > { %5984 = vrot.lane.b32.xlu0 %v6709_v51, %s6427_s12 }
  0x94   : > { %v5785_v1 = vpop.permute.xlu0 %5784  ;;  %5994 = vrot.lane.b32.xlu2 %v6725_v7, %s6429_s14 }
  0x95   : > { %v5787_v8 = vunpack.i.h.bf16 %v5785_v1  ;;  %v5786_v9 = vunpack.i.l.bf16 %v5785_v1  ;;  %6004 = vrot.lane.b32.xlu1 %v5953_v30, %s6428_s13 }
  0x96   : > { %v6749_v39 = vpop.permute.xlu2 %5829 }
  0x97   : > { %v1553_v20 = vsel %vm1552_vm4, %v1520_v15, %v5786_v9  ;;  %v1554_v22 = vsel %vm1552_vm4, %v1521_v14, %v5787_v8  ;;  %v5795_v25 = vpop.permute.xlu1 %5794  ;;  %v6770_v8 = vpack.i.bf16 %v787_v55, %v785_v54  ;;  %v5802_v9 = vunpack.i.h.bf16 %v6701_v47 }
  0x98   : > { %v1586_v28 = vsel %vm1585_vm5, %v1553_v20, %v5761_v17  ;;  %v1587_v30 = vsel %vm1585_vm5, %v1554_v22, %v5762_v16  ;;  %v5797_v48 = vunpack.i.h.bf16 %v5795_v25  ;;  %v5796_v49 = vunpack.i.l.bf16 %v5795_v25 }
  0x99   : > { %v1620_v18 = vsel %vm1618_vm6, %v1587_v30, %v5772_v10  ;;  %v1619_v19 = vsel %vm1618_vm6, %v1586_v28, %v5771_v11  ;;  %v5801_v10 = vunpack.i.l.bf16 %v6701_v47  ;;  %v610_v15 = vsel %vm565_vm1, %v607_v59, %v609_v61  ;;  %v312_v30 = vld [vmem:[%s6497_s8 + $0x80] sm:$0xff] }
  0x9a   : > { %5999 = vrot.lane.b32.xlu0 %v6673_v29, %s6425_s10  ;;  %v1652_v41 = vsel %vm1651_vm7, %v1619_v19, %v5776_v5  ;;  %v1653_v42 = vsel %vm1651_vm7, %v1620_v18, %v5777_v2  ;;  %v606_v29 = vrot.slane %v6735_v26, 1  ;;  %v6023_v17 = vpack.i.bf16 %v6723_v6, %v6735_v26  ;;  %v313_v18 = vld [vmem:[%s6497_s8 + $0x88] sm:$0xff] }
  0x9b   : > { %v1685_v53 = vsel %vm1684_vm8, %v1652_v41, %v5766_v40  ;;  %v1686_v21 = vsel %vm1684_vm8, %v1653_v42, %v5767_v35  ;;  %v1523_v22 = vsel %vm1519_vm3, %v6504_v12, %v5802_v9  ;;  %v1522_v25 = vsel %vm1519_vm3, %v6507_v13, %v5801_v10 }
  0x9c   : > { %v5790_v43 = vpop.permute.xlu0 %5789  ;;  %6009 = vrot.lane.b32.xlu2 %v6709_v51, %s6424_s9  ;;  %v608_v51 = vsel %vm565_vm1, %v606_v29, %v607_v59  ;;  %v418_v12 = vrot.slane %v312_v30, 7  ;;  %v419_v38 = vrot.slane %v313_v18, 7  ;;  %v5817_v13 = vunpack.i.h.bf16 %v6716_v60  ;;  %v315_v30 = vld [vmem:[%s6497_s8 + $0x98] sm:$0xff] }
  0x9d   : > { %v5792_v50 = vunpack.i.h.bf16 %v5790_v43  ;;  %v5791_v52 = vunpack.i.l.bf16 %v5790_v43  ;;  %6019 = vrot.lane.b32.xlu1 %v6725_v7, %s6430_s15  ;;  %v6789_v27 = vpack.i.bf16 %v610_v15, %v608_v51  ;;  %v5816_v41 = vunpack.i.l.bf16 %v6716_v60 }
  0x9e   : > { %v6776_v14 = vpop.permute.xlu2 %5844  ;;  %v6809_v29 = vsel %vm390_vm0, 0.0, %v418_v12  ;;  %v5832_v59 = vunpack.i.h.bf16 %v6749_v39  ;;  %v5831_v61 = vunpack.i.l.bf16 %v6749_v39 }
  0x9f   : > { %v1718_v56 = vsel %vm1717_vm9, %v1685_v53, %v5791_v52  ;;  %v1719_v57 = vsel %vm1717_vm9, %v1686_v21, %v5792_v50  ;;  %v5810_v58 = vpop.permute.xlu1 %5809  ;;  %v6806_v52 = vsel %vm390_vm0, %v418_v12, %v419_v38  ;;  %v788_v39 = vrot.slane %v6809_v29, 2 }
  0xa0   : > { %v1751_v62 = vsel %vm1750_vm10, %v1718_v56, %v5796_v49  ;;  %v1752_v1 = vsel %vm1750_vm10, %v1719_v57, %v5797_v48  ;;  %v5812_v19 = vunpack.i.h.bf16 %v5810_v58  ;;  %v5811_v35 = vunpack.i.l.bf16 %v5810_v58 }
  0xa1   : > { %v1784_v2 = vsel %vm1783_vm11, %v1751_v62, 0.0  ;;  %v1785_v5 = vsel %vm1783_vm11, %v1752_v1, 0.0  ;;  %v6819_v58 = vpack.i.bf16 %v6806_v52, %v6809_v29 }
  0xa2   : > { %6014 = vrot.lane.b32.xlu0 %v6698_v44, %s6426_s11  ;;  %v1816_v11 = vpack.c.bf16 %v1785_v5, %v1784_v2  ;;  %v524_v5 = vsel %vm390_vm0, %v419_v38, 0.0 }
  0xa3   : > { %v791_v15 = vrot.slane %v524_v5, 2 }
  0xa4   : > { %v5805_v16 = vpop.permute.xlu0 %5804  ;;  %4424 = vmatmul.msk.bf16.vlgmr.msra.gmra.mxu0 %vm1852_vm12, %v1816_v11  ;;  %6024 = vrot.lane.b32.xlu2 %v6023_v17, %s6427_s12 }
  0xa5   : > { %v5807_v20 = vunpack.i.h.bf16 %v5805_v16  ;;  %v5806_v47 = vunpack.i.l.bf16 %v5805_v16  ;;  %6034 = vrot.lane.b32.xlu1 %v6770_v8, %s6429_s14  ;;  %v611_v16 = vrot.slane %v6809_v29, 1 }
  0xa6   : > { %v6798_v40 = vpop.permute.xlu2 %5859 }
  0xa7   : > { %v5825_v28 = vpop.permute.xlu1 %5824  ;;  %v1555_v36 = vsel %vm1552_vm4, %v1522_v25, %v5806_v47  ;;  %v1556_v37 = vsel %vm1552_vm4, %v1523_v22, %v5807_v20  ;;  %v612_v22 = vrot.slane %v6806_v52, 1  ;;  %v614_v25 = vrot.slane %v524_v5, 1 }
  0xa8   : > { %v1589_v42 = vsel %vm1585_vm5, %v1556_v37, %v5812_v19  ;;  %v1588_v43 = vsel %vm1585_vm5, %v1555_v36, %v5811_v35  ;;  %v5827_v60 = vunpack.i.h.bf16 %v5825_v28  ;;  %v5826_v54 = vunpack.i.l.bf16 %v5825_v28  ;;  %v314_v28 = vld [vmem:[%s6497_s8 + $0x90] sm:$0xff] }
  0xa9   : > { %v1621_v53 = vsel %vm1618_vm6, %v1588_v43, %v5816_v41  ;;  %v1622_v21 = vsel %vm1618_vm6, %v1589_v42, %v5817_v13  ;;  %v421_v41 = vrot.slane %v314_v28, 7  ;;  %v422_v42 = vrot.slane %v315_v30, 7 }
  0xaa   : > { %6029 = vrot.lane.b32.xlu0 %v6789_v27, %s6431_s16  ;;  %v5847_v43 = vunpack.i.h.bf16 %v6776_v14 }
  0xac   : > { %v5820_v48 = vpop.permute.xlu0 %5819  ;;  %6039 = vrot.lane.b32.xlu2 %v6698_v44, %s6425_s10 }
  0xad   : > { %v5822_v49 = vunpack.i.h.bf16 %v5820_v48  ;;  %v5821_v50 = vunpack.i.l.bf16 %v5820_v48  ;;  %6049 = vrot.lane.b32.xlu1 %v6023_v17, %s6424_s9  ;;  %v5846_v48 = vunpack.i.l.bf16 %v6776_v14 }
  0xae   : > { %v6825_v62 = vpop.permute.xlu2 %5874 }
  0xaf   : > { %v5840_v55 = vpop.permute.xlu1 %5839  ;;  %v1654_v56 = vsel %vm1651_vm7, %v1621_v53, %v5821_v50  ;;  %v1655_v57 = vsel %vm1651_vm7, %v1622_v21, %v5822_v49  ;;  %v613_v49 = vsel %vm565_vm1, %v611_v16, %v612_v22  ;;  %v615_v50 = vsel %vm565_vm1, %v612_v22, %v614_v25 }
  0xb0   : > { %v1687_v1 = vsel %vm1684_vm8, %v1654_v56, %v5826_v54  ;;  %v1688_v2 = vsel %vm1684_vm8, %v1655_v57, %v5827_v60  ;;  %v5842_v18 = vunpack.i.h.bf16 %v5840_v55  ;;  %v5841_v19 = vunpack.i.l.bf16 %v5840_v55 }
  0xb1   : > { %v1720_v11 = vsel %vm1717_vm9, %v1687_v1, %v5831_v61  ;;  %v1721_v51 = vsel %vm1717_vm9, %v1688_v2, %v5832_v59  ;;  %v6861_v54 = vpack.i.bf16 %v615_v50, %v613_v49  ;;  %v6868_v57 = vsel %vm390_vm0, %v421_v41, %v422_v42 }
  0xb2   : > { %6044 = vrot.lane.b32.xlu0 %v6725_v7, %s6428_s13  ;;  %v789_v7 = vrot.slane %v6806_v52, 2  ;;  %v1525_v53 = vsel %vm1519_vm3, %v6531_v32, %v5842_v18  ;;  %v1524_v21 = vsel %vm1519_vm3, %v6534_v34, %v5841_v19  ;;  %v6871_v59 = vsel %vm390_vm0, 0.0, %v421_v41 }
  0xb3   : > { %v6874_v32 = vsel %vm390_vm0, %v422_v42, 0.0  ;;  %v1557_v34 = vsel %vm1552_vm4, %v1524_v21, %v5846_v48  ;;  %v1558_v61 = vsel %vm1552_vm4, %v1525_v53, %v5847_v43  ;;  %v5877_v25 = vunpack.i.h.bf16 %v6825_v62 }
  0xb4   : > { %v5835_v44 = vpop.permute.xlu0 %5834  ;;  %6054 = vrot.lane.b32.xlu2 %v6789_v27, %s6426_s11  ;;  %v790_v12 = vsel %vm742_vm2, %v788_v39, %v789_v7  ;;  %v792_v38 = vsel %vm742_vm2, %v789_v7, %v791_v15  ;;  %v616_v39 = vrot.slane %v6871_v59, 1  ;;  %v617_v7 = vrot.slane %v6868_v57, 1 }
  0xb5   : > { %v5837_v9 = vunpack.i.h.bf16 %v5835_v44  ;;  %v5836_v10 = vunpack.i.l.bf16 %v5835_v44  ;;  %6064 = vrot.lane.b32.xlu1 %v6819_v58, %s6427_s12  ;;  %v6865_v14 = vpack.i.bf16 %v792_v38, %v790_v12  ;;  %v5876_v28 = vunpack.i.l.bf16 %v6825_v62 }
  0xb6   : > { %v6850_v13 = vpop.permute.xlu2 %5889  ;;  %v618_v19 = vsel %vm565_vm1, %v616_v39, %v617_v7 }
  0xb7   : > { %v1753_v17 = vsel %vm1750_vm10, %v1720_v11, %v5836_v10  ;;  %v1754_v20 = vsel %vm1750_vm10, %v1721_v51, %v5837_v9  ;;  %v5855_v47 = vpop.permute.xlu1 %5854  ;;  %v5862_v9 = vunpack.i.h.bf16 %v6798_v40  ;;  %v5861_v10 = vunpack.i.l.bf16 %v6798_v40 }
  0xb8   : > { %v1786_v35 = vsel %vm1783_vm11, %v1753_v17, 0.0  ;;  %v1787_v36 = vsel %vm1783_vm11, %v1754_v20, 0.0  ;;  %v5857_v1 = vunpack.i.h.bf16 %v5855_v47  ;;  %v5856_v2 = vunpack.i.l.bf16 %v5855_v47 }
  0xb9   : > { %v1817_v37 = vpack.c.bf16 %v1787_v36, %v1786_v35  ;;  %v619_v11 = vrot.slane %v6874_v32, 1 }
  0xba   : > { %6059 = vrot.lane.b32.xlu0 %v6770_v8, %s6430_s15 }
  0xbb   : > { %4425 = vmatmul.msk.bf16.gmra.mxu0 %vm1852_vm12, %v1817_v37  ;;  %v620_v35 = vsel %vm565_vm1, %v617_v7, %v619_v11  ;;  %v5892_v7 = vunpack.i.h.bf16 %v6850_v13  ;;  %v5891_v11 = vunpack.i.l.bf16 %v6850_v13 }
  0xbc   : > { %v5850_v60 = vpop.permute.xlu0 %5849  ;;  %6069 = vrot.lane.b32.xlu2 %v6861_v54, %s6431_s16  ;;  %v6909_v43 = vpack.i.bf16 %v620_v35, %v618_v19 }
  0xbd   : > { %v5852_v55 = vunpack.i.h.bf16 %v5850_v60  ;;  %v5851_v56 = vunpack.i.l.bf16 %v5850_v60  ;;  %6079 = vrot.lane.b32.xlu1 %v6789_v27, %s6425_s10 }
  0xbe   : > { %v6889_v51 = vpop.permute.xlu2 %5904 }
  0xbf   : > { %v5870_v5 = vpop.permute.xlu1 %5869  ;;  %v1590_v27 = vsel %vm1585_vm5, %v1557_v34, %v5851_v56  ;;  %v1591_v44 = vsel %vm1585_vm5, %v1558_v61, %v5852_v55  ;;  %v6922_v55 = vpack.i.bf16 %v6868_v57, %v6871_v59  ;;  %v793_v56 = vrot.slane %v6871_v59, 2 }
  0xc0   : > { %v1623_v15 = vsel %vm1618_vm6, %v1590_v27, %v5856_v2  ;;  %v1624_v16 = vsel %vm1618_vm6, %v1591_v44, %v5857_v1  ;;  %v5872_v20 = vunpack.i.h.bf16 %v5870_v5  ;;  %v5871_v47 = vunpack.i.l.bf16 %v5870_v5  ;;  %v316_v1 = vld [vmem:[%s6497_s8 + $0xa0] sm:$0xff]  ;;  %v317_v2 = vld [vmem:[%s6497_s8 + $0xa8] sm:$0xff] }
  0xc1   : > { %v1656_v30 = vsel %vm1651_vm7, %v1623_v15, %v5861_v10  ;;  %v1657_v18 = vsel %vm1651_vm7, %v1624_v16, %v5862_v9  ;;  %v794_v34 = vrot.slane %v6868_v57, 2  ;;  %v796_v61 = vrot.slane %v6874_v32, 2 }
  0xc2   : > { %6074 = vrot.lane.b32.xlu0 %v6865_v14, %s6429_s14  ;;  %v424_v39 = vrot.slane %v316_v1, 7  ;;  %v425_v32 = vrot.slane %v317_v2, 7 }
  0xc3   : > { %v795_v15 = vsel %vm742_vm2, %v793_v56, %v794_v34  ;;  %v797_v16 = vsel %vm742_vm2, %v794_v34, %v796_v61 }
  0xc4   : > { %v5865_v17 = vpop.permute.xlu0 %5864  ;;  %6084 = vrot.lane.b32.xlu2 %v6770_v8, %s6428_s13  ;;  %v6953_v13 = vsel %vm390_vm0, 0.0, %v424_v39 }
  0xc5   : > { %v5867_v22 = vunpack.i.h.bf16 %v5865_v17  ;;  %v5866_v40 = vunpack.i.l.bf16 %v5865_v17  ;;  %6094 = vrot.lane.b32.xlu1 %v6861_v54, %s6426_s11 }
  0xc6   : > { %v6915_v50 = vpop.permute.xlu2 %5919 }
  0xc7   : > { %v1689_v36 = vsel %vm1684_vm8, %v1656_v30, %v5866_v40  ;;  %v1690_v37 = vsel %vm1684_vm8, %v1657_v18, %v5867_v22  ;;  %v5885_v12 = vpop.permute.xlu1 %5884  ;;  %v6950_v40 = vsel %vm390_vm0, %v424_v39, %v425_v32 }
  0xc8   : > { %v1722_v38 = vsel %vm1717_vm9, %v1689_v36, %v5871_v47  ;;  %v1723_v62 = vsel %vm1717_vm9, %v1690_v37, %v5872_v20  ;;  %v5887_v5 = vunpack.i.h.bf16 %v5885_v12  ;;  %v5886_v27 = vunpack.i.l.bf16 %v5885_v12 }
  0xc9   : > { %v1755_v41 = vsel %vm1750_vm10, %v1722_v38, %v5876_v28  ;;  %v1756_v42 = vsel %vm1750_vm10, %v1723_v62, %v5877_v25  ;;  %v6945_v20 = vpack.i.bf16 %v797_v16, %v795_v15  ;;  %v526_v25 = vsel %vm390_vm0, %v425_v32, 0.0 }
  0xca   : > { %6089 = vrot.lane.b32.xlu0 %v6819_v58, %s6424_s9  ;;  %v1788_v48 = vsel %vm1783_vm11, %v1755_v41, 0.0  ;;  %v1789_v49 = vsel %vm1783_vm11, %v1756_v42, 0.0  ;;  %v5906_v12 = vunpack.i.l.bf16 %v6889_v51  ;;  %v798_v38 = vrot.slane %v6953_v13, 2 }
  0xcb   : > { %v1818_v53 = vpack.c.bf16 %v1789_v49, %v1788_v48  ;;  %v799_v62 = vrot.slane %v6950_v40, 2  ;;  %v801_v41 = vrot.slane %v526_v25, 2  ;;  %v5922_v15 = vunpack.i.h.bf16 %v6915_v50 }
  0xcc   : > { %v5880_v21 = vpop.permute.xlu0 %5879  ;;  %6099 = vrot.lane.b32.xlu2 %v6865_v14, %s6430_s15  ;;  %v5921_v16 = vunpack.i.l.bf16 %v6915_v50 }
  0xcd   : > { %v5882_v8 = vunpack.i.h.bf16 %v5880_v21  ;;  %v5881_v60 = vunpack.i.l.bf16 %v5880_v21  ;;  %4426 = vmatmul.msk.bf16.gmra.mxu0 %vm1852_vm12, %v1818_v53  ;;  %6109 = vrot.lane.b32.xlu1 %v6909_v43, %s6431_s16  ;;  %v800_v34 = vsel %vm742_vm2, %v798_v38, %v799_v62  ;;  %v802_v61 = vsel %vm742_vm2, %v799_v62, %v801_v41 }
  0xce   : > { %v6937_v10 = vpop.permute.xlu2 %5934 }
  0xcf   : > { %v5900_v58 = vpop.permute.xlu1 %5899  ;;  %v1527_v44 = vsel %vm1519_vm3, %v6564_v63, %v5882_v8  ;;  %v1526_v9 = vsel %vm1519_vm3, %v6567_v0, %v5881_v60 }
  0xd0   : > { %v1560_v63 = vsel %vm1552_vm4, %v1527_v44, %v5887_v5  ;;  %v1559_v17 = vsel %vm1552_vm4, %v1526_v9, %v5886_v27  ;;  %v5902_v18 = vunpack.i.h.bf16 %v5900_v58  ;;  %v5901_v19 = vunpack.i.l.bf16 %v5900_v58 }
  0xd1   : > { %v1592_v28 = vsel %vm1585_vm5, %v1559_v17, %v5891_v11  ;;  %v1593_v30 = vsel %vm1585_vm5, %v1560_v63, %v5892_v7  ;;  %v622_v27 = vrot.slane %v6950_v40, 1  ;;  %v624_v44 = vrot.slane %v526_v25, 1 }
  0xd2   : > { %6104 = vrot.lane.b32.xlu0 %v6922_v55, %s6427_s12  ;;  %v6988_v11 = vpack.i.bf16 %v802_v61, %v800_v34 }
  0xd4   : > { %v5895_v0 = vpop.permute.xlu0 %5894  ;;  %6114 = vrot.lane.b32.xlu2 %v6945_v20, %s6429_s14 }
  0xd5   : > { %v5897_v47 = vunpack.i.h.bf16 %v5895_v0  ;;  %v5896_v22 = vunpack.i.l.bf16 %v5895_v0  ;;  %6124 = vrot.lane.b32.xlu1 %v6865_v14, %s6428_s13  ;;  %v5907_v14 = vunpack.i.h.bf16 %v6889_v51  ;;  %v625_v0 = vsel %vm565_vm1, %v622_v27, %v624_v44 }
  0xd6   : > { %v6968_v42 = vpop.permute.xlu2 %5949 }
  0xd7   : > { %v5915_v35 = vpop.permute.xlu1 %5914  ;;  %v1625_v36 = vsel %vm1618_vm6, %v1592_v28, %v5896_v22  ;;  %v1626_v37 = vsel %vm1618_vm6, %v1593_v30, %v5897_v47  ;;  %v6143_v22 = vpack.i.bf16 %v6950_v40, %v6953_v13  ;;  %v1529_v28 = vsel %vm1519_vm3, %v6589_v23, %v5922_v15 }
  0xd8   : > { %v1658_v48 = vsel %vm1651_vm7, %v1625_v36, %v5901_v19  ;;  %v1659_v49 = vsel %vm1651_vm7, %v1626_v37, %v5902_v18  ;;  %v5917_v21 = vunpack.i.h.bf16 %v5915_v35  ;;  %v5916_v8 = vunpack.i.l.bf16 %v5915_v35  ;;  %v318_v35 = vld [vmem:[%s6497_s8 + $0xb0] sm:$0xff]  ;;  %v319_v36 = vld [vmem:[%s6497_s8 + $0xb8] sm:$0xff] }
  0xd9   : > { %v1691_v51 = vsel %vm1684_vm8, %v1658_v48, %v5906_v12  ;;  %v1692_v56 = vsel %vm1684_vm8, %v1659_v49, %v5907_v14  ;;  %v1528_v30 = vsel %vm1519_vm3, %v6592_v24, %v5921_v16  ;;  %v427_v23 = vrot.slane %v318_v35, 7  ;;  %v321_v35 = vld [vmem:[%s6497_s8 + $0xc8] sm:$0xff] }
  0xda   : > { %6119 = vrot.lane.b32.xlu0 %v6861_v54, %s6425_s10  ;;  %v621_v54 = vrot.slane %v6953_v13, 1  ;;  %v428_v62 = vrot.slane %v319_v36, 7  ;;  %v5937_v24 = vunpack.i.h.bf16 %v6937_v10  ;;  %v5936_v48 = vunpack.i.l.bf16 %v6937_v10 }
  0xdb   : > { %v5951_v44 = vunpack.i.l.bf16 %v6968_v42 }
  0xdc   : > { %v5910_v53 = vpop.permute.xlu0 %5909  ;;  %6129 = vrot.lane.b32.xlu2 %v6922_v55, %s6424_s9  ;;  %v623_v55 = vsel %vm565_vm1, %v621_v54, %v622_v27  ;;  %v7027_v54 = vsel %vm390_vm0, 0.0, %v427_v23  ;;  %v5952_v27 = vunpack.i.h.bf16 %v6968_v42 }
  0xdd   : > { %v5912_v60 = vunpack.i.h.bf16 %v5910_v53  ;;  %v5911_v58 = vunpack.i.l.bf16 %v5910_v53  ;;  %6139 = vrot.lane.b32.xlu1 %v6945_v20, %s6430_s15  ;;  %v7007_v18 = vpack.i.bf16 %v625_v0, %v623_v55  ;;  %v803_v42 = vrot.slane %v7027_v54, 2 }
  0xde   : > { %v6994_v17 = vpop.permute.xlu2 %5964 }
  0xdf   : > { %v1724_v1 = vsel %vm1717_vm9, %v1691_v51, %v5911_v58  ;;  %v1725_v2 = vsel %vm1717_vm9, %v1692_v56, %v5912_v60  ;;  %v5930_v5 = vpop.permute.xlu1 %5929  ;;  %v7024_v58 = vsel %vm390_vm0, %v427_v23, %v428_v62 }
  0xe0   : > { %v1757_v9 = vsel %vm1750_vm10, %v1724_v1, %v5916_v8  ;;  %v1758_v39 = vsel %vm1750_vm10, %v1725_v2, %v5917_v21  ;;  %v5932_v37 = vunpack.i.h.bf16 %v5930_v5  ;;  %v5931_v14 = vunpack.i.l.bf16 %v5930_v5 }
  0xe1   : > { %v1790_v32 = vsel %vm1783_vm11, %v1757_v9, 0.0  ;;  %v1791_v7 = vsel %vm1783_vm11, %v1758_v39, 0.0  ;;  %v7037_v5 = vpack.i.bf16 %v7024_v58, %v7027_v54 }
  0xe2   : > { %6134 = vrot.lane.b32.xlu0 %v6909_v43, %s6426_s11  ;;  %v1819_v63 = vpack.c.bf16 %v1791_v7, %v1790_v32  ;;  %v527_v7 = vsel %vm390_vm0, %v428_v62, 0.0 }
  0xe3   : > { %v806_v0 = vrot.slane %v527_v7, 2 }
  0xe4   : > { %v5925_v47 = vpop.permute.xlu0 %5924  ;;  %4427 = vmatmul.msk.bf16.gmra.mxu0 %vm1852_vm12, %v1819_v63  ;;  %6144 = vrot.lane.b32.xlu2 %v6143_v22, %s6427_s12 }
  0xe5   : > { %v5927_v25 = vunpack.i.h.bf16 %v5925_v47  ;;  %v5926_v50 = vunpack.i.l.bf16 %v5925_v47  ;;  %6154 = vrot.lane.b32.xlu1 %v6988_v11, %s6429_s14  ;;  %v626_v47 = vrot.slane %v7027_v54, 1 }
  0xe6   : > { %v7016_v41 = vpop.permute.xlu2 %5979 }
  0xe7   : > { %v5945_v19 = vpop.permute.xlu1 %5944  ;;  %v1561_v12 = vsel %vm1552_vm4, %v1528_v30, %v5926_v50  ;;  %v1562_v38 = vsel %vm1552_vm4, %v1529_v28, %v5927_v25  ;;  %v627_v28 = vrot.slane %v7024_v58, 1  ;;  %v629_v30 = vrot.slane %v527_v7, 1 }
  0xe8   : > { %v1595_v49 = vsel %vm1585_vm5, %v1562_v38, %v5932_v37  ;;  %v1594_v53 = vsel %vm1585_vm5, %v1561_v12, %v5931_v14  ;;  %v5947_v10 = vunpack.i.h.bf16 %v5945_v19  ;;  %v5946_v34 = vunpack.i.l.bf16 %v5945_v19  ;;  %v320_v19 = vld [vmem:[%s6497_s8 + $0xc0] sm:$0xff] }
  0xe9   : > { %v1627_v51 = vsel %vm1618_vm6, %v1594_v53, %v5936_v48  ;;  %v1628_v56 = vsel %vm1618_vm6, %v1595_v49, %v5937_v24  ;;  %v430_v48 = vrot.slane %v320_v19, 7  ;;  %v431_v49 = vrot.slane %v321_v35, 7 }
  0xea   : > { %6149 = vrot.lane.b32.xlu0 %v7007_v18, %s6431_s16  ;;  %v5967_v53 = vunpack.i.h.bf16 %v6994_v17 }
  0xec   : > { %v5940_v21 = vpop.permute.xlu0 %5939  ;;  %6159 = vrot.lane.b32.xlu2 %v6909_v43, %s6425_s10 }
  0xed   : > { %v5942_v8 = vunpack.i.h.bf16 %v5940_v21  ;;  %v5941_v60 = vunpack.i.l.bf16 %v5940_v21  ;;  %6169 = vrot.lane.b32.xlu1 %v6143_v22, %s6424_s9  ;;  %v5966_v21 = vunpack.i.l.bf16 %v6994_v17 }
  0xee   : > { %v7043_v9 = vpop.permute.xlu2 %5994 }
  0xef   : > { %v5960_v61 = vpop.permute.xlu1 %5959  ;;  %v1660_v1 = vsel %vm1651_vm7, %v1627_v51, %v5941_v60  ;;  %v1661_v2 = vsel %vm1651_vm7, %v1628_v56, %v5942_v8  ;;  %v628_v8 = vsel %vm565_vm1, %v626_v47, %v627_v28  ;;  %v630_v60 = vsel %vm565_vm1, %v627_v28, %v629_v30 }
  0xf0   : > { %v1693_v39 = vsel %vm1684_vm8, %v1660_v1, %v5946_v34  ;;  %v1694_v32 = vsel %vm1684_vm8, %v1661_v2, %v5947_v10  ;;  %v5962_v36 = vunpack.i.h.bf16 %v5960_v61  ;;  %v5961_v37 = vunpack.i.l.bf16 %v5960_v61 }
  0xf1   : > { %v1726_v63 = vsel %vm1717_vm9, %v1693_v39, %v5951_v44  ;;  %v1727_v55 = vsel %vm1717_vm9, %v1694_v32, %v5952_v27  ;;  %v7079_v34 = vpack.i.bf16 %v630_v60, %v628_v8  ;;  %v7086_v2 = vsel %vm390_vm0, %v430_v48, %v431_v49 }
  0xf2   : > { %6164 = vrot.lane.b32.xlu0 %v6945_v20, %s6428_s13  ;;  %v804_v20 = vrot.slane %v7024_v58, 2  ;;  %v1531_v51 = vsel %vm1519_vm3, %v6617_v45, %v5962_v36  ;;  %v1530_v56 = vsel %vm1519_vm3, %v6620_v46, %v5961_v37  ;;  %v7089_v27 = vsel %vm390_vm0, 0.0, %v430_v48 }
  0xf3   : > { %v7092_v45 = vsel %vm390_vm0, %v431_v49, 0.0  ;;  %v1563_v46 = vsel %vm1552_vm4, %v1530_v56, %v5966_v21  ;;  %v1564_v44 = vsel %vm1552_vm4, %v1531_v51, %v5967_v53  ;;  %v5997_v30 = vunpack.i.h.bf16 %v7043_v9 }
  0xf4   : > { %v5955_v43 = vpop.permute.xlu0 %5954  ;;  %6174 = vrot.lane.b32.xlu2 %v7007_v18, %s6426_s11  ;;  %v805_v23 = vsel %vm742_vm2, %v803_v42, %v804_v20  ;;  %v807_v62 = vsel %vm742_vm2, %v804_v20, %v806_v0  ;;  %v631_v42 = vrot.slane %v7089_v27, 1  ;;  %v632_v20 = vrot.slane %v7086_v2, 1 }
  0xf5   : > { %v5957_v15 = vunpack.i.h.bf16 %v5955_v43  ;;  %v5956_v16 = vunpack.i.l.bf16 %v5955_v43  ;;  %6184 = vrot.lane.b32.xlu1 %v7037_v5, %s6427_s12  ;;  %v7083_v17 = vpack.i.bf16 %v807_v62, %v805_v23  ;;  %v5996_v19 = vunpack.i.l.bf16 %v7043_v9 }
  0xf6   : > { %v7068_v24 = vpop.permute.xlu2 %6009  ;;  %v633_v37 = vsel %vm565_vm1, %v631_v42, %v632_v20 }
  0xf7   : > { %v1759_v22 = vsel %vm1750_vm10, %v1726_v63, %v5956_v16  ;;  %v1760_v25 = vsel %vm1750_vm10, %v1727_v55, %v5957_v15  ;;  %v5975_v50 = vpop.permute.xlu1 %5974  ;;  %v5982_v15 = vunpack.i.h.bf16 %v7016_v41  ;;  %v5981_v16 = vunpack.i.l.bf16 %v7016_v41 }
  0xf8   : > { %v1792_v14 = vsel %vm1783_vm11, %v1759_v22, 0.0  ;;  %v1793_v12 = vsel %vm1783_vm11, %v1760_v25, 0.0  ;;  %v5977_v39 = vunpack.i.h.bf16 %v5975_v50  ;;  %v5976_v32 = vunpack.i.l.bf16 %v5975_v50 }
  0xf9   : > { %v1820_v38 = vpack.c.bf16 %v1793_v12, %v1792_v14  ;;  %v634_v63 = vrot.slane %v7092_v45, 1 }
  0xfa   : > { %6179 = vrot.lane.b32.xlu0 %v6988_v11, %s6430_s15 }
  0xfb   : > { %4428 = vmatmul.msk.bf16.gmra.mxu0 %vm1852_vm12, %v1820_v38  ;;  %v635_v14 = vsel %vm565_vm1, %v632_v20, %v634_v63  ;;  %v6012_v20 = vunpack.i.h.bf16 %v7068_v24  ;;  %v6011_v63 = vunpack.i.l.bf16 %v7068_v24 }
  0xfc   : > { %v5970_v10 = vpop.permute.xlu0 %5969  ;;  %6189 = vrot.lane.b32.xlu2 %v7079_v34, %s6431_s16  ;;  %v7127_v53 = vpack.i.bf16 %v635_v14, %v633_v37 }
  0xfd   : > { %v5972_v61 = vunpack.i.h.bf16 %v5970_v10  ;;  %v5971_v1 = vunpack.i.l.bf16 %v5970_v10  ;;  %6199 = vrot.lane.b32.xlu1 %v7007_v18, %s6425_s10 }
  0xfe   : > { %v7107_v55 = vpop.permute.xlu2 %6024 }
  0xff   : > { %v5990_v7 = vpop.permute.xlu1 %5989  ;;  %v1596_v18 = vsel %vm1585_vm5, %v1563_v46, %v5971_v1  ;;  %v1597_v43 = vsel %vm1585_vm5, %v1564_v44, %v5972_v61  ;;  %v7140_v61 = vpack.i.bf16 %v7086_v2, %v7089_v27  ;;  %v808_v1 = vrot.slane %v7089_v27, 2 }
 0x100   : > { %v1629_v0 = vsel %vm1618_vm6, %v1596_v18, %v5976_v32  ;;  %v1630_v47 = vsel %vm1618_vm6, %v1597_v43, %v5977_v39  ;;  %v5992_v25 = vunpack.i.h.bf16 %v5990_v7  ;;  %v5991_v50 = vunpack.i.l.bf16 %v5990_v7  ;;  %v322_v39 = vld [vmem:[%s6497_s8 + $0xd0] sm:$0xff]  ;;  %v323_v32 = vld [vmem:[%s6497_s8 + $0xd8] sm:$0xff] }
 0x101   : > { %v1662_v35 = vsel %vm1651_vm7, %v1629_v0, %v5981_v16  ;;  %v1663_v36 = vsel %vm1651_vm7, %v1630_v47, %v5982_v15  ;;  %v809_v46 = vrot.slane %v7086_v2, 2  ;;  %v811_v44 = vrot.slane %v7092_v45, 2 }
 0x102   : > { %6194 = vrot.lane.b32.xlu0 %v7083_v17, %s6429_s14  ;;  %v433_v42 = vrot.slane %v322_v39, 7  ;;  %v434_v45 = vrot.slane %v323_v32, 7 }
 0x103   : > { %v810_v0 = vsel %vm742_vm2, %v808_v1, %v809_v46  ;;  %v812_v47 = vsel %vm742_vm2, %v809_v46, %v811_v44 }
 0x104   : > { %v5985_v22 = vpop.permute.xlu0 %5984  ;;  %6204 = vrot.lane.b32.xlu2 %v6988_v11, %s6428_s13  ;;  %v7171_v24 = vsel %vm390_vm0, 0.0, %v433_v42 }
 0x105   : > { %v5987_v28 = vunpack.i.h.bf16 %v5985_v22  ;;  %v5986_v41 = vunpack.i.l.bf16 %v5985_v22  ;;  %6214 = vrot.lane.b32.xlu1 %v7079_v34, %s6426_s11 }
 0x106   : > { %v7133_v60 = vpop.permute.xlu2 %6039 }
 0x107   : > { %v1695_v12 = vsel %vm1684_vm8, %v1662_v35, %v5986_v41  ;;  %v1696_v38 = vsel %vm1684_vm8, %v1663_v36, %v5987_v28  ;;  %v6005_v23 = vpop.permute.xlu1 %6004  ;;  %v7168_v41 = vsel %vm390_vm0, %v433_v42, %v434_v45 }
 0x108   : > { %v1728_v62 = vsel %vm1717_vm9, %v1695_v12, %v5991_v50  ;;  %v1729_v9 = vsel %vm1717_vm9, %v1696_v38, %v5992_v25  ;;  %v6007_v7 = vunpack.i.h.bf16 %v6005_v23  ;;  %v6006_v18 = vunpack.i.l.bf16 %v6005_v23 }
 0x109   : > { %v1761_v48 = vsel %vm1750_vm10, %v1728_v62, %v5996_v19  ;;  %v1762_v49 = vsel %vm1750_vm10, %v1729_v9, %v5997_v30  ;;  %v7163_v25 = vpack.i.bf16 %v812_v47, %v810_v0  ;;  %v529_v30 = vsel %vm390_vm0, %v434_v45, 0.0 }
 0x10a   : > { %6209 = vrot.lane.b32.xlu0 %v7037_v5, %s6424_s9  ;;  %v1794_v21 = vsel %vm1783_vm11, %v1761_v48, 0.0  ;;  %v1795_v8 = vsel %vm1783_vm11, %v1762_v49, 0.0  ;;  %v6026_v23 = vunpack.i.l.bf16 %v7107_v55  ;;  %v813_v62 = vrot.slane %v7171_v24, 2 }
 0x10b   : > { %v1821_v51 = vpack.c.bf16 %v1795_v8, %v1794_v21  ;;  %v814_v9 = vrot.slane %v7168_v41, 2  ;;  %v816_v48 = vrot.slane %v529_v30, 2  ;;  %v6042_v0 = vunpack.i.h.bf16 %v7133_v60 }
 0x10c   : > { %v6000_v56 = vpop.permute.xlu0 %5999  ;;  %6219 = vrot.lane.b32.xlu2 %v7083_v17, %s6430_s15  ;;  %v6041_v47 = vunpack.i.l.bf16 %v7133_v60 }
 0x10d   : > { %v6002_v11 = vunpack.i.h.bf16 %v6000_v56  ;;  %v6001_v10 = vunpack.i.l.bf16 %v6000_v56  ;;  %4429 = vmatmul.msk.bf16.gmra.mxu0 %vm1852_vm12, %v1821_v51  ;;  %6229 = vrot.lane.b32.xlu1 %v7127_v53, %s6431_s16  ;;  %v815_v46 = vsel %vm742_vm2, %v813_v62, %v814_v9  ;;  %v817_v44 = vsel %vm742_vm2, %v814_v9, %v816_v48 }
 0x10e   : > { %v7155_v16 = vpop.permute.xlu2 %6054 }
 0x10f   : > { %v6020_v5 = vpop.permute.xlu1 %6019  ;;  %v1533_v43 = vsel %vm1519_vm3, %v6645_v3, %v6002_v11  ;;  %v1532_v15 = vsel %vm1519_vm3, %v6648_v4, %v6001_v10 }
 0x110   : > { %v1566_v3 = vsel %vm1552_vm4, %v1533_v43, %v6007_v7  ;;  %v1565_v22 = vsel %vm1552_vm4, %v1532_v15, %v6006_v18  ;;  %v6022_v36 = vunpack.i.h.bf16 %v6020_v5  ;;  %v6021_v37 = vunpack.i.l.bf16 %v6020_v5 }
 0x111   : > { %v1598_v19 = vsel %vm1585_vm5, %v1565_v22, %v6011_v63  ;;  %v1599_v35 = vsel %vm1585_vm5, %v1566_v3, %v6012_v20  ;;  %v637_v18 = vrot.slane %v7168_v41, 1  ;;  %v639_v43 = vrot.slane %v529_v30, 1 }
 0x112   : > { %6224 = vrot.lane.b32.xlu0 %v7140_v61, %s6427_s12  ;;  %v7206_v63 = vpack.i.bf16 %v817_v44, %v815_v46 }
 0x114   : > { %v6015_v4 = vpop.permute.xlu0 %6014  ;;  %6234 = vrot.lane.b32.xlu2 %v7163_v25, %s6429_s14 }
 0x115   : > { %v6017_v50 = vunpack.i.h.bf16 %v6015_v4  ;;  %v6016_v28 = vunpack.i.l.bf16 %v6015_v4  ;;  %6244 = vrot.lane.b32.xlu1 %v7083_v17, %s6428_s13  ;;  %v6027_v17 = vunpack.i.h.bf16 %v7107_v55  ;;  %v640_v4 = vsel %vm565_vm1, %v637_v18, %v639_v43 }
 0x116   : > { %v7186_v49 = vpop.permute.xlu2 %6069 }
 0x117   : > { %v6035_v14 = vpop.permute.xlu1 %6034  ;;  %v1631_v12 = vsel %vm1618_vm6, %v1598_v19, %v6016_v28  ;;  %v1632_v38 = vsel %vm1618_vm6, %v1599_v35, %v6017_v50  ;;  %v6263_v28 = vpack.i.bf16 %v7168_v41, %v7171_v24  ;;  %v1535_v19 = vsel %vm1519_vm3, %v6677_v31, %v6042_v0 }
 0x118   : > { %v1664_v21 = vsel %vm1651_vm7, %v1631_v12, %v6021_v37  ;;  %v1665_v8 = vsel %vm1651_vm7, %v1632_v38, %v6022_v36  ;;  %v6037_v56 = vunpack.i.h.bf16 %v6035_v14  ;;  %v6036_v11 = vunpack.i.l.bf16 %v6035_v14  ;;  %v324_v12 = vld [vmem:[%s6497_s8 + $0xe0] sm:$0xff]  ;;  %v325_v38 = vld [vmem:[%s6497_s8 + $0xe8] sm:$0xff] }
 0x119   : > { %v1697_v55 = vsel %vm1684_vm8, %v1664_v21, %v6026_v23  ;;  %v1698_v1 = vsel %vm1684_vm8, %v1665_v8, %v6027_v17  ;;  %v1534_v35 = vsel %vm1519_vm3, %v6680_v33, %v6041_v47  ;;  %v436_v31 = vrot.slane %v324_v12, 7 }
 0x11a   : > { %6239 = vrot.lane.b32.xlu0 %v7079_v34, %s6425_s10  ;;  %v636_v34 = vrot.slane %v7171_v24, 1  ;;  %v437_v48 = vrot.slane %v325_v38, 7  ;;  %v6057_v21 = vunpack.i.h.bf16 %v7155_v16  ;;  %v6056_v8 = vunpack.i.l.bf16 %v7155_v16 }
 0x11b   : > { %v6072_v47 = vunpack.i.h.bf16 %v7186_v49 }
 0x11c   : > { %v6030_v51 = vpop.permute.xlu0 %6029  ;;  %6249 = vrot.lane.b32.xlu2 %v7140_v61, %s6424_s9  ;;  %v638_v61 = vsel %vm565_vm1, %v636_v34, %v637_v18  ;;  %v7242_v34 = vsel %vm390_vm0, %v436_v31, %v437_v48 }
 0x11d   : > { %v6032_v10 = vunpack.i.h.bf16 %v6030_v51  ;;  %v6031_v5 = vunpack.i.l.bf16 %v6030_v51  ;;  %6259 = vrot.lane.b32.xlu1 %v7163_v25, %s6430_s15  ;;  %v7225_v37 = vpack.i.bf16 %v640_v4, %v638_v61  ;;  %v642_v38 = vrot.slane %v7242_v34, 1 }
 0x11e   : > { %v7212_v22 = vpop.permute.xlu2 %6084 }
 0x11f   : > { %v1730_v39 = vsel %vm1717_vm9, %v1697_v55, %v6031_v5  ;;  %v1731_v32 = vsel %vm1717_vm9, %v1698_v1, %v6032_v10  ;;  %v6050_v7 = vpop.permute.xlu1 %6049  ;;  %v7245_v55 = vsel %vm390_vm0, 0.0, %v436_v31  ;;  %v530_v1 = vsel %vm390_vm0, %v437_v48, 0.0  ;;  %v7286_v31 = vld [vmem:[%s6497_s8 + $0xf0] sm:$0xff]  ;;  %v7289_v48 = vld [vmem:[%s6497_s8 + $0xf8] sm:$0xff] }
 0x120   : > { %v1763_v15 = vsel %vm1750_vm10, %v1730_v39, %v6036_v11  ;;  %v1764_v42 = vsel %vm1750_vm10, %v1731_v32, %v6037_v56  ;;  %v6052_v17 = vunpack.i.h.bf16 %v6050_v7  ;;  %v6051_v23 = vunpack.i.l.bf16 %v6050_v7 }
 0x121   : > { %v1796_v45 = vsel %vm1783_vm11, %v1763_v15, 0.0  ;;  %v1797_v20 = vsel %vm1783_vm11, %v1764_v42, 0.0  ;;  %v1910_v36 = vpop.f32.mrf.mxu0  ;;  %v818_v15 = vrot.slane %v7245_v55, 2  ;;  %v819_v42 = vrot.slane %v7242_v34, 2 }
 0x122   : > { %6254 = vrot.lane.b32.xlu0 %v7127_v53, %s6426_s11  ;;  %v1822_v3 = vpack.c.bf16 %v1797_v20, %v1796_v45  ;;  %v7259_v45 = vld [vmem:[%s8870_s2] ss:$0 sm:$0xff]  ;;  %v7263_v20 = vpack.i.bf16 %v7242_v34, %v7245_v55  ;;  %v821_v0 = vrot.slane %v530_v1, 2  ;;  %v641_v12 = vrot.slane %v7245_v55, 1 }
 0x124   : > { %v6045_v50 = vpop.permute.xlu0 %6044  ;;  %4430 = vmatmul.msk.bf16.gmra.mxu0 %vm1852_vm12, %v1822_v3  ;;  %6264 = vrot.lane.b32.xlu2 %v6263_v28, %s6427_s12  ;;  %v6071_v3 = vunpack.i.l.bf16 %v7186_v49 }
 0x125   : > { %v6047_v30 = vunpack.i.h.bf16 %v6045_v50  ;;  %v6046_v60 = vunpack.i.l.bf16 %v6045_v50  ;;  %6274 = vrot.lane.b32.xlu1 %v7206_v63, %s6429_s14 }
 0x126   : > { %v7234_v33 = vpop.permute.xlu2 %6099 }
 0x127   : > { %v6065_v14 = vpop.permute.xlu1 %6064  ;;  %v1567_v62 = vsel %vm1552_vm4, %v1534_v35, %v6046_v60  ;;  %v1568_v9 = vsel %vm1552_vm4, %v1535_v19, %v6047_v30  ;;  %v820_v30 = vsel %vm742_vm2, %v818_v15, %v819_v42  ;;  %v1911_v60 = vadd.f32 %v7259_v45, %v1910_v36 }
 0x128   : > { %v1601_v51 = vsel %vm1585_vm5, %v1568_v9, %v6052_v17  ;;  %v1600_v56 = vsel %vm1585_vm5, %v1567_v62, %v6051_v23  ;;  %v6067_v44 = vunpack.i.h.bf16 %v6065_v14  ;;  %v6066_v39 = vunpack.i.l.bf16 %v6065_v14 }
 0x129   : > { %v1633_v46 = vsel %vm1618_vm6, %v1600_v56, %v6056_v8  ;;  %v1634_v16 = vsel %vm1618_vm6, %v1601_v51, %v6057_v21  ;;  %v1912_v7 = vpop.f32.mrf.mxu0  ;;  %v644_v9 = vrot.slane %v530_v1, 1  ;;  %v6087_v1 = vunpack.i.h.bf16 %v7212_v22 }
 0x12a   : > { %6269 = vrot.lane.b32.xlu0 %v7225_v37, %s6431_s16 }
 0x12b   : > { %v645_v15 = vsel %vm565_vm1, %v642_v38, %v644_v9 }
 0x12c   : > { %v6060_v11 = vpop.permute.xlu0 %6059  ;;  %6279 = vrot.lane.b32.xlu2 %v7127_v53, %s6425_s10  ;;  %v1913_v53 = vadd.f32 %v7259_v45, %v1912_v7 }
 0x12d   : > { %v6062_v10 = vunpack.i.h.bf16 %v6060_v11  ;;  %v6061_v5 = vunpack.i.l.bf16 %v6060_v11  ;;  %6289 = vrot.lane.b32.xlu1 %v6263_v28, %s6424_s9 }
 0x12e   : > { %v7269_v61 = vpop.permute.xlu2 %6114  ;;  %v1991_v17 = vmax.f32 %v1913_v53, 0.0 }
 0x12f   : > { %v6080_v32 = vpop.permute.xlu1 %6079  ;;  %v1666_v18 = vsel %vm1651_vm7, %v1633_v46, %v6061_v5  ;;  %v1667_v43 = vsel %vm1651_vm7, %v1634_v16, %v6062_v10  ;;  %v1990_v10 = vmax.f32 %v1911_v60, 0.0  ;;  %v6086_v16 = vunpack.i.l.bf16 %v7212_v22 }
 0x130   : > { %v1699_v4 = vsel %vm1684_vm8, %v1666_v18, %v6066_v39  ;;  %v1700_v50 = vsel %vm1684_vm8, %v1667_v43, %v6067_v44  ;;  %v6082_v21 = vunpack.i.h.bf16 %v6080_v32  ;;  %v6081_v8 = vunpack.i.l.bf16 %v6080_v32 }
 0x131   : > { %v1732_v35 = vsel %vm1717_vm9, %v1699_v4, %v6071_v3  ;;  %v1733_v14 = vsel %vm1717_vm9, %v1700_v50, %v6072_v47  ;;  %v439_v39 = vrot.slane %v7286_v31, 7  ;;  %v440_v32 = vrot.slane %v7289_v48, 7 }
 0x132   : > { %6284 = vrot.lane.b32.xlu0 %v7163_v25, %s6428_s13  ;;  %v822_v25 = vsel %vm742_vm2, %v819_v42, %v821_v0  ;;  %v2023_v7 = vadd.f32 %v1991_v17, %v1990_v10  ;;  %v643_v43 = vsel %vm565_vm1, %v641_v12, %v642_v38  ;;  %v1537_v22 = vsel %vm1519_vm3, %v6723_v6, %v6082_v21 }
 0x133   : > { %v1536_v42 = vsel %vm1519_vm3, %v6735_v26, %v6081_v8  ;;  %v7311_v47 = vpack.i.bf16 %v645_v15, %v643_v43  ;;  %v7315_v50 = vpack.i.bf16 %v822_v25, %v820_v30  ;;  %v7321_v60 = vsel %vm390_vm0, 0.0, %v439_v39 }
 0x134   : > { %v6075_v28 = vpop.permute.xlu0 %6074  ;;  %6294 = vrot.lane.b32.xlu2 %v7225_v37, %s6426_s11  ;;  %v7324_v6 = vsel %vm390_vm0, %v440_v32, 0.0  ;;  %v1569_v26 = vsel %vm1552_vm4, %v1536_v42, %v6086_v16  ;;  %v6102_v25 = vunpack.i.h.bf16 %v7234_v33  ;;  %v6101_v12 = vunpack.i.l.bf16 %v7234_v33 }
 0x135   : > { %v6077_v19 = vunpack.i.h.bf16 %v6075_v28  ;;  %v6076_v49 = vunpack.i.l.bf16 %v6075_v28  ;;  %6304 = vrot.lane.b32.xlu1 %v7263_v20, %s6427_s12  ;;  %v7318_v28 = vsel %vm390_vm0, %v439_v39, %v440_v32  ;;  %v1017_v17 = vrot.slane %v7321_v60, 1 }
 0x136   : > { %v7300_v44 = vpop.permute.xlu2 %6129  ;;  %v6117_v33 = vunpack.i.h.bf16 %v7269_v61 }
 0x137   : > { %v1765_v23 = vsel %vm1750_vm10, %v1732_v35, %v6076_v49  ;;  %v1766_v36 = vsel %vm1750_vm10, %v1733_v14, %v6077_v19  ;;  %v6095_v62 = vpop.permute.xlu1 %6094  ;;  %v1570_v19 = vsel %vm1552_vm4, %v1537_v22, %v6087_v1 }
 0x138   : > { %v1915_v51 = vpop.f32.mrf.mxu0  ;;  %v1798_v56 = vsel %vm1783_vm11, %v1765_v23, 0.0  ;;  %v1799_v11 = vsel %vm1783_vm11, %v1766_v36, 0.0  ;;  %v6097_v49 = vunpack.i.h.bf16 %v6095_v62  ;;  %v6096_v35 = vunpack.i.l.bf16 %v6095_v62 }
 0x139   : > { %v1916_v5 = vadd.f32 %v7259_v45, %v1915_v51  ;;  %v1823_v46 = vpack.c.bf16 %v1799_v11, %v1798_v56  ;;  %v1018_v23 = vrot.slane %v7318_v28, 1  ;;  %v1020_v36 = vrot.slane %v7324_v6, 1 }
 0x13a   : > { %6299 = vrot.lane.b32.xlu0 %v7206_v63, %s6430_s15 }
 0x13b   : > { %v1992_v18 = vmax.f32 %v1916_v5, 0.0  ;;  %4431 = vmatmul.msk.bf16.gmra.mxu0 %vm1852_vm12, %v1823_v46  ;;  %v6116_v46 = vunpack.i.l.bf16 %v7269_v61  ;;  %v1019_v39 = vsel %vm565_vm1, %v1017_v17, %v1018_v23  ;;  %v1021_v32 = vsel %vm565_vm1, %v1018_v23, %v1020_v36 }
 0x13c   : > { %v6090_v0 = vpop.permute.xlu0 %6089  ;;  %6309 = vrot.lane.b32.xlu2 %v7311_v47, %s6431_s16  ;;  %v353_v17 = vmul.f32 0.0, %v7289_v48 }
 0x13d   : > { %v2024_v3 = vadd.f32 %v2023_v7, %v1992_v18  ;;  %v6092_v53 = vunpack.i.h.bf16 %v6090_v0  ;;  %v6091_v4 = vunpack.i.l.bf16 %v6090_v0  ;;  %6319 = vrot.lane.b32.xlu1 %v7225_v37, %s6425_s10 }
 0x13e   : > { %v7339_v62 = vpop.permute.xlu2 %6144 }
 0x13f   : > { %v6110_v14 = vpop.permute.xlu1 %6109  ;;  %v1602_v37 = vsel %vm1585_vm5, %v1569_v26, %v6091_v4  ;;  %v1603_v30 = vsel %vm1585_vm5, %v1570_v19, %v6092_v53  ;;  %v7360_v53 = vpack.i.bf16 %v1021_v32, %v1019_v39 }
 0x140   : > { %v1917_v38 = vpop.f32.mrf.mxu0  ;;  %v1635_v9 = vsel %vm1618_vm6, %v1602_v37, %v6096_v35  ;;  %v1636_v21 = vsel %vm1618_vm6, %v1603_v30, %v6097_v49  ;;  %v6112_v51 = vunpack.i.h.bf16 %v6110_v14  ;;  %v6111_v56 = vunpack.i.l.bf16 %v6110_v14 }
 0x141   : > { %v1918_v11 = vadd.f32 %v7259_v45, %v1917_v38  ;;  %v1668_v1 = vsel %vm1651_vm7, %v1635_v9, %v6101_v12  ;;  %v1669_v16 = vsel %vm1651_vm7, %v1636_v21, %v6102_v25  ;;  %v352_v38 = vmul.f32 0.0, %v7286_v31 }
 0x142   : > { %6314 = vrot.lane.b32.xlu0 %v7315_v50, %s6429_s14  ;;  %v1119_v9 = vrot.slane %v7318_v28, 2  ;;  %v1121_v21 = vrot.slane %v7324_v6, 2  ;;  %v6132_v6 = vunpack.i.h.bf16 %v7300_v44 }
 0x143   : > { %v1993_v22 = vmax.f32 %v1918_v11, 0.0 }
 0x144   : > { %v6105_v8 = vpop.permute.xlu0 %6104  ;;  %6324 = vrot.lane.b32.xlu2 %v7206_v63, %s6428_s13 }
 0x145   : > { %v6107_v10 = vunpack.i.h.bf16 %v6105_v8  ;;  %v6106_v5 = vunpack.i.l.bf16 %v6105_v8  ;;  %6334 = vrot.lane.b32.xlu1 %v7311_v47, %s6426_s11  ;;  %v2025_v37 = vadd.f32 %v2024_v3, %v1993_v22  ;;  %v1118_v3 = vrot.slane %v7321_v60, 2 }
 0x146   : > { %v7366_v49 = vpop.permute.xlu2 %6159 }
 0x147   : > { %v1701_v7 = vsel %vm1684_vm8, %v1668_v1, %v6106_v5  ;;  %v1702_v18 = vsel %vm1684_vm8, %v1669_v16, %v6107_v10  ;;  %v6125_v43 = vpop.permute.xlu1 %6124  ;;  %v1120_v11 = vsel %vm742_vm2, %v1118_v3, %v1119_v9  ;;  %v1122_v10 = vsel %vm742_vm2, %v1119_v9, %v1121_v21 }
 0x148   : > { %v1734_v15 = vsel %vm1717_vm9, %v1701_v7, %v6111_v56  ;;  %v1735_v61 = vsel %vm1717_vm9, %v1702_v18, %v6112_v51  ;;  %v6127_v8 = vunpack.i.h.bf16 %v6125_v43  ;;  %v6126_v51 = vunpack.i.l.bf16 %v6125_v43 }
 0x149   : > { %v1767_v42 = vsel %vm1750_vm10, %v1734_v15, %v6116_v46  ;;  %v1768_v0 = vsel %vm1750_vm10, %v1735_v61, %v6117_v33  ;;  %v6131_v33 = vunpack.i.l.bf16 %v7300_v44  ;;  %v6378_v16 = vpack.i.bf16 %v1122_v10, %v1120_v11 }
 0x14a   : > { %6329 = vrot.lane.b32.xlu0 %v7263_v20, %s6424_s9  ;;  %v1920_v4 = vpop.f32.mrf.mxu0  ;;  %v1800_v26 = vsel %vm1783_vm11, %v1767_v42, 0.0  ;;  %v1801_v19 = vsel %vm1783_vm11, %v1768_v0, 0.0  ;;  %v7374_v20 = vpack.i.bf16 %v7318_v28, %v7321_v60  ;;  %v442_v60 = vrot.slane %v352_v38, 7 }
 0x14b   : > { %v1921_v35 = vadd.f32 %v7259_v45, %v1920_v4  ;;  %v1824_v63 = vpack.c.bf16 %v1801_v19, %v1800_v26  ;;  %v443_v28 = vrot.slane %v353_v17, 7  ;;  %v6147_v0 = vunpack.i.h.bf16 %v7339_v62 }
 0x14c   : > { %v6120_v14 = vpop.permute.xlu0 %6119  ;;  %6339 = vrot.lane.b32.xlu2 %v7315_v50, %s6430_s15  ;;  %v7405_v44 = vsel %vm390_vm0, 0.0, %v442_v60  ;;  %v6146_v4 = vunpack.i.l.bf16 %v7339_v62 }
 0x14d   : > { %v1994_v30 = vmax.f32 %v1921_v35, 0.0  ;;  %v6122_v25 = vunpack.i.h.bf16 %v6120_v14  ;;  %v6121_v12 = vunpack.i.l.bf16 %v6120_v14  ;;  %4432 = vmatmul.msk.bf16.gmra.mxu0 %vm1852_vm12, %v1824_v63  ;;  %6349 = vrot.lane.b32.xlu1 %v7360_v53, %s6431_s16  ;;  %v7402_v39 = vsel %vm390_vm0, %v442_v60, %v443_v28 }
 0x14e   : > { %v7391_v48 = vpop.permute.xlu2 %6174  ;;  %v532_v32 = vsel %vm390_vm0, %v443_v28, 0.0  ;;  %v1418_v26 = vrot.slane %v7405_v44, 2  ;;  %v1419_v19 = vrot.slane %v7402_v39, 2 }
 0x14f   : > { %v7378_v23 = vadd.f32 %v2025_v37, %v1994_v30  ;;  %v6140_v36 = vpop.permute.xlu1 %6139  ;;  %v1539_v56 = vsel %vm1519_vm3, %v6806_v52, %v6122_v25  ;;  %v1538_v31 = vsel %vm1519_vm3, %v6809_v29, %v6121_v12  ;;  %v1421_v35 = vrot.slane %v532_v32, 2 }
 0x150   : > { %v1572_v52 = vsel %vm1552_vm4, %v1539_v56, %v6127_v8  ;;  %v1571_v5 = vsel %vm1552_vm4, %v1538_v31, %v6126_v51  ;;  %v6142_v43 = vunpack.i.h.bf16 %v6140_v36  ;;  %v6141_v15 = vunpack.i.l.bf16 %v6140_v36 }
 0x151   : > { %v1604_v7 = vsel %vm1585_vm5, %v1571_v5, %v6131_v33  ;;  %v1605_v18 = vsel %vm1585_vm5, %v1572_v52, %v6132_v6  ;;  %v1420_v9 = vsel %vm742_vm2, %v1418_v26, %v1419_v19  ;;  %v1422_v21 = vsel %vm742_vm2, %v1419_v19, %v1421_v35 }
 0x152   : > { %6344 = vrot.lane.b32.xlu0 %v7374_v20, %s6427_s12  ;;  %v1922_v42 = vpop.f32.mrf.mxu0  ;;  %v1318_v31 = vrot.slane %v7402_v39, 1  ;;  %v1320_v60 = vrot.slane %v532_v32, 1  ;;  %v6393_v5 = vpack.i.bf16 %v1422_v21, %v1420_v9  ;;  %v6176_v35 = vunpack.i.l.bf16 %v7391_v48 }
 0x153   : > { %v1923_v30 = vadd.f32 %v7259_v45, %v1922_v42 }
 0x154   : > { %v6135_v29 = vpop.permute.xlu0 %6134  ;;  %6354 = vrot.lane.b32.xlu2 %v6378_v16, %s6429_s14 }
 0x155   : > { %v6137_v46 = vunpack.i.h.bf16 %v6135_v29  ;;  %v6136_v1 = vunpack.i.l.bf16 %v6135_v29  ;;  %6364 = vrot.lane.b32.xlu1 %v7315_v50, %s6428_s13  ;;  %v1995_v28 = vmax.f32 %v1923_v30, 0.0  ;;  %v6162_v29 = vunpack.i.h.bf16 %v7366_v49 }
 0x156   : > { %v7419_v63 = vpop.permute.xlu2 %6189 }
 0x157   : > { %v6155_v61 = vpop.permute.xlu1 %6154  ;;  %v1637_v22 = vsel %vm1618_vm6, %v1604_v7, %v6136_v1  ;;  %v1638_v50 = vsel %vm1618_vm6, %v1605_v18, %v6137_v46  ;;  %v6161_v46 = vunpack.i.l.bf16 %v7366_v49  ;;  %v1321_v7 = vsel %vm565_vm1, %v1318_v31, %v1320_v60 }
 0x158   : > { %v1670_v14 = vsel %vm1651_vm7, %v1637_v22, %v6141_v15  ;;  %v1671_v37 = vsel %vm1651_vm7, %v1638_v50, %v6142_v43  ;;  %v6157_v12 = vunpack.i.h.bf16 %v6155_v61  ;;  %v6156_v38 = vunpack.i.l.bf16 %v6155_v61 }
 0x159   : > { %v1703_v36 = vsel %vm1684_vm8, %v1670_v14, %v6146_v4  ;;  %v1704_v3 = vsel %vm1684_vm8, %v1671_v37, %v6147_v0  ;;  %v2027_v18 = vadd.f32 %v7378_v23, %v1995_v28  ;;  %v6383_v49 = vpack.i.bf16 %v7402_v39, %v7405_v44 }
 0x15a   : > { %6359 = vrot.lane.b32.xlu0 %v7311_v47, %s6425_s10  ;;  %v1317_v47 = vrot.slane %v7405_v44, 1  ;;  %v1540_v50 = vsel %vm1519_vm3, %v6871_v59, %v6161_v46  ;;  %v6191_v21 = vunpack.i.l.bf16 %v7419_v63 }
 0x15c   : > { %v6150_v25 = vpop.permute.xlu0 %6149  ;;  %6369 = vrot.lane.b32.xlu2 %v7374_v20, %s6424_s9  ;;  %v1319_v20 = vsel %vm565_vm1, %v1317_v47, %v1318_v31 }
 0x15d   : > { %v6152_v62 = vunpack.i.h.bf16 %v6150_v25  ;;  %v6151_v17 = vunpack.i.l.bf16 %v6150_v25  ;;  %6379 = vrot.lane.b32.xlu1 %v6378_v16, %s6430_s15  ;;  %v6388_v0 = vpack.i.bf16 %v1321_v7, %v1319_v20 }
 0x15e   : > { %v7444_v32 = vpop.permute.xlu2 %6204 }
 0x15f   : > { %v1736_v8 = vsel %vm1717_vm9, %v1703_v36, %v6151_v17  ;;  %v1737_v51 = vsel %vm1717_vm9, %v1704_v3, %v6152_v62  ;;  %v6170_v56 = vpop.permute.xlu1 %6169 }
 0x160   : > { %v1769_v6 = vsel %vm1750_vm10, %v1736_v8, %v6156_v38  ;;  %v1770_v33 = vsel %vm1750_vm10, %v1737_v51, %v6157_v12  ;;  %v6172_v4 = vunpack.i.h.bf16 %v6170_v56  ;;  %v6171_v26 = vunpack.i.l.bf16 %v6170_v56 }
 0x161   : > { %v1925_v11 = vpop.f32.mrf.mxu0  ;;  %v1802_v10 = vsel %vm1783_vm11, %v1769_v6, 0.0  ;;  %v1803_v52 = vsel %vm1783_vm11, %v1770_v33, 0.0 }
 0x162   : > { %v1926_v1 = vadd.f32 %v7259_v45, %v1925_v11  ;;  %6374 = vrot.lane.b32.xlu0 %v7360_v53, %s6426_s11  ;;  %v1825_v16 = vpack.c.bf16 %v1803_v52, %v1802_v10  ;;  %v1541_v53 = vsel %vm1519_vm3, %v6868_v57, %v6162_v29  ;;  %v6177_v57 = vunpack.i.h.bf16 %v7391_v48 }
 0x163   : > { %v6192_v48 = vunpack.i.h.bf16 %v7419_v63 }
 0x164   : > { %v1996_v43 = vmax.f32 %v1926_v1, 0.0  ;;  %v6165_v15 = vpop.permute.xlu0 %6164  ;;  %4433 = vmatmul.msk.bf16.gmra.mxu0 %vm1852_vm12, %v1825_v16  ;;  %6384 = vrot.lane.b32.xlu2 %v6383_v49, %s6427_s12  ;;  %v6206_v49 = vunpack.i.l.bf16 %v7444_v32 }
 0x165   : > { %v6167_v61 = vunpack.i.h.bf16 %v6165_v15  ;;  %v6166_v22 = vunpack.i.l.bf16 %v6165_v15  ;;  %6394 = vrot.lane.b32.xlu1 %v6393_v5, %s6429_s14  ;;  %v6207_v15 = vunpack.i.h.bf16 %v7444_v32 }
 0x166   : > { %v2028_v42 = vadd.f32 %v2027_v18, %v1996_v43  ;;  %v7461_v44 = vpop.permute.xlu2 %6219 }
 0x167   : > { %v6185_v23 = vpop.permute.xlu1 %6184  ;;  %v1573_v19 = vsel %vm1552_vm4, %v1540_v50, %v6166_v22  ;;  %v1574_v39 = vsel %vm1552_vm4, %v1541_v53, %v6167_v61 }
 0x168   : > { %v1607_v59 = vsel %vm1585_vm5, %v1574_v39, %v6172_v4  ;;  %v1606_v14 = vsel %vm1585_vm5, %v1573_v19, %v6171_v26  ;;  %v6187_v62 = vunpack.i.h.bf16 %v6185_v23  ;;  %v6186_v17 = vunpack.i.l.bf16 %v6185_v23 }
 0x169   : > { %v1639_v12 = vsel %vm1618_vm6, %v1606_v14, %v6176_v35  ;;  %v1640_v38 = vsel %vm1618_vm6, %v1607_v59, %v6177_v57  ;;  %v1927_v36 = vpop.f32.mrf.mxu0  ;;  %v6221_v14 = vunpack.i.l.bf16 %v7461_v44 }
 0x16a   : > { %6389 = vrot.lane.b32.xlu0 %v6388_v0, %s6431_s16  ;;  %v1928_v51 = vadd.f32 %v7259_v45, %v1927_v36 }
 0x16c   : > { %v6180_v37 = vpop.permute.xlu0 %6179  ;;  %v1997_v10 = vmax.f32 %v1928_v51, 0.0 }
 0x16d   : > { %v6182_v30 = vunpack.i.h.bf16 %v6180_v37  ;;  %v6181_v25 = vunpack.i.l.bf16 %v6180_v37 }
 0x16e   : > { %v7473_v8 = vpop.permute.xlu2 %6234  ;;  %v2029_v43 = vadd.f32 %v2028_v42, %v1997_v10 }
 0x16f   : > { %v6200_v47 = vpop.permute.xlu1 %6199  ;;  %v1672_v3 = vsel %vm1651_vm7, %v1639_v12, %v6181_v25  ;;  %v1673_v9 = vsel %vm1651_vm7, %v1640_v38, %v6182_v30 }
 0x170   : > { %v1705_v56 = vsel %vm1684_vm8, %v1672_v3, %v6186_v17  ;;  %v1706_v31 = vsel %vm1684_vm8, %v1673_v9, %v6187_v62  ;;  %v6202_v29 = vunpack.i.h.bf16 %v6200_v47  ;;  %v6201_v46 = vunpack.i.l.bf16 %v6200_v47 }
 0x171   : > { %v1738_v33 = vsel %vm1717_vm9, %v1705_v56, %v6191_v21  ;;  %v1739_v11 = vsel %vm1717_vm9, %v1706_v31, %v6192_v48  ;;  %v6237_v62 = vunpack.i.h.bf16 %v7473_v8  ;;  %v6236_v3 = vunpack.i.l.bf16 %v7473_v8 }
 0x172   : > { %v1543_v53 = vsel %vm1519_vm3, %v6950_v40, %v6202_v29  ;;  %v1542_v50 = vsel %vm1519_vm3, %v6953_v13, %v6201_v46  ;;  %v6222_v40 = vunpack.i.h.bf16 %v7461_v44 }
 0x173   : > { %v1575_v42 = vsel %vm1552_vm4, %v1542_v50, %v6206_v49  ;;  %v1576_v19 = vsel %vm1552_vm4, %v1543_v53, %v6207_v15 }
 0x174   : > { %v6195_v60 = vpop.permute.xlu0 %6194 }
 0x175   : > { %v6197_v28 = vunpack.i.h.bf16 %v6195_v60  ;;  %v6196_v6 = vunpack.i.l.bf16 %v6195_v60 }
 0x176   : > { %v7488_v22 = vpop.permute.xlu2 %6249 }
 0x177   : > { %v1771_v52 = vsel %vm1750_vm10, %v1738_v33, %v6196_v6  ;;  %v1772_v63 = vsel %vm1750_vm10, %v1739_v11, %v6197_v28  ;;  %v6215_v5 = vpop.permute.xlu1 %6214  ;;  %v6252_v53 = vunpack.i.h.bf16 %v7488_v22  ;;  %v6251_v50 = vunpack.i.l.bf16 %v7488_v22 }
 0x178   : > { %v1930_v1 = vpop.f32.mrf.mxu0  ;;  %v1804_v16 = vsel %vm1783_vm11, %v1771_v52, 0.0  ;;  %v1805_v20 = vsel %vm1783_vm11, %v1772_v63, 0.0  ;;  %v6217_v32 = vunpack.i.h.bf16 %v6215_v5  ;;  %v6216_v39 = vunpack.i.l.bf16 %v6215_v5 }
 0x179   : > { %v1931_v7 = vadd.f32 %v7259_v45, %v1930_v1  ;;  %v1826_v18 = vpack.c.bf16 %v1805_v20, %v1804_v16 }
 0x17b   : > { %v1998_v61 = vmax.f32 %v1931_v7, 0.0  ;;  %4434 = vmatmul.msk.bf16.gmra.mxu0 %vm1852_vm12, %v1826_v18 }
 0x17c   : > { %v6210_v0 = vpop.permute.xlu0 %6209 }
 0x17d   : > { %v2030_v23 = vadd.f32 %v2029_v43, %v1998_v61  ;;  %v6212_v4 = vunpack.i.h.bf16 %v6210_v0  ;;  %v6211_v26 = vunpack.i.l.bf16 %v6210_v0 }
 0x17e   : > { %v6265_v9 = vpop.permute.xlu2 %6264 }
 0x17f   : > { %v6230_v57 = vpop.permute.xlu1 %6229  ;;  %v1608_v35 = vsel %vm1585_vm5, %v1575_v42, %v6211_v26  ;;  %v1609_v59 = vsel %vm1585_vm5, %v1576_v19, %v6212_v4 }
 0x180   : > { %v1932_v13 = vpop.f32.mrf.mxu0  ;;  %v1641_v37 = vsel %vm1618_vm6, %v1608_v35, %v6216_v39  ;;  %v1642_v30 = vsel %vm1618_vm6, %v1609_v59, %v6217_v32  ;;  %v6232_v12 = vunpack.i.h.bf16 %v6230_v57  ;;  %v6231_v38 = vunpack.i.l.bf16 %v6230_v57 }
 0x181   : > { %v1933_v17 = vadd.f32 %v7259_v45, %v1932_v13  ;;  %v1674_v48 = vsel %vm1651_vm7, %v1641_v37, %v6221_v14  ;;  %v1675_v44 = vsel %vm1651_vm7, %v1642_v30, %v6222_v40  ;;  %v6267_v40 = vunpack.i.h.bf16 %v6265_v9 }
 0x182   : > { %v6266_v14 = vunpack.i.l.bf16 %v6265_v9 }
 0x183   : > { %v1999_v28 = vmax.f32 %v1933_v17, 0.0 }
 0x184   : > { %v6225_v25 = vpop.permute.xlu0 %6224 }
 0x185   : > { %v6227_v47 = vunpack.i.h.bf16 %v6225_v25  ;;  %v6226_v36 = vunpack.i.l.bf16 %v6225_v25  ;;  %v2031_v29 = vadd.f32 %v2030_v23, %v1999_v28 }
 0x186   : > { %v6280_v18 = vpop.permute.xlu2 %6279 }
 0x187   : > { %v1707_v21 = vsel %vm1684_vm8, %v1674_v48, %v6226_v36  ;;  %v1708_v51 = vsel %vm1684_vm8, %v1675_v44, %v6227_v47  ;;  %v6245_v56 = vpop.permute.xlu1 %6244  ;;  %v6282_v28 = vunpack.i.h.bf16 %v6280_v18 }
 0x188   : > { %v1740_v31 = vsel %vm1717_vm9, %v1707_v21, %v6231_v38  ;;  %v1741_v60 = vsel %vm1717_vm9, %v1708_v51, %v6232_v12  ;;  %v6247_v43 = vunpack.i.h.bf16 %v6245_v56  ;;  %v6246_v15 = vunpack.i.l.bf16 %v6245_v56 }
 0x189   : > { %v1773_v6 = vsel %vm1750_vm10, %v1740_v31, %v6236_v3  ;;  %v1774_v33 = vsel %vm1750_vm10, %v1741_v60, %v6237_v62 }
 0x18a   : > { %v1935_v8 = vpop.f32.mrf.mxu0  ;;  %v1806_v11 = vsel %vm1783_vm11, %v1773_v6, 0.0  ;;  %v1807_v10 = vsel %vm1783_vm11, %v1774_v33, 0.0  ;;  %v6281_v6 = vunpack.i.l.bf16 %v6280_v18 }
 0x18b   : > { %v1936_v52 = vadd.f32 %v7259_v45, %v1935_v8  ;;  %v1827_v63 = vpack.c.bf16 %v1807_v10, %v1806_v11 }
 0x18c   : > { %v6240_v5 = vpop.permute.xlu0 %6239 }
 0x18d   : > { %v2000_v46 = vmax.f32 %v1936_v52, 0.0  ;;  %v6242_v1 = vunpack.i.h.bf16 %v6240_v5  ;;  %v6241_v16 = vunpack.i.l.bf16 %v6240_v5  ;;  %4435 = vmatmul.msk.bf16.gmra.mxu0 %vm1852_vm12, %v1827_v63 }
 0x18e   : > { %v6295_v22 = vpop.permute.xlu2 %6294 }
 0x18f   : > { %v2032_v20 = vadd.f32 %v2031_v29, %v2000_v46  ;;  %v6260_v7 = vpop.permute.xlu1 %6259  ;;  %v1545_v49 = vsel %vm1519_vm3, %v7024_v58, %v6242_v1  ;;  %v1544_v61 = vsel %vm1519_vm3, %v7027_v54, %v6241_v16  ;;  %v1547_v46 = vsel %vm1519_vm3, %v7086_v2, %v6282_v28 }
 0x190   : > { %v1578_v0 = vsel %vm1552_vm4, %v1545_v49, %v6247_v43  ;;  %v1577_v23 = vsel %vm1552_vm4, %v1544_v61, %v6246_v15  ;;  %v6262_v39 = vunpack.i.h.bf16 %v6260_v7  ;;  %v6261_v58 = vunpack.i.l.bf16 %v6260_v7 }
 0x191   : > { %v1610_v19 = vsel %vm1585_vm5, %v1577_v23, %v6251_v50  ;;  %v1611_v32 = vsel %vm1585_vm5, %v1578_v0, %v6252_v53  ;;  %v1546_v1 = vsel %vm1519_vm3, %v7089_v27, %v6281_v6  ;;  %v6297_v53 = vunpack.i.h.bf16 %v6295_v22 }
 0x192   : > { %v1937_v59 = vpop.f32.mrf.mxu0  ;;  %v6296_v50 = vunpack.i.l.bf16 %v6295_v22 }
 0x193   : > { %v1938_v30 = vadd.f32 %v7259_v45, %v1937_v59 }
 0x194   : > { %v6255_v4 = vpop.permute.xlu0 %6254 }
 0x195   : > { %v6257_v26 = vunpack.i.h.bf16 %v6255_v4  ;;  %v6256_v42 = vunpack.i.l.bf16 %v6255_v4  ;;  %v2001_v44 = vmax.f32 %v1938_v30, 0.0 }
 0x196   : > { %v6310_v11 = vpop.permute.xlu2 %6309 }
 0x197   : > { %v6275_v57 = vpop.permute.xlu1 %6274  ;;  %v1643_v54 = vsel %vm1618_vm6, %v1610_v19, %v6256_v42  ;;  %v1644_v35 = vsel %vm1618_vm6, %v1611_v32, %v6257_v26  ;;  %v2033_v10 = vadd.f32 %v2032_v20, %v2001_v44  ;;  %v6312_v22 = vunpack.i.h.bf16 %v6310_v11 }
 0x198   : > { %v1676_v13 = vsel %vm1651_vm7, %v1643_v54, %v6261_v58  ;;  %v1677_v37 = vsel %vm1651_vm7, %v1644_v35, %v6262_v39  ;;  %v6277_v12 = vunpack.i.h.bf16 %v6275_v57  ;;  %v6276_v38 = vunpack.i.l.bf16 %v6275_v57 }
 0x199   : > { %v1709_v47 = vsel %vm1684_vm8, %v1676_v13, %v6266_v14  ;;  %v1710_v36 = vsel %vm1684_vm8, %v1677_v37, %v6267_v40  ;;  %v6311_v40 = vunpack.i.l.bf16 %v6310_v11 }
 0x19c   : > { %v6270_v25 = vpop.permute.xlu0 %6269 }
 0x19d   : > { %v6272_v62 = vunpack.i.h.bf16 %v6270_v25  ;;  %v6271_v17 = vunpack.i.l.bf16 %v6270_v25 }
 0x19e   : > { %v6325_v42 = vpop.permute.xlu2 %6324 }
 0x19f   : > { %v1742_v3 = vsel %vm1717_vm9, %v1709_v47, %v6271_v17  ;;  %v1743_v48 = vsel %vm1717_vm9, %v1710_v36, %v6272_v62  ;;  %v6290_v9 = vpop.permute.xlu1 %6289 }
 0x1a0   : > { %v1775_v21 = vsel %vm1750_vm10, %v1742_v3, %v6276_v38  ;;  %v1776_v51 = vsel %vm1750_vm10, %v1743_v48, %v6277_v12  ;;  %v6292_v18 = vunpack.i.h.bf16 %v6290_v9  ;;  %v6291_v43 = vunpack.i.l.bf16 %v6290_v9 }
 0x1a1   : > { %v1808_v56 = vsel %vm1783_vm11, %v1775_v21, 0.0  ;;  %v1809_v31 = vsel %vm1783_vm11, %v1776_v51, 0.0  ;;  %v1940_v60 = vpop.f32.mrf.mxu0 }
 0x1a2   : > { %v1941_v33 = vadd.f32 %v7259_v45, %v1940_v60  ;;  %v1828_v8 = vpack.c.bf16 %v1809_v31, %v1808_v56  ;;  %v6327_v31 = vunpack.i.h.bf16 %v6325_v42  ;;  %v6326_v60 = vunpack.i.l.bf16 %v6325_v42 }
 0x1a4   : > { %v2002_v52 = vmax.f32 %v1941_v33, 0.0  ;;  %v6285_v63 = vpop.permute.xlu0 %6284  ;;  %4436 = vmatmul.msk.bf16.gmra.mxu0 %vm1852_vm12, %v1828_v8 }
 0x1a5   : > { %v6287_v5 = vunpack.i.h.bf16 %v6285_v63  ;;  %v6286_v29 = vunpack.i.l.bf16 %v6285_v63 }
 0x1a6   : > { %v2034_v16 = vadd.f32 %v2033_v10, %v2002_v52  ;;  %v6340_v36 = vpop.permute.xlu2 %6339 }
 0x1a7   : > { %v6305_v7 = vpop.permute.xlu1 %6304  ;;  %v1579_v15 = vsel %vm1552_vm4, %v1546_v1, %v6286_v29  ;;  %v1580_v20 = vsel %vm1552_vm4, %v1547_v46, %v6287_v5 }
 0x1a8   : > { %v1613_v0 = vsel %vm1585_vm5, %v1580_v20, %v6292_v18  ;;  %v1612_v2 = vsel %vm1585_vm5, %v1579_v15, %v6291_v43  ;;  %v6307_v58 = vunpack.i.h.bf16 %v6305_v7  ;;  %v6306_v57 = vunpack.i.l.bf16 %v6305_v7 }
 0x1a9   : > { %v1942_v49 = vpop.f32.mrf.mxu0  ;;  %v1645_v32 = vsel %vm1618_vm6, %v1612_v2, %v6296_v50  ;;  %v1646_v39 = vsel %vm1618_vm6, %v1613_v0, %v6297_v53  ;;  %v6341_v15 = vunpack.i.l.bf16 %v6340_v36 }
 0x1aa   : > { %v1943_v61 = vadd.f32 %v7259_v45, %v1942_v49 }
 0x1ac   : > { %v2003_v23 = vmax.f32 %v1943_v61, 0.0  ;;  %v6300_v4 = vpop.permute.xlu0 %6299 }
 0x1ad   : > { %v6302_v27 = vunpack.i.h.bf16 %v6300_v4  ;;  %v6301_v26 = vunpack.i.l.bf16 %v6300_v4 }
 0x1ae   : > { %v2035_v19 = vadd.f32 %v2034_v16, %v2003_v23  ;;  %v6355_v43 = vpop.permute.xlu2 %6354 }
 0x1af   : > { %v6320_v54 = vpop.permute.xlu1 %6319  ;;  %v1678_v35 = vsel %vm1651_vm7, %v1645_v32, %v6301_v26  ;;  %v1679_v59 = vsel %vm1651_vm7, %v1646_v39, %v6302_v27  ;;  %v6357_v2 = vunpack.i.h.bf16 %v6355_v43  ;;  %v6356_v26 = vunpack.i.l.bf16 %v6355_v43 }
 0x1b0   : > { %v1711_v14 = vsel %vm1684_vm8, %v1678_v35, %v6306_v57  ;;  %v1712_v13 = vsel %vm1684_vm8, %v1679_v59, %v6307_v58  ;;  %v6322_v9 = vunpack.i.h.bf16 %v6320_v54  ;;  %v6321_v44 = vunpack.i.l.bf16 %v6320_v54 }
 0x1b1   : > { %v1744_v12 = vsel %vm1717_vm9, %v1711_v14, %v6311_v40  ;;  %v1745_v38 = vsel %vm1717_vm9, %v1712_v13, %v6312_v22 }
 0x1b2   : > { %v1549_v6 = vsel %vm1519_vm3, %v7168_v41, %v6322_v9  ;;  %v1548_v33 = vsel %vm1519_vm3, %v7171_v24, %v6321_v44  ;;  %v6342_v24 = vunpack.i.h.bf16 %v6340_v36 }
 0x1b3   : > { %v1581_v63 = vsel %vm1552_vm4, %v1548_v33, %v6326_v60  ;;  %v1582_v5 = vsel %vm1552_vm4, %v1549_v6, %v6327_v31 }
 0x1b4   : > { %v6315_v37 = vpop.permute.xlu0 %6314 }
 0x1b5   : > { %v6317_v30 = vunpack.i.h.bf16 %v6315_v37  ;;  %v6316_v25 = vunpack.i.l.bf16 %v6315_v37 }
 0x1b7   : > { %v1777_v62 = vsel %vm1750_vm10, %v1744_v12, %v6316_v25  ;;  %v1778_v17 = vsel %vm1750_vm10, %v1745_v38, %v6317_v30  ;;  %v6335_v47 = vpop.permute.xlu1 %6334 }
 0x1b8   : > { %v1810_v3 = vsel %vm1783_vm11, %v1777_v62, 0.0  ;;  %v1811_v48 = vsel %vm1783_vm11, %v1778_v17, 0.0  ;;  %v1945_v21 = vpop.f32.mrf.mxu0  ;;  %v6337_v29 = vunpack.i.h.bf16 %v6335_v47  ;;  %v6336_v46 = vunpack.i.l.bf16 %v6335_v47  ;;  %v6370_v62 = vpop.permute.xlu2 %6369 }
 0x1b9   : > { %v1946_v51 = vadd.f32 %v7259_v45, %v1945_v21  ;;  %v1829_v56 = vpack.c.bf16 %v1811_v48, %v1810_v3  ;;  %v6372_v21 = vunpack.i.h.bf16 %v6370_v62 }
 0x1bb   : > { %v2004_v28 = vmax.f32 %v1946_v51, 0.0  ;;  %4437 = vmatmul.msk.bf16.gmra.mxu0 %vm1852_vm12, %v1829_v56  ;;  %v6371_v51 = vunpack.i.l.bf16 %v6370_v62 }
 0x1bc   : > { %v6330_v8 = vpop.permute.xlu0 %6329 }
 0x1bd   : > { %v2036_v11 = vadd.f32 %v2035_v19, %v2004_v28  ;;  %v6332_v10 = vunpack.i.h.bf16 %v6330_v8  ;;  %v6331_v52 = vunpack.i.l.bf16 %v6330_v8 }
 0x1bf   : > { %v6350_v1 = vpop.permute.xlu1 %6349  ;;  %v1614_v16 = vsel %vm1585_vm5, %v1581_v63, %v6331_v52  ;;  %v1615_v7 = vsel %vm1585_vm5, %v1582_v5, %v6332_v10 }
 0x1c0   : > { %v1947_v18 = vpop.f32.mrf.mxu0  ;;  %v1647_v20 = vsel %vm1618_vm6, %v1614_v16, %v6336_v46  ;;  %v1648_v49 = vsel %vm1618_vm6, %v1615_v7, %v6337_v29  ;;  %v6352_v50 = vunpack.i.h.bf16 %v6350_v1  ;;  %v6351_v0 = vunpack.i.l.bf16 %v6350_v1  ;;  %v6385_v63 = vpop.permute.xlu2 %6384 }
 0x1c1   : > { %v1948_v41 = vadd.f32 %v7259_v45, %v1947_v18  ;;  %v1680_v42 = vsel %vm1651_vm7, %v1647_v20, %v6341_v15  ;;  %v1681_v19 = vsel %vm1651_vm7, %v1648_v49, %v6342_v24  ;;  %v6387_v46 = vunpack.i.h.bf16 %v6385_v63 }
 0x1c2   : > { %v6386_v1 = vunpack.i.l.bf16 %v6385_v63  ;;  %v5558_v63 = vld [vmem:[%s8871_s3 + $0x2c4] sm:$0xf0] }
 0x1c3   : > { %v2005_v61 = vmax.f32 %v1948_v41, 0.0 }
 0x1c4   : > { %v6345_v53 = vpop.permute.xlu0 %6344 }
 0x1c5   : > { %v2037_v23 = vadd.f32 %v2036_v11, %v2005_v61  ;;  %v6347_v4 = vunpack.i.h.bf16 %v6345_v53  ;;  %v6346_v27 = vunpack.i.l.bf16 %v6345_v53 }
 0x1c7   : > { %v1713_v32 = vsel %vm1684_vm8, %v1680_v42, %v6346_v27  ;;  %v1714_v39 = vsel %vm1684_vm8, %v1681_v19, %v6347_v4  ;;  %v6365_v58 = vpop.permute.xlu1 %6364 }
 0x1c8   : > { %v1746_v57 = vsel %vm1717_vm9, %v1713_v32, %v6351_v0  ;;  %v1747_v54 = vsel %vm1717_vm9, %v1714_v39, %v6352_v50  ;;  %v6367_v36 = vunpack.i.h.bf16 %v6365_v58  ;;  %v6366_v3 = vunpack.i.l.bf16 %v6365_v58 }
 0x1c9   : > { %v1779_v35 = vsel %vm1750_vm10, %v1746_v57, %v6356_v26  ;;  %v1780_v59 = vsel %vm1750_vm10, %v1747_v54, %v6357_v2  ;;  %v7612_v26 = vld [vmem:[%s8870_s2] ss:$0 sm:$0xff] }
 0x1ca   : > { %v1812_v22 = vsel %vm1783_vm11, %v1779_v35, 0.0  ;;  %v1813_v40 = vsel %vm1783_vm11, %v1780_v59, 0.0  ;;  %v1950_v14 = vpop.f32.mrf.mxu0 }
 0x1cb   : > { %v1951_v13 = vadd.f32 %v7259_v45, %v1950_v14  ;;  %v1830_v37 = vpack.c.bf16 %v1813_v40, %v1812_v22 }
 0x1cc   : > { %v6360_v30 = vpop.permute.xlu0 %6359 }
 0x1cd   : > { %v2006_v25 = vmax.f32 %v1951_v13, 0.0  ;;  %v6362_v12 = vunpack.i.h.bf16 %v6360_v30  ;;  %v6361_v38 = vunpack.i.l.bf16 %v6360_v30  ;;  %4438 = vmatmul.msk.bf16.gmra.mxu0 %vm1852_vm12, %v1830_v37 }
 0x1cf   : > { %v2038_v17 = vadd.f32 %v2037_v23, %v2006_v25  ;;  %v6380_v47 = vpop.permute.xlu1 %6379  ;;  %v1551_v48 = vsel %vm1519_vm3, %v7242_v34, %v6362_v12  ;;  %v1550_v9 = vsel %vm1519_vm3, %v7245_v55, %v6361_v38  ;;  %v4890_v25 = vld [vmem:[%s8871_s3 + $0x380] sm:$0xf]  ;;  %v5581_v38 = vld [vmem:[%s8871_s3 + $0x384] sm:$0xf] }
 0x1d0   : > { %v1584_v31 = vsel %vm1552_vm4, %v1551_v48, %v6367_v36  ;;  %v1583_v60 = vsel %vm1552_vm4, %v1550_v9, %v6366_v3  ;;  %v6382_v11 = vunpack.i.h.bf16 %v6380_v47  ;;  %v6381_v55 = vunpack.i.l.bf16 %v6380_v47  ;;  %v5589_v12 = vld [vmem:[%s8871_s3 + $0x3bc] sm:$0xf0]  ;;  %v4898_v47 = vld [vmem:[%s8871_s3 + $0x388] sm:$0xf] }
 0x1d1   : > { %v1616_v10 = vsel %vm1585_vm5, %v1583_v60, %v6371_v51  ;;  %v1617_v34 = vsel %vm1585_vm5, %v1584_v31, %v6372_v21  ;;  %v4891_v62 = vor.u32 %v5589_v12, %v4890_v25  ;;  %v5590_v36 = vld [vmem:[%s8871_s3 + $0x3c4] sm:$0xf0]  ;;  %v4826_v9 = vld [vmem:[%s8871_s3 + $0x300] sm:$0xf]  ;;  %v5565_v21 = vld [vmem:[%s8871_s3 + $0x304] sm:$0xf] }
 0x1d2   : > { %v1952_v44 = vpop.f32.mrf.mxu0  ;;  %v4899_v48 = vor.u32 %v5590_v36, %v4898_v47  ;;  %v4834_v31 = vld [vmem:[%s8871_s3 + $0x308] sm:$0xf]  ;;  %v5485_v25 = vld [vmem:[%s8871_s3 + $0x84] sm:$0xf] }
 0x1d3   : > { %v1953_v56 = vadd.f32 %v7259_v45, %v1952_v44  ;;  %2872 = vmatpush.bf16.msra.mxu1 %v4891_v62  ;;  %v5573_v44 = vld [vmem:[%s8871_s3 + $0x33c] sm:$0xf0]  ;;  %v5574_v60 = vld [vmem:[%s8871_s3 + $0x344] sm:$0xf0] }
 0x1d4   : > { %v6375_v28 = vpop.permute.xlu0 %6374  ;;  %2898 = vmatpush.bf16.msra.mxu3 %v4899_v48  ;;  %v4827_v51 = vor.u32 %v5573_v44, %v4826_v9  ;;  %v4514_v62 = vld [vmem:[%s8871_s3 + $0x88] sm:$0xf]  ;;  %v6432_v48 = vmov 0.0   ;;  %v4442_v9 = vld [vmem:[%s8871_s3] sm:$0xf] }
 0x1d5   : > { %v2007_v6 = vmax.f32 %v1953_v56, 0.0  ;;  %v6377_v33 = vunpack.i.h.bf16 %v6375_v28  ;;  %v6376_v8 = vunpack.i.l.bf16 %v6375_v28  ;;  %v4828_v56 = vld [vmem:[%s8871_s3 + $0x340] sm:$0xf0]  ;;  %293 = vst [vmem:[#allocation2] sm:$0x1] %v6432_v48 }
 0x1d6   : > { %v4831_v28 = vor.u32 %v5565_v21, %v4828_v56  ;;  %v5477_v44 = vld [vmem:[%s8871_s3 + $0x3c] sm:$0xf0]  ;;  %v5469_v21 = vld [vmem:[%s8871_s3 + $0x4] sm:$0xf]  ;;  %v5518_v48 = vld [vmem:[%s8871_s3 + $0x18c] sm:$0xf] }
 0x1d7   : > { %v2039_v52 = vadd.f32 %v2038_v17, %v2007_v6  ;;  %v1649_v5 = vsel %vm1618_vm6, %v1616_v10, %v6376_v8  ;;  %v1650_v45 = vsel %vm1618_vm6, %v1617_v34, %v6377_v33  ;;  %v6395_v29 = vpop.permute.xlu1 %6394  ;;  %v4892_v17 = vld [vmem:[%s8871_s3 + $0x3c0] sm:$0xf0]  ;;  %v4835_v6 = vor.u32 %v5574_v60, %v4834_v31  ;;  %2873 = vmatpush.bf16.msra.mxu1 %v4827_v51  ;;  %v4762_v8 = vld [vmem:[%s8871_s3 + $0x280] sm:$0xf]  ;;  %v4450_v31 = vld [vmem:[%s8871_s3 + $0x8] sm:$0xf] }
 0x1d8   : > { %v1682_v16 = vsel %vm1651_vm7, %v1649_v5, %v6381_v55  ;;  %v1683_v7 = vsel %vm1651_vm7, %v1650_v45, %v6382_v11  ;;  %v6397_v41 = vunpack.i.h.bf16 %v6395_v29  ;;  %v6396_v43 = vunpack.i.l.bf16 %v6395_v29  ;;  %v5557_v11 = vld [vmem:[%s8871_s3 + $0x2bc] sm:$0xf0]  ;;  %v5549_v10 = vld [vmem:[%s8871_s3 + $0x284] sm:$0xf]  ;;  %v4770_v55 = vld [vmem:[%s8871_s3 + $0x288] sm:$0xf] }
 0x1d9   : > { %v1715_v20 = vsel %vm1684_vm8, %v1682_v16, %v6386_v1  ;;  %v1716_v49 = vsel %vm1684_vm8, %v1683_v7, %v6387_v46  ;;  %v4895_v3 = vor.u32 %v5581_v38, %v4892_v17  ;;  %2899 = vmatpush.bf16.msra.mxu3 %v4835_v6  ;;  %v4763_v34 = vor.u32 %v5557_v11, %v4762_v8  ;;  %v4698_v29 = vld [vmem:[%s8871_s3 + $0x200] sm:$0xf]  ;;  %v5533_v1 = vld [vmem:[%s8871_s3 + $0x204] sm:$0xf]  ;;  %v5494_v17 = vld [vmem:[%s8871_s3 + $0xc4] sm:$0xf0] }
 0x1da   : > { %v4771_v45 = vor.u32 %v5558_v63, %v4770_v55  ;;  %v5541_v46 = vld [vmem:[%s8871_s3 + $0x23c] sm:$0xf0]  ;;  %v4700_v7 = vld [vmem:[%s8871_s3 + $0x240] sm:$0xf0]  ;;  %v4443_v51 = vor.u32 %v5477_v44, %v4442_v9  ;;  %v5478_v60 = vld [vmem:[%s8871_s3 + $0x44] sm:$0xf0] }
 0x1db   : > { %2885 = vmatpush.bf16.msra.mxu2 %v4895_v3  ;;  %2874 = vmatpush.bf16.msra.mxu1 %v4763_v34  ;;  %v4699_v16 = vor.u32 %v5541_v46, %v4698_v29  ;;  %v4508_v38 = vld [vmem:[%s8871_s3 + $0xc0] sm:$0xf0]  ;;  %v4515_v3 = vor.u32 %v5494_v17, %v4514_v62  ;;  %v4451_v6 = vor.u32 %v5478_v60, %v4450_v31  ;;  %v5582_v8 = vld [vmem:[%s8871_s3 + $0x38c] sm:$0xf]  ;;  %v5583_v55 = vld [vmem:[%s8871_s3 + $0x394] sm:$0xf] }
 0x1dc   : > { %v6390_v18 = vpop.permute.xlu0 %6389  ;;  %v4511_v36 = vor.u32 %v5485_v25, %v4508_v38  ;;  %v4444_v56 = vld [vmem:[%s8871_s3 + $0x40] sm:$0xf0]  ;;  %v4900_v11 = vld [vmem:[%s8871_s3 + $0x3c8] sm:$0xf0]  ;;  %v4908_v63 = vld [vmem:[%s8871_s3 + $0x3d0] sm:$0xf0] }
 0x1dd   : > { %v6392_v24 = vunpack.i.h.bf16 %v6390_v18  ;;  %v6391_v15 = vunpack.i.l.bf16 %v6390_v18  ;;  %v4706_v18 = vld [vmem:[%s8871_s3 + $0x208] sm:$0xf]  ;;  %2900 = vmatpush.bf16.msra.mxu3 %v4771_v45  ;;  %v4903_v34 = vor.u32 %v5582_v8, %v4900_v11  ;;  %v4911_v45 = vor.u32 %v5583_v55, %v4908_v63  ;;  %v5566_v29 = vld [vmem:[%s8871_s3 + $0x30c] sm:$0xf]  ;;  %v4650_v9 = vld [vmem:[%s8871_s3 + $0x190] sm:$0xf] }
 0x1de   : > { %v4836_v46 = vld [vmem:[%s8871_s3 + $0x348] sm:$0xf0]  ;;  %v5503_v63 = vld [vmem:[%s8871_s3 + $0x114] sm:$0xf] }
 0x1df   : > { %v1748_v61 = vsel %vm1717_vm9, %v1715_v20, %v6391_v15  ;;  %v1749_v53 = vsel %vm1717_vm9, %v1716_v49, %v6392_v24  ;;  %2886 = vmatpush.bf16.msra.mxu2 %v4831_v28  ;;  %v4634_v15 = vld [vmem:[%s8871_s3 + $0x180] sm:$0xf]  ;;  %v5517_v49 = vld [vmem:[%s8871_s3 + $0x184] sm:$0xf]  ;;  %2875 = vmatpush.bf16.msra.mxu1 %v4699_v16  ;;  %v4447_v28 = vor.u32 %v5469_v21, %v4444_v56  ;;  %v5519_v21 = vld [vmem:[%s8871_s3 + $0x194] sm:$0xf] }
 0x1e0   : > { %v1781_v50 = vsel %vm1750_vm10, %v1748_v61, %v6396_v43  ;;  %v1782_v0 = vsel %vm1750_vm10, %v1749_v53, %v6397_v41  ;;  %v5542_v41 = vld [vmem:[%s8871_s3 + $0x244] sm:$0xf0]  ;;  %v4703_v43 = vor.u32 %v5533_v1, %v4700_v7  ;;  %v5525_v20 = vld [vmem:[%s8871_s3 + $0x1bc] sm:$0xf0]  ;;  %v4636_v61 = vld [vmem:[%s8871_s3 + $0x1c0] sm:$0xf0]  ;;  %v4839_v7 = vor.u32 %v5566_v29, %v4836_v46 }
 0x1e1   : > { %v1814_v2 = vsel %vm1783_vm11, %v1781_v50, 0.0  ;;  %v1815_v23 = vsel %vm1783_vm11, %v1782_v0, 0.0  ;;  %v1955_v4 = vpop.f32.mrf.mxu0  ;;  %v4707_v24 = vor.u32 %v5542_v41, %v4706_v18  ;;  %v4642_v53 = vld [vmem:[%s8871_s3 + $0x188] sm:$0xf]  ;;  %v4635_v0 = vor.u32 %v5525_v20, %v4634_v15  ;;  %v4842_v1 = vld [vmem:[%s8871_s3 + $0x310] sm:$0xf] }
 0x1e2   : > { %v1831_v27 = vpack.c.bf16 %v1815_v23, %v1814_v2  ;;  %v1956_v42 = vadd.f32 %v7612_v26, %v1955_v4  ;;  %v5526_v50 = vld [vmem:[%s8871_s3 + $0x1c4] sm:$0xf0]  ;;  %v4639_v23 = vor.u32 %v5517_v49, %v4636_v61  ;;  %v5575_v18 = vld [vmem:[%s8871_s3 + $0x34c] sm:$0xf0]  ;;  %v5567_v41 = vld [vmem:[%s8871_s3 + $0x314] sm:$0xf] }
 0x1e3   : > { %2901 = vmatpush.bf16.msra.mxu3 %v4707_v24  ;;  %v4643_v4 = vor.u32 %v5526_v50, %v4642_v53  ;;  %2876 = vmatpush.bf16.msra.mxu1 %v4635_v0  ;;  %v4843_v24 = vor.u32 %v5575_v18, %v4842_v1  ;;  %v4844_v15 = vld [vmem:[%s8871_s3 + $0x350] sm:$0xf0]  ;;  %v5550_v61 = vld [vmem:[%s8871_s3 + $0x28c] sm:$0xf] }
 0x1e4   : > { %v2008_v19 = vmax.f32 %v1956_v42, 0.0  ;;  %4439 = vmatmul.msk.bf16.gmra.mxu0 %vm1852_vm12, %v1831_v27  ;;  %v4570_v27 = vld [vmem:[%s8871_s3 + $0x100] sm:$0xf]  ;;  %v4847_v49 = vor.u32 %v5567_v41, %v4844_v15  ;;  %v4772_v53 = vld [vmem:[%s8871_s3 + $0x2c8] sm:$0xf0] }
 0x1e5   : > { %v5509_v42 = vld [vmem:[%s8871_s3 + $0x13c] sm:$0xf0]  ;;  %v4775_v50 = vor.u32 %v5550_v61, %v4772_v53  ;;  %v5551_v0 = vld [vmem:[%s8871_s3 + $0x294] sm:$0xf]  ;;  %v5502_v11 = vld [vmem:[%s8871_s3 + $0x10c] sm:$0xf] }
 0x1e6   : > { %v2040_v32 = vadd.f32 %v2039_v52, %v2008_v19  ;;  %v4764_v52 = vld [vmem:[%s8871_s3 + $0x2c0] sm:$0xf0]  ;;  %v5487_v61 = vld [vmem:[%s8871_s3 + $0x94] sm:$0xf] }
 0x1e7   : > { %v4767_v5 = vor.u32 %v5549_v10, %v4764_v52  ;;  %2902 = vmatpush.bf16.msra.mxu3 %v4643_v4  ;;  %v5501_v19 = vld [vmem:[%s8871_s3 + $0x104] sm:$0xf]  ;;  %v4906_v10 = vld [vmem:[%s8871_s3 + $0x390] sm:$0xf]  ;;  %v4524_v53 = vld [vmem:[%s8871_s3 + $0xd0] sm:$0xf0] }
 0x1e8   : > { %v5591_v52 = vld [vmem:[%s8871_s3 + $0x3cc] sm:$0xf0] }
 0x1e9   : > { %v1957_v39 = vpop.f32.mrf.mxu0  ;;  %2887 = vmatpush.bf16.msra.mxu2 %v4767_v5  ;;  %v4907_v5 = vor.u32 %v5591_v52, %v4906_v10  ;;  %v4580_v10 = vld [vmem:[%s8871_s3 + $0x148] sm:$0xf0] }
 0x1ea   : > { %v1958_v58 = vadd.f32 %v7612_v26, %v1957_v39  ;;  %v4572_v39 = vld [vmem:[%s8871_s3 + $0x140] sm:$0xf0]  ;;  %v4583_v55 = vor.u32 %v5502_v11, %v4580_v10 }
 0x1ec   : > { %v2009_v57 = vmax.f32 %v1958_v58, 0.0  ;;  %v4578_v58 = vld [vmem:[%s8871_s3 + $0x108] sm:$0xf] }
 0x1ed   : > { %2888 = vmatpush.bf16.msra.mxu2 %v4703_v43 }
 0x1ee   : > { %v2041_v54 = vadd.f32 %v2040_v32, %v2009_v57  ;;  %v4571_v32 = vor.u32 %v5509_v42, %v4570_v27  ;;  %v5510_v57 = vld [vmem:[%s8871_s3 + $0x144] sm:$0xf0] }
 0x1f0   : > { %2877 = vmatpush.bf16.msra.mxu1 %v4571_v32 }
 0x1f1   : > { %2889 = vmatpush.bf16.msra.mxu2 %v4639_v23  ;;  %v4780_v23 = vld [vmem:[%s8871_s3 + $0x2d0] sm:$0xf0] }
 0x1f2   : > { %v4783_v42 = vor.u32 %v5551_v0, %v4780_v23  ;;  %v4527_v0 = vor.u32 %v5487_v61, %v4524_v53  ;;  %v4722_v53 = vld [vmem:[%s8871_s3 + $0x218] sm:$0xf] }
 0x1f8   : > { %v1960_v35 = vpop.f32.mrf.mxu0 }
 0x1f9   : > { %v1961_v59 = vadd.f32 %v7612_v26, %v1960_v35  ;;  %v4579_v35 = vor.u32 %v5510_v57, %v4578_v58  ;;  %v5534_v58 = vld [vmem:[%s8871_s3 + $0x20c] sm:$0xf] }
 0x1fa   : > { %v4708_v57 = vld [vmem:[%s8871_s3 + $0x248] sm:$0xf0] }
 0x1fb   : > { %v2010_v22 = vmax.f32 %v1961_v59, 0.0  ;;  %2903 = vmatpush.bf16.msra.mxu3 %v4579_v35  ;;  %v4506_v59 = vld [vmem:[%s8871_s3 + $0x80] sm:$0xf]  ;;  %v4711_v35 = vor.u32 %v5534_v58, %v4708_v57  ;;  %v5471_v58 = vld [vmem:[%s8871_s3 + $0x14] sm:$0xf] }
 0x1fc   : > { %v4460_v57 = vld [vmem:[%s8871_s3 + $0x50] sm:$0xf0] }
 0x1fd   : > { %v7618_v40 = vadd.f32 %v2041_v54, %v2010_v22  ;;  %v4575_v54 = vor.u32 %v5501_v19, %v4572_v39  ;;  %v5493_v22 = vld [vmem:[%s8871_s3 + $0xbc] sm:$0xf0] }
 0x1fe   : > { %v4507_v12 = vor.u32 %v5493_v22, %v4506_v59  ;;  %v4716_v59 = vld [vmem:[%s8871_s3 + $0x250] sm:$0xf0] }
 0x1ff   : > { %2890 = vmatpush.bf16.msra.mxu2 %v4575_v54  ;;  %2904 = vmatpush.bf16.msra.mxu3 %v4515_v3  ;;  %v4714_v54 = vld [vmem:[%s8871_s3 + $0x210] sm:$0xf] }
 0x200   : > { %v7620_v14 = vpop.f32.mrf.mxu0  ;;  %2878 = vmatpush.bf16.msra.mxu1 %v4507_v12 }
 0x201   : > { %v1963_v43 = vadd.f32 %v7612_v26, %v7620_v14  ;;  %v4778_v14 = vld [vmem:[%s8871_s3 + $0x290] sm:$0xf] }
 0x203   : > { %2891 = vmatpush.bf16.msra.mxu2 %v4511_v36  ;;  %2905 = vmatpush.bf16.msra.mxu3 %v4451_v6  ;;  %v2011_v4 = vmax.f32 %v1963_v43, 0.0  ;;  %v5486_v43 = vld [vmem:[%s8871_s3 + $0x8c] sm:$0xf] }
 0x204   : > { %2879 = vmatpush.bf16.msra.mxu1 %v4443_v51  ;;  %v4652_v51 = vld [vmem:[%s8871_s3 + $0x1d0] sm:$0xf0] }
 0x205   : > { %v2043_v22 = vadd.f32 %v7618_v40, %v2011_v4  ;;  %v4644_v40 = vld [vmem:[%s8871_s3 + $0x1c8] sm:$0xf0]  ;;  %v4655_v31 = vor.u32 %v5519_v21, %v4652_v51  ;;  %v4914_v21 = vld [vmem:[%s8871_s3 + $0x398] sm:$0xf] }
 0x206   : > { %v5592_v51 = vld [vmem:[%s8871_s3 + $0x3d4] sm:$0xf0] }
 0x207   : > { %2892 = vmatpush.bf16.msra.mxu2 %v4447_v28  ;;  %2937 = vmatpush.bf16.msrb.mxu3 %v4911_v45  ;;  %v4915_v11 = vor.u32 %v5592_v51, %v4914_v21  ;;  %v4466_v51 = vld [vmem:[%s8871_s3 + $0x18] sm:$0xf] }
 0x208   : > { %2911 = vmatpush.bf16.msrb.mxu1 %v4903_v34  ;;  %v4586_v34 = vld [vmem:[%s8871_s3 + $0x110] sm:$0xf] }
 0x20a   : > { %v7622_v13 = vpop.f32.mrf.mxu0 }
 0x20b   : > { %2924 = vmatpush.bf16.msrb.mxu2 %v4907_v5  ;;  %v1966_v20 = vadd.f32 %v7612_v26, %v7622_v13  ;;  %2938 = vmatpush.bf16.msrb.mxu3 %v4847_v49  ;;  %v5559_v13 = vld [vmem:[%s8871_s3 + $0x2cc] sm:$0xf0]  ;;  %v4588_v5 = vld [vmem:[%s8871_s3 + $0x150] sm:$0xf0] }
 0x20c   : > { %2912 = vmatpush.bf16.msrb.mxu1 %v4839_v7  ;;  %v4779_v27 = vor.u32 %v5559_v13, %v4778_v14  ;;  %v4591_v46 = vor.u32 %v5503_v63, %v4588_v5  ;;  %v5495_v49 = vld [vmem:[%s8871_s3 + $0xcc] sm:$0xf0]  ;;  %v5568_v63 = vld [vmem:[%s8871_s3 + $0x31c] sm:$0xf] }
 0x20d   : > { %v2012_v19 = vmax.f32 %v1966_v20, 0.0  ;;  %v4852_v5 = vld [vmem:[%s8871_s3 + $0x358] sm:$0xf0] }
 0x20f   : > { %2925 = vmatpush.bf16.msrb.mxu2 %v4843_v24  ;;  %2939 = vmatpush.bf16.msrb.mxu3 %v4783_v42  ;;  %v2044_v44 = vadd.f32 %v2043_v22, %v2012_v19  ;;  %v4516_v24 = vld [vmem:[%s8871_s3 + $0xc8] sm:$0xf0]  ;;  %v4458_v19 = vld [vmem:[%s8871_s3 + $0x10] sm:$0xf] }
 0x210   : > { %2913 = vmatpush.bf16.msrb.mxu1 %v4775_v50  ;;  %v4519_v20 = vor.u32 %v5486_v43, %v4516_v24  ;;  %v4452_v42 = vld [vmem:[%s8871_s3 + $0x48] sm:$0xf0]  ;;  %v5552_v43 = vld [vmem:[%s8871_s3 + $0x29c] sm:$0xf] }
 0x211   : > { %v4788_v24 = vld [vmem:[%s8871_s3 + $0x2d8] sm:$0xf0] }
 0x212   : > { %v7624_v37 = vpop.f32.mrf.mxu0 }
 0x213   : > { %v1968_v32 = vadd.f32 %v7612_v26, %v7624_v37  ;;  %2926 = vmatpush.bf16.msrb.mxu2 %v4779_v27  ;;  %v5543_v37 = vld [vmem:[%s8871_s3 + $0x24c] sm:$0xf0]  ;;  %v5470_v27 = vld [vmem:[%s8871_s3 + $0xc] sm:$0xf] }
 0x214   : > { %v4715_v25 = vor.u32 %v5543_v37, %v4714_v54  ;;  %2914 = vmatpush.bf16.msrb.mxu1 %v4711_v35  ;;  %v5668_v37 = vld [vmem:[%s8873_s5 + $0x238] sm:$0xff] }
 0x215   : > { %v2013_v38 = vmax.f32 %v1968_v32, 0.0  ;;  %v4455_v32 = vor.u32 %v5470_v27, %v4452_v42  ;;  %4241 = vmatpush.bf16.msrb.mxu0 %v5668_v37 }
 0x217   : > { %2927 = vmatpush.bf16.msrb.mxu2 %v4715_v25  ;;  %v2045_v60 = vadd.f32 %v2044_v44, %v2013_v38  ;;  %v5667_v44 = vld [vmem:[%s8873_s5 + $0x230] sm:$0xff] }
 0x219   : > { %4242 = vmatpush.bf16.msrb.mxu0 %v5667_v44  ;;  %v5488_v44 = vld [vmem:[%s8871_s3 + $0x9c] sm:$0xf] }
 0x221   : > { %v7626_v30 = vpop.f32.mrf.mxu0 }
 0x222   : > { %v1971_v39 = vadd.f32 %v7612_v26, %v7626_v30  ;;  %v5535_v30 = vld [vmem:[%s8871_s3 + $0x214] sm:$0xf] }
 0x223   : > { %v4719_v12 = vor.u32 %v5535_v30, %v4716_v59  ;;  %v4463_v59 = vor.u32 %v5471_v58, %v4460_v57  ;;  %v4660_v58 = vld [vmem:[%s8871_s3 + $0x1d8] sm:$0xf0]  ;;  %v4666_v57 = vld [vmem:[%s8871_s3 + $0x1a0] sm:$0xf] }
 0x224   : > { %v2014_v62 = vmax.f32 %v1971_v39, 0.0  ;;  %v5479_v39 = vld [vmem:[%s8871_s3 + $0x4c] sm:$0xf0] }
 0x225   : > { %2940 = vmatpush.bf16.msrb.mxu3 %v4719_v12  ;;  %v4459_v30 = vor.u32 %v5479_v39, %v4458_v19  ;;  %v4658_v19 = vld [vmem:[%s8871_s3 + $0x198] sm:$0xf]  ;;  %v5520_v39 = vld [vmem:[%s8871_s3 + $0x19c] sm:$0xf] }
 0x226   : > { %v2046_v52 = vadd.f32 %v2045_v60, %v2014_v62  ;;  %v4663_v37 = vor.u32 %v5520_v39, %v4660_v58  ;;  %v4732_v39 = vld [vmem:[%s8871_s3 + $0x260] sm:$0xf0]  ;;  %v4738_v58 = vld [vmem:[%s8871_s3 + $0x228] sm:$0xf] }
 0x229   : > { %v7664_v33 = vpop.f32.mrf.mxu0  ;;  %2941 = vmatpush.bf16.msrb.mxu3 %v4655_v31  ;;  %v4916_v31 = vld [vmem:[%s8871_s3 + $0x3d8] sm:$0xf0] }
 0x22a   : > { %v1973_v17 = vadd.f32 %v7612_v26, %v7664_v33  ;;  %v4647_v33 = vor.u32 %v5518_v48, %v4644_v40 }
 0x22c   : > { %v2015_v28 = vmax.f32 %v1973_v17, 0.0  ;;  %2915 = vmatpush.bf16.msrb.mxu1 %v4647_v33  ;;  %v2022_v33 = vld [vmem:[#allocation2] sm:$0x1] }
 0x22d   : > { %2942 = vmatpush.bf16.msrb.mxu3 %v4591_v46 }
 0x22e   : > { %v2047_v1 = vadd.f32 %v2046_v52, %v2015_v28  ;;  %v4922_v28 = vld [vmem:[%s8871_s3 + $0x3a0] sm:$0xf] }
 0x230   : > { %2916 = vmatpush.bf16.msrb.mxu1 %v4583_v55  ;;  %v4850_v55 = vld [vmem:[%s8871_s3 + $0x318] sm:$0xf] }
 0x231   : > { %2943 = vmatpush.bf16.msrb.mxu3 %v4527_v0  ;;  %v4730_v0 = vld [vmem:[%s8871_s3 + $0x220] sm:$0xf] }
 0x234   : > { %2917 = vmatpush.bf16.msrb.mxu1 %v4519_v20 }
 0x235   : > { %2944 = vmatpush.bf16.msrb.mxu3 %v4463_v59  ;;  %v4594_v59 = vld [vmem:[%s8871_s3 + $0x118] sm:$0xf] }
 0x238   : > { %v7720_v2 = vpop.f32.mrf.mxu0  ;;  %2918 = vmatpush.bf16.msrb.mxu1 %v4455_v32  ;;  %v5528_v32 = vld [vmem:[%s8871_s3 + $0x1d4] sm:$0xf0] }
 0x239   : > { %v1976_v36 = vadd.f32 %v7612_v26, %v7720_v2  ;;  %v5527_v2 = vld [vmem:[%s8871_s3 + $0x1cc] sm:$0xf0] }
 0x23a   : > { %v4651_v56 = vor.u32 %v5527_v2, %v4650_v9 }
 0x23b   : > { %v2016_v6 = vmax.f32 %v1976_v36, 0.0 }
 0x23c   : > { %2928 = vmatpush.bf16.msrb.mxu2 %v4651_v56  ;;  %v5584_v56 = vld [vmem:[%s8871_s3 + $0x39c] sm:$0xf] }
 0x23d   : > { %v2048_v15 = vadd.f32 %v2047_v1, %v2016_v6  ;;  %v5593_v6 = vld [vmem:[%s8871_s3 + $0x3dc] sm:$0xf0]  ;;  %v4855_v1 = vor.u32 %v5568_v63, %v4852_v5  ;;  %v5586_v5 = vld [vmem:[%s8871_s3 + $0x3ac] sm:$0xf] }
 0x23e   : > { %v4923_v52 = vor.u32 %v5593_v6, %v4922_v28  ;;  %v5472_v28 = vld [vmem:[%s8871_s3 + $0x1c] sm:$0xf] }
 0x23f   : > { %v4468_v6 = vld [vmem:[%s8871_s3 + $0x58] sm:$0xf0] }
 0x240   : > { %v7758_v47 = vpop.f32.mrf.mxu0 }
 0x241   : > { %v1978_v8 = vadd.f32 %v7612_v26, %v7758_v47  ;;  %v5511_v47 = vld [vmem:[%s8871_s3 + $0x14c] sm:$0xf0] }
 0x242   : > { %v4587_v29 = vor.u32 %v5511_v47, %v4586_v34  ;;  %v4919_v34 = vor.u32 %v5584_v56, %v4916_v31  ;;  %v5576_v47 = vld [vmem:[%s8871_s3 + $0x354] sm:$0xf0] }
 0x243   : > { %v2017_v7 = vmax.f32 %v1978_v8, 0.0  ;;  %v4851_v46 = vor.u32 %v5576_v47, %v4850_v55  ;;  %v4930_v55 = vld [vmem:[%s8871_s3 + $0x3a8] sm:$0xf] }
 0x244   : > { %2929 = vmatpush.bf16.msrb.mxu2 %v4587_v29  ;;  %v5577_v29 = vld [vmem:[%s8871_s3 + $0x35c] sm:$0xf0]  ;;  %v5594_v47 = vld [vmem:[%s8871_s3 + $0x3e4] sm:$0xf0] }
 0x245   : > { %v2049_v4 = vadd.f32 %v2048_v15, %v2017_v7  ;;  %v5561_v15 = vld [vmem:[%s8871_s3 + $0x2dc] sm:$0xf0] }
 0x24a   : > { %v7805_v16 = vpop.f32.mrf.mxu0 }
 0x24b   : > { %v1981_v45 = vadd.f32 %v7612_v26, %v7805_v16  ;;  %v4522_v16 = vld [vmem:[%s8871_s3 + $0x90] sm:$0xf] }
 0x24c   : > { %v4523_v13 = vor.u32 %v5495_v49, %v4522_v16  ;;  %v4794_v16 = vld [vmem:[%s8871_s3 + $0x2a0] sm:$0xf]  ;;  %v4791_v49 = vor.u32 %v5552_v43, %v4788_v24  ;;  %v4860_v43 = vld [vmem:[%s8871_s3 + $0x360] sm:$0xf0]  ;;  %v4866_v24 = vld [vmem:[%s8871_s3 + $0x328] sm:$0xf] }
 0x24d   : > { %v2018_v14 = vmax.f32 %v1981_v45, 0.0  ;;  %v4858_v45 = vld [vmem:[%s8871_s3 + $0x320] sm:$0xf]  ;;  %v4795_v61 = vor.u32 %v5561_v15, %v4794_v16  ;;  %v5578_v16 = vld [vmem:[%s8871_s3 + $0x364] sm:$0xf0] }
 0x24e   : > { %2930 = vmatpush.bf16.msrb.mxu2 %v4523_v13  ;;  %v4859_v7 = vor.u32 %v5577_v29, %v4858_v45  ;;  %v4724_v13 = vld [vmem:[%s8871_s3 + $0x258] sm:$0xf0]  ;;  %v4932_v45 = vld [vmem:[%s8871_s3 + $0x3e8] sm:$0xf0]  ;;  %v4471_v29 = vor.u32 %v5472_v28, %v4468_v6  ;;  %v4546_v28 = vld [vmem:[%s8871_s3 + $0xa8] sm:$0xf] }
 0x24f   : > { %v2050_v54 = vadd.f32 %v2049_v4, %v2018_v14  ;;  %v5544_v14 = vld [vmem:[%s8871_s3 + $0x254] sm:$0xf0]  ;;  %v5570_v15 = vld [vmem:[%s8871_s3 + $0x32c] sm:$0xf]  ;;  %v5498_v6 = vld [vmem:[%s8871_s3 + $0xe4] sm:$0xf0] }
 0x250   : > { %v4723_v4 = vor.u32 %v5544_v14, %v4722_v53  ;;  %v5553_v53 = vld [vmem:[%s8871_s3 + $0x2a4] sm:$0xf] }
 0x252   : > { %v1982_v3 = vpop.f32.mrf.mxu0  ;;  %2931 = vmatpush.bf16.msrb.mxu2 %v4459_v30 }
 0x253   : > { %v1983_v18 = vadd.f32 %v7612_v26, %v1982_v3 }
 0x255   : > { %v2019_v23 = vmax.f32 %v1983_v18, 0.0  ;;  %v4786_v18 = vld [vmem:[%s8871_s3 + $0x298] sm:$0xf] }
 0x257   : > { %v2051_v25 = vadd.f32 %v2050_v54, %v2019_v23  ;;  %v5545_v23 = vld [vmem:[%s8871_s3 + $0x25c] sm:$0xf0] }
 0x258   : > { %v4731_v42 = vor.u32 %v5545_v23, %v4730_v0  ;;  %v5529_v54 = vld [vmem:[%s8871_s3 + $0x1dc] sm:$0xf0]  ;;  %v5562_v0 = vld [vmem:[%s8871_s3 + $0x2e4] sm:$0xf0]  ;;  %v5554_v23 = vld [vmem:[%s8871_s3 + $0x2ac] sm:$0xf] }
 0x259   : > { %v4667_v30 = vor.u32 %v5529_v54, %v4666_v57  ;;  %v5546_v57 = vld [vmem:[%s8871_s3 + $0x264] sm:$0xf0]  ;;  %v5538_v54 = vld [vmem:[%s8871_s3 + $0x22c] sm:$0xf] }
 0x261   : > { %v1985_v41 = vpop.f32.mrf.mxu0 }
 0x262   : > { %v1986_v50 = vadd.f32 %v7612_v26, %v1985_v41  ;;  %v5560_v41 = vld [vmem:[%s8871_s3 + $0x2d4] sm:$0xf0] }
 0x263   : > { %v4787_v20 = vor.u32 %v5560_v41, %v4786_v18  ;;  %v5569_v18 = vld [vmem:[%s8871_s3 + $0x324] sm:$0xf]  ;;  %v4935_v41 = vor.u32 %v5586_v5, %v4932_v45  ;;  %v4482_v5 = vld [vmem:[%s8871_s3 + $0x28] sm:$0xf] }
 0x264   : > { %v2020_v35 = vmax.f32 %v1986_v50, 0.0  ;;  %v5536_v50 = vld [vmem:[%s8871_s3 + $0x21c] sm:$0xf] }
 0x265   : > { %v4727_v27 = vor.u32 %v5536_v50, %v4724_v13  ;;  %v4796_v50 = vld [vmem:[%s8871_s3 + $0x2e0] sm:$0xf0]  ;;  %v4802_v13 = vld [vmem:[%s8871_s3 + $0x2a8] sm:$0xf] }
 0x266   : > { %v2052_v38 = vadd.f32 %v2051_v25, %v2020_v35  ;;  %v4659_v35 = vor.u32 %v5528_v32, %v4658_v19  ;;  %v5504_v25 = vld [vmem:[%s8871_s3 + $0x11c] sm:$0xf]  ;;  %v5537_v19 = vld [vmem:[%s8871_s3 + $0x224] sm:$0xf] }
 0x269   : > { %v1987_v22 = vpop.f32.mrf.mxu0 }
 0x26a   : > { %v1988_v12 = vadd.f32 %v7612_v26, %v1987_v22  ;;  %v5512_v22 = vld [vmem:[%s8871_s3 + $0x154] sm:$0xf0] }
 0x26c   : > { %v2021_v62 = vmax.f32 %v1988_v12, 0.0  ;;  %v4596_v12 = vld [vmem:[%s8871_s3 + $0x158] sm:$0xf0] }
 0x26e   : > { %v2053_v17 = vadd.f32 %v2052_v38, %v2021_v62  ;;  %v4602_v38 = vld [vmem:[%s8871_s3 + $0x120] sm:$0xf] }
 0x26f   : > { %v5513_v62 = vld [vmem:[%s8871_s3 + $0x15c] sm:$0xf0] }
 0x270   : > { %v2054_v36 = vrot.slane %v2053_v17, 4 }
 0x272   : > { %v2055_v3 = vadd.f32 %v2054_v36, %v2053_v17  ;;  %v5666_v17 = vld [vmem:[%s8873_s5 + $0x228] sm:$0xff]  ;;  %v4595_v36 = vor.u32 %v5512_v22, %v4594_v59  ;;  %v5521_v59 = vld [vmem:[%s8871_s3 + $0x1a4] sm:$0xf] }
 0x273   : > { %4243 = vmatpush.bf16.msrb.mxu0 %v5666_v17  ;;  %v4676_v17 = vld [vmem:[%s8871_s3 + $0x1e8] sm:$0xf0] }
 0x274   : > { %v2056_v48 = vrot.slane %v2055_v3, 2 }
 0x276   : > { %v2057_v40 = vadd.f32 %v2056_v48, %v2055_v3  ;;  %v4599_v3 = vor.u32 %v5504_v25, %v4596_v12  ;;  %v4603_v48 = vor.u32 %v5513_v62, %v4602_v38  ;;  %v4668_v25 = vld [vmem:[%s8871_s3 + $0x1e0] sm:$0xf0]  ;;  %v4674_v12 = vld [vmem:[%s8871_s3 + $0x1a8] sm:$0xf]  ;;  %v5522_v62 = vld [vmem:[%s8871_s3 + $0x1ac] sm:$0xf] }
 0x277   : > { %v5530_v38 = vld [vmem:[%s8871_s3 + $0x1e4] sm:$0xf0] }
 0x278   : > { %v2058_v9 = vrot.slane %v2057_v40, 1 }
 0x27a   : > { %v2059_v2 = vadd.f32 %v2058_v9, %v2057_v40  ;;  %v4530_v40 = vld [vmem:[%s8871_s3 + $0x98] sm:$0xf] }
 0x27b   : > { %v5496_v9 = vld [vmem:[%s8871_s3 + $0xd4] sm:$0xf0] }
 0x27c   : > { %v2060_v26 = vadd.f32 %v2059_v2, %v2022_v33  ;;  %v4532_v33 = vld [vmem:[%s8871_s3 + $0xd8] sm:$0xf0]  ;;  %v4538_v2 = vld [vmem:[%s8871_s3 + $0xa0] sm:$0xf]  ;;  %v4531_v21 = vor.u32 %v5496_v9, %v4530_v40  ;;  %v4679_v40 = vor.u32 %v5522_v62, %v4676_v17  ;;  %v4604_v9 = vld [vmem:[%s8871_s3 + $0x160] sm:$0xf0] }
 0x27d   : > { %v4535_v56 = vor.u32 %v5488_v44, %v4532_v33  ;;  %v4610_v44 = vld [vmem:[%s8871_s3 + $0x128] sm:$0xf]  ;;  %v4748_v62 = vld [vmem:[%s8871_s3 + $0x270] sm:$0xf0]  ;;  %v4754_v17 = vld [vmem:[%s8871_s3 + $0x238] sm:$0xf] }
 0x27e   : > { %2061 = vst [vmem:[#allocation2] sm:$0x1] %v2060_v26  ;;  %v5497_v26 = vld [vmem:[%s8871_s3 + $0xdc] sm:$0xf0]  ;;  %v5514_v33 = vld [vmem:[%s8871_s3 + $0x164] sm:$0xf0] }
 0x27f   : > { %v4539_v31 = vor.u32 %v5497_v26, %v4538_v2  ;;  %v5506_v2 = vld [vmem:[%s8871_s3 + $0x12c] sm:$0xf] }
 0x280   : > { %v4612_v26 = vld [vmem:[%s8871_s3 + $0x168] sm:$0xf0] }
 0x285   : > { %v2065_v60 = vld [vmem:[#allocation2] sm:$0x1] }
 0x286   : > { %v2066_v8 = vmul.f32 0.00390625, %v2065_v60  ;;  %v5480_v60 = vld [vmem:[%s8871_s3 + $0x54] sm:$0xf0] }
 0x287   : > { %v4467_v63 = vor.u32 %v5480_v60, %v4466_v51  ;;  %v4611_v51 = vor.u32 %v5514_v33, %v4610_v44  ;;  %v4540_v60 = vld [vmem:[%s8871_s3 + $0xe0] sm:$0xf0]  ;;  %v5531_v44 = vld [vmem:[%s8871_s3 + $0x1ec] sm:$0xf0]  ;;  %v5523_v33 = vld [vmem:[%s8871_s3 + $0x1b4] sm:$0xf] }
 0x288   : > { %v7968_v10 = vpack.c.bf16 %v2066_v8, %v2066_v8  ;;  %v4474_v8 = vld [vmem:[%s8871_s3 + $0x20] sm:$0xf] }
 0x28a   : > { %2880 = vmatmul.bf16.vlgmr.msra.gmra.mxu1 %v7968_v10  ;;  %2893 = vmatmul.bf16.vlgmr.msra.gmra.mxu2 %v7968_v10 }
 0x28b   : > { %2906 = vmatmul.bf16.vlgmr.msra.gmra.mxu3 %v7968_v10  ;;  %2950 = vmatpush.bf16.msra.mxu1 %v4915_v11  ;;  %v5481_v11 = vld [vmem:[%s8871_s3 + $0x5c] sm:$0xf0] }
 0x28c   : > { %2963 = vmatpush.bf16.msra.mxu2 %v4919_v34  ;;  %2976 = vmatpush.bf16.msra.mxu3 %v4923_v52  ;;  %v5585_v34 = vld [vmem:[%s8871_s3 + $0x3a4] sm:$0xf] }
 0x28d   : > { %v4924_v52 = vld [vmem:[%s8871_s3 + $0x3e0] sm:$0xf0] }
 0x28f   : > { %2951 = vmatpush.bf16.msra.mxu1 %v4851_v46  ;;  %v4475_v46 = vor.u32 %v5481_v11, %v4474_v8  ;;  %v5490_v8 = vld [vmem:[%s8871_s3 + $0xac] sm:$0xf] }
 0x290   : > { %2964 = vmatpush.bf16.msra.mxu2 %v4855_v1  ;;  %2977 = vmatpush.bf16.msra.mxu3 %v4859_v7  ;;  %v4927_v1 = vor.u32 %v5585_v34, %v4924_v52  ;;  %v4931_v7 = vor.u32 %v5594_v47, %v4930_v55  ;;  %v4548_v11 = vld [vmem:[%s8871_s3 + $0xe8] sm:$0xf0]  ;;  %v5665_v34 = vld [vmem:[%s8873_s5 + $0x220] sm:$0xff]  ;;  %v4547_v55 = vor.u32 %v5498_v6, %v4546_v28  ;;  %v5515_v28 = vld [vmem:[%s8871_s3 + $0x16c] sm:$0xf0] }
 0x291   : > { %v5473_v47 = vld [vmem:[%s8871_s3 + $0x24] sm:$0xf]  ;;  %v4551_v45 = vor.u32 %v5490_v8, %v4548_v11  ;;  %4244 = vmatpush.bf16.msrb.mxu0 %v5665_v34  ;;  %v5507_v6 = vld [vmem:[%s8871_s3 + $0x134] sm:$0xf]  ;;  %v4626_v11 = vld [vmem:[%s8871_s3 + $0x138] sm:$0xf] }
 0x292   : > { %v4620_v8 = vld [vmem:[%s8871_s3 + $0x170] sm:$0xf0]  ;;  %v5516_v34 = vld [vmem:[%s8871_s3 + $0x174] sm:$0xf0] }
 0x293   : > { %2952 = vmatpush.bf16.msra.mxu1 %v4787_v20  ;;  %v4868_v20 = vld [vmem:[%s8871_s3 + $0x368] sm:$0xf0] }
 0x294   : > { %2965 = vmatpush.bf16.msra.mxu2 %v4791_v49  ;;  %2978 = vmatpush.bf16.msra.mxu3 %v4795_v61  ;;  %v4863_v49 = vor.u32 %v5569_v18, %v4860_v43  ;;  %v4867_v61 = vor.u32 %v5578_v16, %v4866_v24  ;;  %v4871_v14 = vor.u32 %v5570_v15, %v4868_v20  ;;  %v5595_v18 = vld [vmem:[%s8871_s3 + $0x3ec] sm:$0xf0]  ;;  %v4940_v43 = vld [vmem:[%s8871_s3 + $0x3f0] sm:$0xf0]  ;;  %v4946_v24 = vld [vmem:[%s8871_s3 + $0x3b8] sm:$0xf] }
 0x295   : > { %v5596_v16 = vld [vmem:[%s8871_s3 + $0x3f4] sm:$0xf0] }
 0x297   : > { %2953 = vmatpush.bf16.msra.mxu1 %v4723_v4  ;;  %v4804_v4 = vld [vmem:[%s8871_s3 + $0x2e8] sm:$0xf0] }
 0x298   : > { %2966 = vmatpush.bf16.msra.mxu2 %v4727_v27  ;;  %2979 = vmatpush.bf16.msra.mxu3 %v4731_v42  ;;  %v4799_v27 = vor.u32 %v5553_v53, %v4796_v50  ;;  %v4803_v42 = vor.u32 %v5562_v0, %v4802_v13  ;;  %v4807_v32 = vor.u32 %v5554_v23, %v4804_v4  ;;  %v4874_v50 = vld [vmem:[%s8871_s3 + $0x330] sm:$0xf]  ;;  %v5571_v0 = vld [vmem:[%s8871_s3 + $0x334] sm:$0xf]  ;;  %v4882_v4 = vld [vmem:[%s8871_s3 + $0x338] sm:$0xf] }
 0x299   : > { %v5579_v13 = vld [vmem:[%s8871_s3 + $0x36c] sm:$0xf0]  ;;  %v4876_v23 = vld [vmem:[%s8871_s3 + $0x370] sm:$0xf0] }
 0x29a   : > { %2919 = vmatmul.bf16.vlgmr.msrb.gmra.mxu1 %v7968_v10  ;;  %2932 = vmatmul.bf16.vlgmr.msrb.gmra.mxu2 %v7968_v10 }
 0x29b   : > { %2945 = vmatmul.bf16.vlgmr.msrb.gmra.mxu3 %v7968_v10  ;;  %2954 = vmatpush.bf16.msra.mxu1 %v4659_v35  ;;  %v4740_v35 = vld [vmem:[%s8871_s3 + $0x268] sm:$0xf0] }
 0x29c   : > { %2967 = vmatpush.bf16.msra.mxu2 %v4663_v37  ;;  %2980 = vmatpush.bf16.msra.mxu3 %v4667_v30  ;;  %v4735_v37 = vor.u32 %v5537_v19, %v4732_v39  ;;  %v4739_v30 = vor.u32 %v5546_v57, %v4738_v58  ;;  %v4743_v22 = vor.u32 %v5538_v54, %v4740_v35  ;;  %v4810_v39 = vld [vmem:[%s8871_s3 + $0x2b0] sm:$0xf]  ;;  %v5555_v57 = vld [vmem:[%s8871_s3 + $0x2b4] sm:$0xf]  ;;  %v4818_v35 = vld [vmem:[%s8871_s3 + $0x2b8] sm:$0xf] }
 0x29d   : > { %v4879_v19 = vor.u32 %v5571_v0, %v4876_v23  ;;  %v5563_v58 = vld [vmem:[%s8871_s3 + $0x2ec] sm:$0xf0]  ;;  %v4812_v54 = vld [vmem:[%s8871_s3 + $0x2f0] sm:$0xf0] }
 0x29f   : > { %2955 = vmatpush.bf16.msra.mxu1 %v4595_v36  ;;  %v4671_v36 = vor.u32 %v5521_v59, %v4668_v25  ;;  %v4815_v59 = vor.u32 %v5555_v57, %v4812_v54  ;;  %v4746_v25 = vld [vmem:[%s8871_s3 + $0x230] sm:$0xf]  ;;  %v5556_v57 = vld [vmem:[%s8871_s3 + $0x2bc] sm:$0xf] }
 0x2a0   : > { %2968 = vmatpush.bf16.msra.mxu2 %v4599_v3  ;;  %2981 = vmatpush.bf16.msra.mxu3 %v4603_v48  ;;  %v4675_v3 = vor.u32 %v5530_v38, %v4674_v12  ;;  %v5505_v48 = vld [vmem:[%s8871_s3 + $0x124] sm:$0xf]  ;;  %v5547_v12 = vld [vmem:[%s8871_s3 + $0x26c] sm:$0xf0]  ;;  %v5539_v38 = vld [vmem:[%s8871_s3 + $0x234] sm:$0xf] }
 0x2a1   : > { %v4820_v54 = vld [vmem:[%s8871_s3 + $0x2f8] sm:$0xf0] }
 0x2a3   : > { %2956 = vmatpush.bf16.msra.mxu1 %v4531_v21  ;;  %v4607_v21 = vor.u32 %v5505_v48, %v4604_v9  ;;  %v4751_v48 = vor.u32 %v5539_v38, %v4748_v62  ;;  %v4682_v9 = vld [vmem:[%s8871_s3 + $0x1b0] sm:$0xf]  ;;  %v5609_v38 = vld [vmem:[%s8873_s5 + $0x60] sm:$0xff]  ;;  %v5524_v62 = vld [vmem:[%s8871_s3 + $0x1bc] sm:$0xf] }
 0x2a4   : > { %2969 = vmatpush.bf16.msra.mxu2 %v4535_v56  ;;  %2982 = vmatpush.bf16.msra.mxu3 %v4539_v31  ;;  %v5489_v56 = vld [vmem:[%s8871_s3 + $0xa4] sm:$0xf]  ;;  %v4615_v31 = vor.u32 %v5506_v2, %v4612_v26  ;;  %v4684_v2 = vld [vmem:[%s8871_s3 + $0x1f0] sm:$0xf0]  ;;  %v4690_v26 = vld [vmem:[%s8871_s3 + $0x1b8] sm:$0xf] }
 0x2a5   : > { %v4543_v52 = vor.u32 %v5489_v56, %v4540_v60  ;;  %v4687_v56 = vor.u32 %v5523_v33, %v4684_v2  ;;  %v4618_v60 = vld [vmem:[%s8871_s3 + $0x130] sm:$0xf] }
 0x2a6   : > { %v5599_v33 = vld [vmem:[%s8873_s5 + $0x10] sm:$0xff] }
 0x2a7   : > { %2957 = vmatpush.bf16.msra.mxu1 %v4467_v63  ;;  %v4476_v63 = vld [vmem:[%s8871_s3 + $0x60] sm:$0xf0]  ;;  %v5607_v2 = vld [vmem:[%s8873_s5 + $0x50] sm:$0xff] }
 0x2a8   : > { %2970 = vmatpush.bf16.msra.mxu2 %v4471_v29  ;;  %2983 = vmatpush.bf16.msra.mxu3 %v4475_v46  ;;  %v5482_v29 = vld [vmem:[%s8871_s3 + $0x64] sm:$0xf0]  ;;  %v5474_v46 = vld [vmem:[%s8871_s3 + $0x2c] sm:$0xf]  ;;  %v4479_v15 = vor.u32 %v5473_v47, %v4476_v63  ;;  %v4627_v47 = vor.u32 %v5516_v34, %v4626_v11  ;;  %v4554_v63 = vld [vmem:[%s8871_s3 + $0xb0] sm:$0xf] }
 0x2a9   : > { %v4483_v20 = vor.u32 %v5482_v29, %v4482_v5  ;;  %v5499_v5 = vld [vmem:[%s8871_s3 + $0xec] sm:$0xf0]  ;;  %v4556_v29 = vld [vmem:[%s8871_s3 + $0xf0] sm:$0xf0]  ;;  %v5605_v34 = vld [vmem:[%s8873_s5 + $0x40] sm:$0xff] }
 0x2aa   : > { %2958 = vmatmul.bf16.vlgmr.msra.gmra.mxu1 %v7968_v10  ;;  %v5663_v11 = vld [vmem:[%s8873_s5 + $0x210] sm:$0xff] }
 0x2ab   : > { %2989 = vmatpush.bf16.msrb.mxu1 %v4927_v1  ;;  %2971 = vmatmul.bf16.vlgmr.msra.gmra.mxu2 %v7968_v10  ;;  %v4484_v1 = vld [vmem:[%s8871_s3 + $0x68] sm:$0xf0] }
 0x2ac   : > { %3002 = vmatpush.bf16.msrb.mxu2 %v4931_v7  ;;  %3015 = vmatpush.bf16.msrb.mxu3 %v4935_v41  ;;  %v4938_v7 = vld [vmem:[%s8871_s3 + $0x3b0] sm:$0xf]  ;;  %v5587_v41 = vld [vmem:[%s8871_s3 + $0x3b4] sm:$0xf] }
 0x2ad   : > { %2984 = vmatmul.bf16.vlgmr.msra.gmra.mxu3 %v7968_v10  ;;  %v4943_v53 = vor.u32 %v5587_v41, %v4940_v43  ;;  %v4490_v43 = vld [vmem:[%s8871_s3 + $0x30] sm:$0xf] }
 0x2af   : > { %2990 = vmatpush.bf16.msrb.mxu1 %v4863_v49  ;;  %v4487_v49 = vor.u32 %v5474_v46, %v4484_v1  ;;  %v4562_v46 = vld [vmem:[%s8871_s3 + $0xb8] sm:$0xf] }
 0x2b0   : > { %3003 = vmatpush.bf16.msrb.mxu2 %v4867_v61  ;;  %3016 = vmatpush.bf16.msrb.mxu3 %v4871_v14  ;;  %v4939_v61 = vor.u32 %v5595_v18, %v4938_v7  ;;  %v4947_v14 = vor.u32 %v5596_v16, %v4946_v24  ;;  %v5500_v1 = vld [vmem:[%s8871_s3 + $0xf4] sm:$0xf0]  ;;  %v4555_v7 = vor.u32 %v5499_v5, %v4554_v63  ;;  %v5483_v24 = vld [vmem:[%s8871_s3 + $0x6c] sm:$0xf0]  ;;  %v5475_v16 = vld [vmem:[%s8871_s3 + $0x34] sm:$0xf] }
 0x2b1   : > { %v4563_v41 = vor.u32 %v5500_v1, %v4562_v46  ;;  %v5619_v63 = vld [vmem:[%s8873_s5 + $0xb0] sm:$0xff]  ;;  %v8522_v5 = vld [vmem:[%s8872_s4] sm:$0xff]  ;;  %v5618_v1 = vld [vmem:[%s8873_s5 + $0xa8] sm:$0xff] }
 0x2b2   : > { %v2840_v46 = vperm.slane %v8522_v5, 0 }
 0x2b3   : > { %2991 = vmatpush.bf16.msrb.mxu1 %v4799_v27  ;;  %v5580_v27 = vld [vmem:[%s8871_s3 + $0x374] sm:$0xf0] }
 0x2b4   : > { %3004 = vmatpush.bf16.msrb.mxu2 %v4803_v42  ;;  %3017 = vmatpush.bf16.msrb.mxu3 %v4807_v32  ;;  %v4875_v42 = vor.u32 %v5579_v13, %v4874_v50  ;;  %v4883_v32 = vor.u32 %v5580_v27, %v4882_v4  ;;  %v4491_v50 = vor.u32 %v5483_v24, %v4490_v43  ;;  %v5604_v4 = vld [vmem:[%s8873_s5 + $0x38] sm:$0xff] }
 0x2b5   : > { %v5612_v27 = vld [vmem:[%s8873_s5 + $0x78] sm:$0xff] }
 0x2b7   : > { %2992 = vmatpush.bf16.msrb.mxu1 %v4735_v37  ;;  %v5564_v37 = vld [vmem:[%s8871_s3 + $0x2f4] sm:$0xf0] }
 0x2b8   : > { %3005 = vmatpush.bf16.msrb.mxu2 %v4739_v30  ;;  %3018 = vmatpush.bf16.msrb.mxu3 %v4743_v22  ;;  %v4811_v30 = vor.u32 %v5563_v58, %v4810_v39  ;;  %v4819_v22 = vor.u32 %v5564_v37, %v4818_v35  ;;  %v5603_v39 = vld [vmem:[%s8873_s5 + $0x30] sm:$0xff]  ;;  %v4823_v35 = vor.u32 %v5556_v57, %v4820_v54  ;;  %v5602_v37 = vld [vmem:[%s8873_s5 + $0x28] sm:$0xff]  ;;  %v2843_v57 = vperm.slane %v8522_v5, 3  ;;  %v5661_v54 = vld [vmem:[%s8873_s5 + $0x200] sm:$0xff] }
 0x2b9   : > { %v5611_v58 = vld [vmem:[%s8873_s5 + $0x70] sm:$0xff] }
 0x2bb   : > { %2993 = vmatpush.bf16.msrb.mxu1 %v4671_v36  ;;  %v5548_v36 = vld [vmem:[%s8871_s3 + $0x274] sm:$0xf0] }
 0x2bc   : > { %3006 = vmatpush.bf16.msrb.mxu2 %v4675_v3  ;;  %3019 = vmatpush.bf16.msrb.mxu3 %v4679_v40  ;;  %v4747_v3 = vor.u32 %v5547_v12, %v4746_v25  ;;  %v4755_v40 = vor.u32 %v5548_v36, %v4754_v17  ;;  %v5601_v12 = vld [vmem:[%s8873_s5 + $0x20] sm:$0xff]  ;;  %v4692_v17 = vld [vmem:[%s8871_s3 + $0x1f8] sm:$0xf0] }
 0x2bd   : > { %v4695_v36 = vor.u32 %v5524_v62, %v4692_v17  ;;  %v5613_v62 = vld [vmem:[%s8873_s5 + $0x80] sm:$0xff] }
 0x2bf   : > { %2994 = vmatpush.bf16.msrb.mxu1 %v4607_v21  ;;  %v5532_v21 = vld [vmem:[%s8871_s3 + $0x1f4] sm:$0xf0] }
 0x2c0   : > { %3007 = vmatpush.bf16.msrb.mxu2 %v4611_v51  ;;  %3020 = vmatpush.bf16.msrb.mxu3 %v4615_v31  ;;  %v4683_v51 = vor.u32 %v5531_v44, %v4682_v9  ;;  %v4691_v31 = vor.u32 %v5532_v21, %v4690_v26  ;;  %v4628_v9 = vld [vmem:[%s8871_s3 + $0x178] sm:$0xf0] }
 0x2c1   : > { %v5492_v26 = vld [vmem:[%s8871_s3 + $0xbc] sm:$0xf] }
 0x2c2   : > { %v4564_v21 = vld [vmem:[%s8871_s3 + $0xf8] sm:$0xf0] }
 0x2c3   : > { %2995 = vmatpush.bf16.msrb.mxu1 %v4543_v52  ;;  %v4619_v52 = vor.u32 %v5515_v28, %v4618_v60  ;;  %v5476_v60 = vld [vmem:[%s8871_s3 + $0x3c] sm:$0xf] }
 0x2c4   : > { %3008 = vmatpush.bf16.msrb.mxu2 %v4547_v55  ;;  %3021 = vmatpush.bf16.msrb.mxu3 %v4551_v45  ;;  %v4623_v55 = vor.u32 %v5507_v6, %v4620_v8  ;;  %v5491_v45 = vld [vmem:[%s8871_s3 + $0xb4] sm:$0xf]  ;;  %v4500_v28 = vld [vmem:[%s8871_s3 + $0x78] sm:$0xf0]  ;;  %v5597_v8 = vld [vmem:[%s8873_s5] sm:$0xff] }
 0x2c5   : > { %v4559_v18 = vor.u32 %v5491_v45, %v4556_v29  ;;  %v4503_v6 = vor.u32 %v5476_v60, %v4500_v28  ;;  %v5627_v45 = vld [vmem:[%s8873_s5 + $0xf0] sm:$0xff] }
 0x2c6   : > { %v5635_v29 = vld [vmem:[%s8873_s5 + $0x130] sm:$0xff] }
 0x2c7   : > { %2996 = vmatpush.bf16.msrb.mxu1 %v4479_v15  ;;  %v4492_v15 = vld [vmem:[%s8871_s3 + $0x70] sm:$0xf0] }
 0x2c8   : > { %3009 = vmatpush.bf16.msrb.mxu2 %v4483_v20  ;;  %3022 = vmatpush.bf16.msrb.mxu3 %v4487_v49  ;;  %v4498_v20 = vld [vmem:[%s8871_s3 + $0x38] sm:$0xf]  ;;  %v4495_v13 = vor.u32 %v5475_v16, %v4492_v15  ;;  %v5625_v16 = vld [vmem:[%s8873_s5 + $0xe0] sm:$0xff]  ;;  %v5643_v60 = vld [vmem:[%s8873_s5 + $0x170] sm:$0xff] }
 0x2c9   : > { %v5484_v49 = vld [vmem:[%s8871_s3 + $0x74] sm:$0xf0]  ;;  %v5633_v15 = vld [vmem:[%s8873_s5 + $0x120] sm:$0xff]  ;;  %v5651_v28 = vld [vmem:[%s8873_s5 + $0x1b0] sm:$0xff] }
 0x2ca   : > { %2997 = vmatmul.bf16.vlgmr.msrb.gmra.mxu1 %v7968_v10  ;;  %v4499_v0 = vor.u32 %v5484_v49, %v4498_v20  ;;  %v2841_v20 = vperm.slane %v8522_v5, 1 }
 0x2cb   : > { %3028 = vmatpush.bf16.msra.mxu1 %v4939_v61  ;;  %3010 = vmatmul.bf16.vlgmr.msrb.gmra.mxu2 %v7968_v10  ;;  %v5588_v61 = vld [vmem:[%s8871_s3 + $0x3bc] sm:$0xf] }
 0x2cc   : > { %3041 = vmatpush.bf16.msra.mxu2 %v4943_v53  ;;  %3054 = vmatpush.bf16.msra.mxu3 %v4947_v14  ;;  %v4948_v53 = vld [vmem:[%s8871_s3 + $0x3f8] sm:$0xf0] }
 0x2cd   : > { %3023 = vmatmul.bf16.vlgmr.msrb.gmra.mxu3 %v7968_v10  ;;  %v5664_v14 = vld [vmem:[%s8873_s5 + $0x218] sm:$0xff]  ;;  %v4951_v23 = vor.u32 %v5588_v61, %v4948_v53 }
 0x2ce   : > { %4245 = vmatpush.bf16.msrb.mxu0 %v5664_v14  ;;  %v5616_v53 = vld [vmem:[%s8873_s5 + $0x98] sm:$0xff] }
 0x2cf   : > { %3029 = vmatpush.bf16.msra.mxu1 %v4875_v42  ;;  %v5572_v42 = vld [vmem:[%s8871_s3 + $0x33c] sm:$0xf] }
 0x2d0   : > { %3042 = vmatpush.bf16.msra.mxu2 %v4879_v19  ;;  %3055 = vmatpush.bf16.msra.mxu3 %v4883_v32  ;;  %v4884_v19 = vld [vmem:[%s8871_s3 + $0x378] sm:$0xf0] }
 0x2d1   : > { %v4887_v32 = vor.u32 %v5572_v42, %v4884_v19  ;;  %v5615_v42 = vld [vmem:[%s8873_s5 + $0x90] sm:$0xff] }
 0x2d2   : > { %4246 = vmatpush.bf16.msrb.mxu0 %v5663_v11 }
 0x2d3   : > { %3030 = vmatpush.bf16.msra.mxu1 %v4811_v30  ;;  %v5610_v30 = vld [vmem:[%s8873_s5 + $0x68] sm:$0xff] }
 0x2d4   : > { %3043 = vmatpush.bf16.msra.mxu2 %v4815_v59  ;;  %3056 = vmatpush.bf16.msra.mxu3 %v4819_v22  ;;  %v5540_v59 = vld [vmem:[%s8871_s3 + $0x23c] sm:$0xf] }
 0x2d5   : > { %v4756_v22 = vld [vmem:[%s8871_s3 + $0x278] sm:$0xf0] }
 0x2d6   : > { %v4759_v25 = vor.u32 %v5540_v59, %v4756_v22  ;;  %v5622_v22 = vld [vmem:[%s8873_s5 + $0xc8] sm:$0xff] }
 0x2d7   : > { %3031 = vmatpush.bf16.msra.mxu1 %v4747_v3  ;;  %v5600_v3 = vld [vmem:[%s8873_s5 + $0x18] sm:$0xff] }
 0x2d8   : > { %3044 = vmatpush.bf16.msra.mxu2 %v4751_v48  ;;  %3057 = vmatpush.bf16.msra.mxu3 %v4755_v40  ;;  %v5608_v48 = vld [vmem:[%s8873_s5 + $0x58] sm:$0xff] }
 0x2d9   : > { %v5508_v40 = vld [vmem:[%s8871_s3 + $0x13c] sm:$0xf] }
 0x2da   : > { %v4631_v44 = vor.u32 %v5508_v40, %v4628_v9  ;;  %v2844_v40 = vperm.slane %v8522_v5, 4  ;;  %v5644_v9 = vld [vmem:[%s8873_s5 + $0x178] sm:$0xff] }
 0x2db   : > { %3032 = vmatpush.bf16.msra.mxu1 %v4683_v51  ;;  %v4567_v51 = vor.u32 %v5492_v26, %v4564_v21 }
 0x2dc   : > { %3045 = vmatpush.bf16.msra.mxu2 %v4687_v56  ;;  %3058 = vmatpush.bf16.msra.mxu3 %v4691_v31  ;;  %v5598_v56 = vld [vmem:[%s8873_s5 + $0x8] sm:$0xff] }
 0x2dd   : > { %v5606_v31 = vld [vmem:[%s8873_s5 + $0x48] sm:$0xff] }
 0x2df   : > { %3033 = vmatpush.bf16.msra.mxu1 %v4619_v52  ;;  %v5620_v52 = vld [vmem:[%s8873_s5 + $0xb8] sm:$0xff] }
 0x2e0   : > { %3046 = vmatpush.bf16.msra.mxu2 %v4623_v55  ;;  %3059 = vmatpush.bf16.msra.mxu3 %v4627_v47  ;;  %v5628_v55 = vld [vmem:[%s8873_s5 + $0xf8] sm:$0xff] }
 0x2e1   : > { %v5636_v47 = vld [vmem:[%s8873_s5 + $0x138] sm:$0xff] }
 0x2e3   : > { %3034 = vmatpush.bf16.msra.mxu1 %v4555_v7  ;;  %v5626_v7 = vld [vmem:[%s8873_s5 + $0xe8] sm:$0xff] }
 0x2e4   : > { %3047 = vmatpush.bf16.msra.mxu2 %v4559_v18  ;;  %3060 = vmatpush.bf16.msra.mxu3 %v4563_v41  ;;  %v5634_v18 = vld [vmem:[%s8873_s5 + $0x128] sm:$0xff] }
 0x2e7   : > { %3035 = vmatpush.bf16.msra.mxu1 %v4491_v50 }
 0x2e8   : > { %3048 = vmatpush.bf16.msra.mxu2 %v4495_v13  ;;  %3061 = vmatpush.bf16.msra.mxu3 %v4499_v0  ;;  %v5624_v13 = vld [vmem:[%s8873_s5 + $0xd8] sm:$0xff] }
 0x2e9   : > { %v5632_v0 = vld [vmem:[%s8873_s5 + $0x118] sm:$0xff] }
 0x2ea   : > { %3036 = vmatmul.bf16.vlgmr.msra.gmra.mxu1 %v7968_v10 }
 0x2eb   : > { %3067 = vmatpush.bf16.msrb.mxu1 %v4951_v23  ;;  %3049 = vmatmul.bf16.vlgmr.msra.gmra.mxu2 %v7968_v10 }
 0x2ec   : > { %4137 = vmatpush.bf16.msrb.mxu2 %v5604_v4  ;;  %4150 = vmatpush.bf16.msrb.mxu3 %v5612_v27  ;;  %v5662_v27 = vld [vmem:[%s8873_s5 + $0x208] sm:$0xff] }
 0x2ed   : > { %3062 = vmatmul.bf16.vlgmr.msra.gmra.mxu3 %v7968_v10  ;;  %4247 = vmatpush.bf16.msrb.mxu0 %v5662_v27 }
 0x2ef   : > { %3068 = vmatpush.bf16.msrb.mxu1 %v4887_v32  ;;  %v2842_v32 = vperm.slane %v8522_v5, 2 }
 0x2f0   : > { %4138 = vmatpush.bf16.msrb.mxu2 %v5603_v39  ;;  %4151 = vmatpush.bf16.msrb.mxu3 %v5611_v58  ;;  %v5623_v39 = vld [vmem:[%s8873_s5 + $0xd0] sm:$0xff] }
 0x2f1   : > { %v5631_v58 = vld [vmem:[%s8873_s5 + $0x110] sm:$0xff]  ;;  %4248 = vmatpush.bf16.msrb.mxu0 %v5661_v54 }
 0x2f3   : > { %3069 = vmatpush.bf16.msrb.mxu1 %v4823_v35 }
 0x2f4   : > { %4139 = vmatpush.bf16.msrb.mxu2 %v5602_v37  ;;  %4152 = vmatpush.bf16.msrb.mxu3 %v5610_v30  ;;  %v5614_v37 = vld [vmem:[%s8873_s5 + $0x88] sm:$0xff] }
 0x2f7   : > { %3070 = vmatpush.bf16.msrb.mxu1 %v4759_v25  ;;  %v5630_v25 = vld [vmem:[%s8873_s5 + $0x108] sm:$0xff] }
 0x2f8   : > { %4140 = vmatpush.bf16.msrb.mxu2 %v5601_v12  ;;  %4153 = vmatpush.bf16.msrb.mxu3 %v5609_v38 }
 0x2fb   : > { %3071 = vmatpush.bf16.msrb.mxu1 %v4695_v36 }
 0x2fc   : > { %4141 = vmatpush.bf16.msrb.mxu2 %v5600_v3  ;;  %4154 = vmatpush.bf16.msrb.mxu3 %v5608_v48  ;;  %v5621_v3 = vld [vmem:[%s8873_s5 + $0xc0] sm:$0xff] }
 0x2fd   : > { %v5629_v48 = vld [vmem:[%s8873_s5 + $0x100] sm:$0xff] }
 0x2ff   : > { %3072 = vmatpush.bf16.msrb.mxu1 %v4631_v44  ;;  %v5652_v44 = vld [vmem:[%s8873_s5 + $0x1b8] sm:$0xff] }
 0x300   : > { %4142 = vmatpush.bf16.msrb.mxu2 %v5599_v33  ;;  %4155 = vmatpush.bf16.msrb.mxu3 %v5607_v2  ;;  %v5660_v33 = vld [vmem:[%s8873_s5 + $0x1f8] sm:$0xff] }
 0x303   : > { %3073 = vmatpush.bf16.msrb.mxu1 %v4567_v51 }
 0x304   : > { %4143 = vmatpush.bf16.msrb.mxu2 %v5598_v56  ;;  %4156 = vmatpush.bf16.msrb.mxu3 %v5606_v31 }
 0x307   : > { %3074 = vmatpush.bf16.msrb.mxu1 %v4503_v6  ;;  %v2881_v41 = vpop.f32.mrf.mxu1 }
 0x308   : > { %4144 = vmatpush.bf16.msrb.mxu2 %v5597_v8  ;;  %4157 = vmatpush.bf16.msrb.mxu3 %v5605_v34  ;;  %v2882_v43 = vadd.f32 %v2881_v41, %v2840_v46  ;;  %v5659_v8 = vld [vmem:[%s8873_s5 + $0x1f0] sm:$0xff]  ;;  %v5642_v34 = vld [vmem:[%s8873_s5 + $0x168] sm:$0xff]  ;;  %v5649_v46 = vld [vmem:[%s8873_s5 + $0x1a0] sm:$0xff] }
 0x309   : > { %v5648_v41 = vld [vmem:[%s8873_s5 + $0x198] sm:$0xff] }
 0x30a   : > { %3075 = vmatmul.bf16.vlgmr.msrb.gmra.mxu1 %v7968_v10  ;;  %v5617_v10 = vld [vmem:[%s8873_s5 + $0xa0] sm:$0xff]  ;;  %v3080_v24 = vmax.f32 %v2882_v43, 0.0 }
 0x30b   : > { %4163 = vmatpush.bf16.msra.mxu1 %v5620_v52  ;;  %v5650_v52 = vld [vmem:[%s8873_s5 + $0x1a8] sm:$0xff] }
 0x30c   : > { %4176 = vmatpush.bf16.msra.mxu2 %v5628_v55  ;;  %4189 = vmatpush.bf16.msra.mxu3 %v5636_v47  ;;  %v3096_v49 = vpack.c.bf16 %v3080_v24, %v3080_v24  ;;  %v5658_v55 = vld [vmem:[%s8873_s5 + $0x1e8] sm:$0xff]  ;;  %v5656_v24 = vld [vmem:[%s8873_s5 + $0x1d8] sm:$0xff] }
 0x30d   : > { %v2894_v61 = vpop.f32.mrf.mxu2 }
 0x30e   : > { %v2895_v14 = vadd.f32 %v2894_v61, %v2841_v20  ;;  %v2907_v50 = vpop.f32.mrf.mxu3  ;;  %4145 = vmatmul.bf16.vlgmr.msrb.gmra.mxu2 %v3096_v49  ;;  %v5639_v61 = vld [vmem:[%s8873_s5 + $0x150] sm:$0xff] }
 0x30f   : > { %4164 = vmatpush.bf16.msra.mxu1 %v5619_v63  ;;  %v2883_v23 = vpop.f32.mrf.mxu1  ;;  %v2908_v30 = vadd.f32 %v2907_v50, %v2842_v32  ;;  %v2846_v50 = vperm.slane %v8522_v5, 6  ;;  %v5698_v32 = vld [vmem:[%s8873_s5 + $0x328] sm:$0xff] }
 0x310   : > { %4177 = vmatpush.bf16.msra.mxu2 %v5627_v45  ;;  %4190 = vmatpush.bf16.msra.mxu3 %v5635_v29  ;;  %v3081_v4 = vmax.f32 %v2895_v14, 0.0  ;;  %v5641_v29 = vld [vmem:[%s8873_s5 + $0x160] sm:$0xff]  ;;  %v2845_v14 = vperm.slane %v8522_v5, 5  ;;  %v2847_v23 = vperm.slane %v8522_v5, 7  ;;  %v5654_v5 = vld [vmem:[%s8873_s5 + $0x1c8] sm:$0xff] }
 0x311   : > { %v3082_v17 = vmax.f32 %v2908_v30, 0.0  ;;  %v5645_v30 = vld [vmem:[%s8873_s5 + $0x180] sm:$0xff] }
 0x312   : > { %v3097_v19 = vpack.c.bf16 %v3081_v4, %v3081_v4 }
 0x313   : > { %4165 = vmatpush.bf16.msra.mxu1 %v5618_v1  ;;  %v3098_v21 = vpack.c.bf16 %v3082_v17, %v3082_v17  ;;  %v5657_v1 = vld [vmem:[%s8873_s5 + $0x1e0] sm:$0xff]  ;;  %v5684_v17 = vld [vmem:[%s8873_s5 + $0x2b8] sm:$0xff] }
 0x314   : > { %4178 = vmatpush.bf16.msra.mxu2 %v5626_v7  ;;  %4191 = vmatpush.bf16.msra.mxu3 %v5634_v18  ;;  %v8635_v7 = vld [vmem:[%s8872_s4 + $0x8] sm:$0xff]  ;;  %v5640_v18 = vld [vmem:[%s8873_s5 + $0x158] sm:$0xff] }
 0x315   : > { %4158 = vmatmul.bf16.vlgmr.msrb.gmra.mxu3 %v3097_v19  ;;  %v2896_v35 = vpop.f32.mrf.mxu2  ;;  %v2848_v43 = vperm.slane %v8635_v7, 0  ;;  %v5646_v19 = vld [vmem:[%s8873_s5 + $0x188] sm:$0xff] }
 0x316   : > { %v2909_v59 = vpop.f32.mrf.mxu3 }
 0x317   : > { %4166 = vmatpush.bf16.msra.mxu1 %v5617_v10  ;;  %v2920_v12 = vpop.f32.mrf.mxu1  ;;  %v5700_v10 = vld [vmem:[%s8873_s5 + $0x338] sm:$0xff]  ;;  %v5697_v59 = vld [vmem:[%s8873_s5 + $0x320] sm:$0xff] }
 0x318   : > { %4179 = vmatpush.bf16.msra.mxu2 %v5625_v16  ;;  %4192 = vmatpush.bf16.msra.mxu3 %v5633_v15  ;;  %v2921_v38 = vadd.f32 %v2920_v12, %v2843_v57  ;;  %v5653_v12 = vld [vmem:[%s8873_s5 + $0x1c0] sm:$0xff] }
 0x319   : > { %4293 = vmatpush.bf16.msra.mxu0 %v5700_v10  ;;  %v5670_v10 = vld [vmem:[%s8873_s5 + $0x248] sm:$0xff] }
 0x31a   : > { %v3083_v36 = vmax.f32 %v2921_v38, 0.0  ;;  %v5676_v38 = vld [vmem:[%s8873_s5 + $0x278] sm:$0xff] }
 0x31b   : > { %4167 = vmatpush.bf16.msra.mxu1 %v5616_v53  ;;  %v5647_v53 = vld [vmem:[%s8873_s5 + $0x190] sm:$0xff] }
 0x31c   : > { %4180 = vmatpush.bf16.msra.mxu2 %v5624_v13  ;;  %4193 = vmatpush.bf16.msra.mxu3 %v5632_v0  ;;  %v3099_v2 = vpack.c.bf16 %v3083_v36, %v3083_v36  ;;  %v5655_v13 = vld [vmem:[%s8873_s5 + $0x1d0] sm:$0xff]  ;;  %v5692_v36 = vld [vmem:[%s8873_s5 + $0x2f8] sm:$0xff] }
 0x31d   : > { %v2933_v26 = vpop.f32.mrf.mxu2  ;;  %v5699_v0 = vld [vmem:[%s8873_s5 + $0x330] sm:$0xff] }
 0x31e   : > { %v2934_v51 = vadd.f32 %v2933_v26, %v2844_v40  ;;  %v2946_v56 = vpop.f32.mrf.mxu3  ;;  %4294 = vmatpush.bf16.msra.mxu0 %v5699_v0  ;;  %v5695_v26 = vld [vmem:[%s8873_s5 + $0x310] sm:$0xff]  ;;  %v5685_v0 = vld [vmem:[%s8873_s5 + $0x2c0] sm:$0xff] }
 0x31f   : > { %4168 = vmatpush.bf16.msra.mxu1 %v5615_v42  ;;  %v2922_v31 = vpop.f32.mrf.mxu1  ;;  %v5638_v42 = vld [vmem:[%s8873_s5 + $0x148] sm:$0xff] }
 0x320   : > { %4181 = vmatpush.bf16.msra.mxu2 %v5623_v39  ;;  %4194 = vmatpush.bf16.msra.mxu3 %v5631_v58  ;;  %v3084_v6 = vmax.f32 %v2934_v51, 0.0  ;;  %v2947_v39 = vadd.f32 %v2946_v56, %v2845_v14  ;;  %v5682_v51 = vld [vmem:[%s8873_s5 + $0x2a8] sm:$0xff]  ;;  %v5669_v14 = vld [vmem:[%s8873_s5 + $0x240] sm:$0xff] }
 0x321   : > { %v5690_v56 = vld [vmem:[%s8873_s5 + $0x2e8] sm:$0xff] }
 0x322   : > { %v3100_v11 = vpack.c.bf16 %v3084_v6, %v3084_v6  ;;  %4295 = vmatpush.bf16.msra.mxu0 %v5698_v32  ;;  %v5694_v31 = vld [vmem:[%s8873_s5 + $0x308] sm:$0xff]  ;;  %v5681_v6 = vld [vmem:[%s8873_s5 + $0x2a0] sm:$0xff] }
 0x323   : > { %4169 = vmatpush.bf16.msra.mxu1 %v5614_v37  ;;  %v5637_v37 = vld [vmem:[%s8873_s5 + $0x140] sm:$0xff] }
 0x324   : > { %4182 = vmatpush.bf16.msra.mxu2 %v5622_v22  ;;  %4195 = vmatpush.bf16.msra.mxu3 %v5630_v25  ;;  %v3085_v22 = vmax.f32 %v2947_v39, 0.0 }
 0x325   : > { %v2935_v47 = vpop.f32.mrf.mxu2 }
 0x326   : > { %v2948_v63 = vpop.f32.mrf.mxu3  ;;  %4296 = vmatpush.bf16.msra.mxu0 %v5697_v59  ;;  %v5722_v59 = vld [vmem:[%s8873_s5 + $0x3e8] sm:$0xff] }
 0x327   : > { %4170 = vmatpush.bf16.msra.mxu1 %v5613_v62  ;;  %v2959_v45 = vpop.f32.mrf.mxu1 }
 0x328   : > { %4183 = vmatpush.bf16.msra.mxu2 %v5621_v3  ;;  %4196 = vmatpush.bf16.msra.mxu3 %v5629_v48  ;;  %v2960_v58 = vadd.f32 %v2959_v45, %v2846_v50  ;;  %v5696_v3 = vld [vmem:[%s8873_s5 + $0x318] sm:$0xff]  ;;  %v3101_v48 = vpack.c.bf16 %v3085_v22, %v3085_v22  ;;  %v5671_v45 = vld [vmem:[%s8873_s5 + $0x250] sm:$0xff] }
 0x32a   : > { %4171 = vmatmul.bf16.vlgmr.msra.gmra.mxu1 %v3098_v21  ;;  %v3086_v25 = vmax.f32 %v2960_v58, 0.0  ;;  %4297 = vmatpush.bf16.msra.mxu0 %v5696_v3  ;;  %v5674_v21 = vld [vmem:[%s8873_s5 + $0x268] sm:$0xff]  ;;  %v5712_v3 = vld [vmem:[%s8873_s5 + $0x398] sm:$0xff] }
 0x32b   : > { %4202 = vmatpush.bf16.msrb.mxu1 %v5644_v9  ;;  %4184 = vmatmul.bf16.vlgmr.msra.gmra.mxu2 %v3099_v2  ;;  %v5675_v9 = vld [vmem:[%s8873_s5 + $0x270] sm:$0xff] }
 0x32c   : > { %4215 = vmatpush.bf16.msrb.mxu2 %v5652_v44  ;;  %4228 = vmatpush.bf16.msrb.mxu3 %v5660_v33  ;;  %v3102_v40 = vpack.c.bf16 %v3086_v25, %v3086_v25  ;;  %v5683_v33 = vld [vmem:[%s8873_s5 + $0x2b0] sm:$0xff]  ;;  %v5705_v25 = vld [vmem:[%s8873_s5 + $0x360] sm:$0xff] }
 0x32d   : > { %4197 = vmatmul.bf16.vlgmr.msra.gmra.mxu3 %v3100_v11  ;;  %v5691_v2 = vld [vmem:[%s8873_s5 + $0x2f0] sm:$0xff]  ;;  %v5693_v11 = vld [vmem:[%s8873_s5 + $0x300] sm:$0xff] }
 0x32e   : > { %v2972_v16 = vpop.f32.mrf.mxu2  ;;  %4298 = vmatpush.bf16.msra.mxu0 %v5695_v26  ;;  %v5711_v26 = vld [vmem:[%s8873_s5 + $0x390] sm:$0xff] }
 0x32f   : > { %4203 = vmatpush.bf16.msrb.mxu1 %v5643_v60  ;;  %v2961_v49 = vpop.f32.mrf.mxu1  ;;  %v2973_v57 = vadd.f32 %v2972_v16, %v2847_v23  ;;  %v5673_v60 = vld [vmem:[%s8873_s5 + $0x260] sm:$0xff]  ;;  %v5678_v16 = vld [vmem:[%s8873_s5 + $0x288] sm:$0xff] }
 0x330   : > { %4216 = vmatpush.bf16.msrb.mxu2 %v5651_v28  ;;  %4229 = vmatpush.bf16.msrb.mxu3 %v5659_v8  ;;  %v2985_v15 = vpop.f32.mrf.mxu3  ;;  %v5689_v8 = vld [vmem:[%s8873_s5 + $0x2e0] sm:$0xff] }
 0x331   : > { %v2986_v20 = vadd.f32 %v2985_v15, %v2848_v43  ;;  %v3087_v62 = vmax.f32 %v2973_v57, 0.0  ;;  %v2851_v43 = vperm.slane %v8635_v7, 3  ;;  %v5686_v15 = vld [vmem:[%s8873_s5 + $0x2c8] sm:$0xff]  ;;  %v5715_v57 = vld [vmem:[%s8873_s5 + $0x3b0] sm:$0xff] }
 0x332   : > { %4299 = vmatpush.bf16.msra.mxu0 %v5694_v31  ;;  %v5702_v31 = vld [vmem:[%s8873_s5 + $0x348] sm:$0xff] }
 0x333   : > { %4204 = vmatpush.bf16.msrb.mxu1 %v5642_v34  ;;  %v3088_v4 = vmax.f32 %v2986_v20, 0.0  ;;  %v3103_v44 = vpack.c.bf16 %v3087_v62, %v3087_v62  ;;  %v5672_v34 = vld [vmem:[%s8873_s5 + $0x258] sm:$0xff]  ;;  %v5721_v62 = vld [vmem:[%s8873_s5 + $0x3e0] sm:$0xff] }
 0x334   : > { %4217 = vmatpush.bf16.msrb.mxu2 %v5650_v52  ;;  %4230 = vmatpush.bf16.msrb.mxu3 %v5658_v55  ;;  %v5680_v52 = vld [vmem:[%s8873_s5 + $0x298] sm:$0xff] }
 0x335   : > { %v3104_v27 = vpack.c.bf16 %v3088_v4, %v3088_v4  ;;  %v5688_v55 = vld [vmem:[%s8873_s5 + $0x2d8] sm:$0xff] }
 0x336   : > { %v2974_v54 = vpop.f32.mrf.mxu2  ;;  %4300 = vmatpush.bf16.msra.mxu0 %v5693_v11 }
 0x337   : > { %4205 = vmatpush.bf16.msrb.mxu1 %v5641_v29  ;;  %4249 = vmatmul.bf16.vlgmr.msrb.gmra.mxu0 %v3104_v27  ;;  %v2849_v29 = vperm.slane %v8635_v7, 1  ;;  %v5708_v27 = vld [vmem:[%s8873_s5 + $0x378] sm:$0xff]  ;;  %v5723_v54 = vld [vmem:[%s8873_s5 + $0x3f0] sm:$0xff] }
 0x338   : > { %4218 = vmatpush.bf16.msrb.mxu2 %v5649_v46  ;;  %4231 = vmatpush.bf16.msrb.mxu3 %v5657_v1  ;;  %v2987_v35 = vpop.f32.mrf.mxu3  ;;  %v5679_v1 = vld [vmem:[%s8873_s5 + $0x290] sm:$0xff] }
 0x339   : > { %v5706_v35 = vld [vmem:[%s8873_s5 + $0x368] sm:$0xff] }
 0x33b   : > { %4206 = vmatpush.bf16.msrb.mxu1 %v5640_v18  ;;  %v5687_v18 = vld [vmem:[%s8873_s5 + $0x2d0] sm:$0xff] }
 0x33c   : > { %4219 = vmatpush.bf16.msrb.mxu2 %v5648_v41  ;;  %4232 = vmatpush.bf16.msrb.mxu3 %v5656_v24  ;;  %v2850_v41 = vperm.slane %v8635_v7, 2 }
 0x33f   : > { %4207 = vmatpush.bf16.msrb.mxu1 %v5639_v61 }
 0x340   : > { %4220 = vmatpush.bf16.msrb.mxu2 %v5647_v53  ;;  %4233 = vmatpush.bf16.msrb.mxu3 %v5655_v13  ;;  %v5677_v13 = vld [vmem:[%s8873_s5 + $0x280] sm:$0xff] }
 0x343   : > { %4208 = vmatpush.bf16.msrb.mxu1 %v5638_v42  ;;  %v5716_v42 = vld [vmem:[%s8873_s5 + $0x3b8] sm:$0xff] }
 0x344   : > { %4221 = vmatpush.bf16.msrb.mxu2 %v5646_v19  ;;  %4234 = vmatpush.bf16.msrb.mxu3 %v5654_v5  ;;  %v5724_v19 = vld [vmem:[%s8873_s5 + $0x3f8] sm:$0xff]  ;;  %v5707_v5 = vld [vmem:[%s8873_s5 + $0x370] sm:$0xff] }
 0x347   : > { %4209 = vmatpush.bf16.msrb.mxu1 %v5637_v37  ;;  %v2998_v28 = vpop.f32.mrf.mxu1  ;;  %v5714_v37 = vld [vmem:[%s8873_s5 + $0x3a8] sm:$0xff] }
 0x348   : > { %4222 = vmatpush.bf16.msrb.mxu2 %v5645_v30  ;;  %4235 = vmatpush.bf16.msrb.mxu3 %v5653_v12  ;;  %v2999_v24 = vadd.f32 %v2998_v28, %v2849_v29  ;;  %v2852_v30 = vperm.slane %v8635_v7, 4  ;;  %v5713_v12 = vld [vmem:[%s8873_s5 + $0x3a0] sm:$0xff] }
 0x34a   : > { %4210 = vmatmul.bf16.vlgmr.msrb.gmra.mxu1 %v3101_v48  ;;  %v3089_v50 = vmax.f32 %v2999_v24, 0.0 }
 0x34b   : > { %4254 = vmatpush.bf16.msra.mxu1 %v5676_v38  ;;  %4223 = vmatmul.bf16.vlgmr.msrb.gmra.mxu2 %v3102_v40  ;;  %v5720_v40 = vld [vmem:[%s8873_s5 + $0x3d8] sm:$0xff] }
 0x34c   : > { %4267 = vmatpush.bf16.msra.mxu2 %v5684_v17  ;;  %4280 = vmatpush.bf16.msra.mxu3 %v5692_v36  ;;  %v3105_v32 = vpack.c.bf16 %v3089_v50, %v3089_v50  ;;  %v5704_v36 = vld [vmem:[%s8873_s5 + $0x358] sm:$0xff] }
 0x34d   : > { %4236 = vmatmul.bf16.vlgmr.msrb.gmra.mxu3 %v3103_v44 }
 0x34e   : > { %v3011_v47 = vpop.f32.mrf.mxu2 }
 0x34f   : > { %4255 = vmatpush.bf16.msra.mxu1 %v5675_v9  ;;  %v3000_v46 = vpop.f32.mrf.mxu1  ;;  %v3012_v20 = vadd.f32 %v3011_v47, %v2850_v41 }
 0x350   : > { %4268 = vmatpush.bf16.msra.mxu2 %v5683_v33  ;;  %4281 = vmatpush.bf16.msra.mxu3 %v5691_v2  ;;  %v3024_v63 = vpop.f32.mrf.mxu3  ;;  %v5703_v2 = vld [vmem:[%s8873_s5 + $0x350] sm:$0xff] }
 0x351   : > { %v3025_v49 = vadd.f32 %v3024_v63, %v2851_v43  ;;  %v3090_v23 = vmax.f32 %v3012_v20, 0.0 }
 0x353   : > { %4256 = vmatpush.bf16.msra.mxu1 %v5674_v21  ;;  %v3091_v4 = vmax.f32 %v3025_v49, 0.0  ;;  %v3106_v39 = vpack.c.bf16 %v3090_v23, %v3090_v23  ;;  %v2853_v21 = vperm.slane %v8635_v7, 5 }
 0x354   : > { %4269 = vmatpush.bf16.msra.mxu2 %v5682_v51  ;;  %4282 = vmatpush.bf16.msra.mxu3 %v5690_v56  ;;  %v2854_v51 = vperm.slane %v8635_v7, 6  ;;  %v5719_v56 = vld [vmem:[%s8873_s5 + $0x3d0] sm:$0xff] }
 0x355   : > { %v3107_v58 = vpack.c.bf16 %v3091_v4, %v3091_v4 }
 0x356   : > { %v3013_v61 = vpop.f32.mrf.mxu2 }
 0x357   : > { %4257 = vmatpush.bf16.msra.mxu1 %v5673_v60  ;;  %v5710_v60 = vld [vmem:[%s8873_s5 + $0x388] sm:$0xff] }
 0x358   : > { %4270 = vmatpush.bf16.msra.mxu2 %v5681_v6  ;;  %4283 = vmatpush.bf16.msra.mxu3 %v5689_v8  ;;  %v3026_v53 = vpop.f32.mrf.mxu3  ;;  %v5718_v8 = vld [vmem:[%s8873_s5 + $0x3c8] sm:$0xff] }
 0x35b   : > { %4258 = vmatpush.bf16.msra.mxu1 %v5672_v34 }
 0x35c   : > { %4271 = vmatpush.bf16.msra.mxu2 %v5680_v52  ;;  %4284 = vmatpush.bf16.msra.mxu3 %v5688_v55  ;;  %v5701_v52 = vld [vmem:[%s8873_s5 + $0x340] sm:$0xff] }
 0x35d   : > { %v5709_v55 = vld [vmem:[%s8873_s5 + $0x380] sm:$0xff] }
 0x35f   : > { %4259 = vmatpush.bf16.msra.mxu1 %v5671_v45  ;;  %v5717_v45 = vld [vmem:[%s8873_s5 + $0x3c0] sm:$0xff] }
 0x360   : > { %4272 = vmatpush.bf16.msra.mxu2 %v5679_v1  ;;  %4285 = vmatpush.bf16.msra.mxu3 %v5687_v18  ;;  %v2855_v1 = vperm.slane %v8635_v7, 7 }
 0x363   : > { %4260 = vmatpush.bf16.msra.mxu1 %v5670_v10 }
 0x364   : > { %4273 = vmatpush.bf16.msra.mxu2 %v5678_v16  ;;  %4286 = vmatpush.bf16.msra.mxu3 %v5686_v15  ;;  %v3368_v15 = vld [vmem:[%s8874_s6] sm:$0x1] }
 0x367   : > { %4261 = vmatpush.bf16.msra.mxu1 %v5669_v14  ;;  %v3037_v22 = vpop.f32.mrf.mxu1 }
 0x368   : > { %4274 = vmatpush.bf16.msra.mxu2 %v5677_v13  ;;  %4287 = vmatpush.bf16.msra.mxu3 %v5685_v0  ;;  %v3038_v38 = vadd.f32 %v3037_v22, %v2852_v30 }
 0x36a   : > { %4262 = vmatmul.bf16.vlgmr.msra.gmra.mxu1 %v3105_v32  ;;  %v3092_v17 = vmax.f32 %v3038_v38, 0.0 }
 0x36b   : > { %4306 = vmatpush.bf16.msrb.mxu1 %v5708_v27  ;;  %4275 = vmatmul.bf16.vlgmr.msra.gmra.mxu2 %v3106_v39 }
 0x36c   : > { %4319 = vmatpush.bf16.msrb.mxu2 %v5716_v42  ;;  %4332 = vmatpush.bf16.msrb.mxu3 %v5724_v19  ;;  %v3108_v48 = vpack.c.bf16 %v3092_v17, %v3092_v17 }
 0x36d   : > { %4288 = vmatmul.bf16.vlgmr.msra.gmra.mxu3 %v3107_v58 }
 0x36e   : > { %v3050_v9 = vpop.f32.mrf.mxu2  ;;  %4301 = vmatmul.bf16.vlgmr.msra.gmra.mxu0 %v3108_v48 }
 0x36f   : > { %4307 = vmatpush.bf16.msrb.mxu1 %v5707_v5  ;;  %v3039_v33 = vpop.f32.mrf.mxu1  ;;  %v3051_v28 = vadd.f32 %v3050_v9, %v2853_v21 }
 0x370   : > { %4320 = vmatpush.bf16.msrb.mxu2 %v5715_v57  ;;  %4333 = vmatpush.bf16.msrb.mxu3 %v5723_v54  ;;  %v3063_v44 = vpop.f32.mrf.mxu3 }
 0x371   : > { %v3064_v6 = vadd.f32 %v3063_v44, %v2854_v51  ;;  %v3093_v47 = vmax.f32 %v3051_v28, 0.0 }
 0x373   : > { %4308 = vmatpush.bf16.msrb.mxu1 %v5706_v35  ;;  %v3094_v63 = vmax.f32 %v3064_v6, 0.0  ;;  %v3109_v29 = vpack.c.bf16 %v3093_v47, %v3093_v47 }
 0x374   : > { %4321 = vmatpush.bf16.msrb.mxu2 %v5714_v37  ;;  %4334 = vmatpush.bf16.msrb.mxu3 %v5722_v59 }
 0x375   : > { %v3110_v46 = vpack.c.bf16 %v3094_v63, %v3094_v63 }
 0x376   : > { %v3052_v11 = vpop.f32.mrf.mxu2 }
 0x377   : > { %4309 = vmatpush.bf16.msrb.mxu1 %v5705_v25 }
 0x378   : > { %4322 = vmatpush.bf16.msrb.mxu2 %v5713_v12  ;;  %4335 = vmatpush.bf16.msrb.mxu3 %v5721_v62  ;;  %v3065_v34 = vpop.f32.mrf.mxu3 }
 0x37b   : > { %4310 = vmatpush.bf16.msrb.mxu1 %v5704_v36 }
 0x37c   : > { %4323 = vmatpush.bf16.msrb.mxu2 %v5712_v3  ;;  %4336 = vmatpush.bf16.msrb.mxu3 %v5720_v40 }
 0x37f   : > { %4311 = vmatpush.bf16.msrb.mxu1 %v5703_v2 }
 0x380   : > { %4324 = vmatpush.bf16.msrb.mxu2 %v5711_v26  ;;  %4337 = vmatpush.bf16.msrb.mxu3 %v5719_v56 }
 0x383   : > { %4312 = vmatpush.bf16.msrb.mxu1 %v5702_v31 }
 0x384   : > { %4325 = vmatpush.bf16.msrb.mxu2 %v5710_v60  ;;  %4338 = vmatpush.bf16.msrb.mxu3 %v5718_v8 }
 0x387   : > { %4313 = vmatpush.bf16.msrb.mxu1 %v5701_v52  ;;  %v3076_v18 = vpop.f32.mrf.mxu1 }
 0x388   : > { %4326 = vmatpush.bf16.msrb.mxu2 %v5709_v55  ;;  %4339 = vmatpush.bf16.msrb.mxu3 %v5717_v45  ;;  %v3077_v41 = vadd.f32 %v3076_v18, %v2855_v1 }
 0x38a   : > { %4314 = vmatmul.bf16.vlgmr.msrb.gmra.mxu1 %v3109_v29  ;;  %v3095_v43 = vmax.f32 %v3077_v41, 0.0 }
 0x38b   : > { %4327 = vmatmul.bf16.vlgmr.msrb.gmra.mxu2 %v3110_v46 }
 0x38c   : > { %v3111_v10 = vpack.c.bf16 %v3095_v43, %v3095_v43 }
 0x38e   : > { %4340 = vmatmul.bf16.vlgmr.msrb.gmra.mxu3 %v3111_v10 }
 0x38f   : > { %v3078_v24 = vpop.f32.mrf.mxu1 }
 0x391   : > { %v4146_v16 = vpop.f32.mrf.mxu2 }
 0x392   : > { %v4147_v20 = vadd.f32 %v4146_v16, %v3368_v15 }
 0x398   : > { %v4159_v49 = vpop.f32.mrf.mxu3 }
 0x399   : > { %v4160_v61 = vadd.f32 %v4159_v49, %v4147_v20  ;;  %v4148_v53 = vpop.f32.mrf.mxu2 }
 0x3a0   : > { %v4161_v13 = vpop.f32.mrf.mxu3 }
 0x3a7   : > { %v4172_v14 = vpop.f32.mrf.mxu1 }
 0x3a8   : > { %v4173_v50 = vadd.f32 %v4172_v14, %v4160_v61 }
 0x3ae   : > { %v4185_v0 = vpop.f32.mrf.mxu2 }
 0x3af   : > { %v4186_v7 = vadd.f32 %v4185_v0, %v4173_v50  ;;  %v4174_v23 = vpop.f32.mrf.mxu1 }
 0x3b0   : > { %v4198_v4 = vpop.f32.mrf.mxu3 }
 0x3b1   : > { %v4199_v27 = vadd.f32 %v4198_v4, %v4186_v7 }
 0x3b4   : > { %v4250_v32 = vpop.f32.mrf.mxu0 }
 0x3b6   : > { %v4187_v42 = vpop.f32.mrf.mxu2 }
 0x3b8   : > { %v4200_v19 = vpop.f32.mrf.mxu3 }
 0x3bc   : > { %v4252_v39 = vpop.f32.mrf.mxu0 }
 0x3c7   : > { %v4211_v58 = vpop.f32.mrf.mxu1 }
 0x3c8   : > { %v4212_v5 = vadd.f32 %v4211_v58, %v4199_v27 }
 0x3ce   : > { %v4224_v57 = vpop.f32.mrf.mxu2 }
 0x3cf   : > { %v4225_v54 = vadd.f32 %v4224_v57, %v4212_v5  ;;  %v4213_v37 = vpop.f32.mrf.mxu1 }
 0x3d0   : > { %v4237_v35 = vpop.f32.mrf.mxu3 }
 0x3d1   : > { %v4238_v30 = vadd.f32 %v4237_v35, %v4225_v54 }
 0x3d3   : > { %v4251_v59 = vadd.f32 %v4250_v32, %v4238_v30 }
 0x3d6   : > { %v4226_v22 = vpop.f32.mrf.mxu2 }
 0x3d8   : > { %v4239_v25 = vpop.f32.mrf.mxu3 }
 0x3e7   : > { %v4263_v12 = vpop.f32.mrf.mxu1 }
 0x3e8   : > { %v4264_v33 = vadd.f32 %v4263_v12, %v4251_v59 }
 0x3eb   : > { %v4302_v36 = vpop.f32.mrf.mxu0 }
 0x3ee   : > { %v4276_v38 = vpop.f32.mrf.mxu2 }
 0x3ef   : > { %v4265_v17 = vpop.f32.mrf.mxu1  ;;  %v4277_v26 = vadd.f32 %v4276_v38, %v4264_v33 }
 0x3f0   : > { %v4289_v62 = vpop.f32.mrf.mxu3 }
 0x3f1   : > { %v4290_v21 = vadd.f32 %v4289_v62, %v4277_v26 }
 0x3f3   : > { %v4304_v40 = vpop.f32.mrf.mxu0  ;;  %v4303_v56 = vadd.f32 %v4302_v36, %v4290_v21 }
 0x3f6   : > { %v4278_v3 = vpop.f32.mrf.mxu2 }
 0x3f8   : > { %v4291_v48 = vpop.f32.mrf.mxu3 }
 0x407   : > { %v4315_v9 = vpop.f32.mrf.mxu1 }
 0x408   : > { %v4316_v31 = vadd.f32 %v4315_v9, %v4303_v56 }
 0x40e   : > { %v4328_v44 = vpop.f32.mrf.mxu2 }
 0x40f   : > { %v4317_v2 = vpop.f32.mrf.mxu1  ;;  %v4329_v60 = vadd.f32 %v4328_v44, %v4316_v31 }
 0x411   : > { %v4341_v28 = vpop.f32.mrf.mxu3 }
 0x412   : > { %v4342_v6 = vadd.f32 %v4341_v28, %v4329_v60 }
 0x414   : > { %4345 = vst [vmem:[%s286_s22] sm:$0x1] %v4342_v6 }
 0x416   : > { %v4330_v51 = vpop.f32.mrf.mxu2 }
 0x419   : > { %v4343_v8 = vpop.f32.mrf.mxu3 }
 0x41a PF: > { %s17_s26 = sadd.s32 1, %s6422_s26   ;;  %s8876_s24 = smov %s6418_s25 }
 0x41b   : > { %p14_p5 = scmp.ge.s32.totalorder %s17_s26, 4   ;;  %s8877_s25 = smov %s8879_s27 }
 0x41d   :  { %16 = sbr.rel (!%p14_p5) target bundleno = 2 (0x2), region = 89 }

</bundles_post_ra>
